<compile_context>
chip_gen: v7x
topology: tpu7x:2x2x1
jax: 0.10.0
libtpu: 0.0.40
codegen_flags: <defaults>
</compile_context>

<pallas_src>
import functools

import jax
import jax.numpy as jnp
from jax.experimental import pallas as pl
from jax.experimental.pallas import tpu as pltpu


def _encoder_kernel(x_ref, w1_ref, b1_ref, w2_ref, b2_ref, w3_ref, b3_ref,
                    mu_ref, sigma_ref, *, z_dim):
    """Fused 3-layer MLP for one (TM, feature_dim) batch tile.

    All weights/biases are full-size VMEM blocks (no K or N tiling needed at
    these sizes), so there is no accumulator, no pl.when and no program_id.
    """
    # Layer 1: Linear(F, 1024) + ReLU   (f32 accumulation on the MXU)
    h = jnp.dot(x_ref[...], w1_ref[...], preferred_element_type=jnp.float32)
    h = jnp.maximum(h + b1_ref[...], 0.0)

    # Layer 2: Linear(1024, 1024) + ReLU
    h = jnp.dot(h.astype(w2_ref.dtype), w2_ref[...],
                preferred_element_type=jnp.float32)
    h = jnp.maximum(h + b2_ref[...], 0.0)

    # Layer 3: Linear(1024, 2*z_dim)
    p = jnp.dot(h.astype(w3_ref.dtype), w3_ref[...],
                preferred_element_type=jnp.float32)
    p = p + b3_ref[...]

    mu = p[:, :z_dim]
    s = p[:, z_dim:]
    # Numerically stable softplus(s) + 1e-7 (exp/log run on the EUP slot).
    sigma = jnp.maximum(s, 0.0) + jnp.log(1.0 + jnp.exp(-jnp.abs(s))) + 1e-7

    mu_ref[...] = mu.astype(mu_ref.dtype)
    sigma_ref[...] = sigma.astype(sigma_ref.dtype)


def _pick_tile_m(m):
    for c in (256, 128, 64, 32, 16, 8):
        if m % c == 0:
            return c
    return m  # fall back to the full (unblocked) batch dimension


def encoder_forward(x, params, z_dim):
    """Pallas forward of Encoder.  Returns (mu, sigma) of the Normal.

    `params` = (w1, b1, w2, b2, w3, b3), weights stored as (in_dim, out_dim).
    Weights may be float32 or bfloat16; biases stay float32.
    """
    w1, b1, w2, b2, w3, b3 = params
    xm = x.reshape(x.shape[0], -1).astype(w1.dtype)   # x.view(B, -1)
    M, F = xm.shape
    H1 = w1.shape[1]
    H2 = w2.shape[1]
    OUT = w3.shape[1]
    assert w1.shape == (F, H1) and w2.shape == (H1, H2) and w3.shape == (H2, OUT)
    assert OUT == 2 * z_dim

    # nn.Dropout(0.5) is identity in eval mode (inverted dropout) -> no-op.
    # TODO(synk): training-mode dropout (pltpu.prng_* masking) not implemented.

    TM = _pick_tile_m(M)
    grid = (M // TM,)

    kernel = functools.partial(_encoder_kernel, z_dim=z_dim)

    mu, sigma = pl.pallas_call(
        kernel,
        out_shape=(jax.ShapeDtypeStruct((M, z_dim), jnp.float32),
                   jax.ShapeDtypeStruct((M, z_dim), jnp.float32)),
        grid=grid,
        in_specs=[
            pl.BlockSpec((TM, F), lambda i: (i, 0)),     # x batch tile
            pl.BlockSpec((F, H1), lambda i: (0, 0)),     # w1 (resident)
            pl.BlockSpec((1, H1), lambda i: (0, 0)),     # b1
            pl.BlockSpec((H1, H2), lambda i: (0, 0)),    # w2 (resident)
            pl.BlockSpec((1, H2), lambda i: (0, 0)),     # b2
            pl.BlockSpec((H2, OUT), lambda i: (0, 0)),   # w3 (resident)
            pl.BlockSpec((1, OUT), lambda i: (0, 0)),    # b3
        ],
        out_specs=(pl.BlockSpec((TM, z_dim), lambda i: (i, 0)),
                   pl.BlockSpec((TM, z_dim), lambda i: (i, 0))),
        compiler_params=pltpu.CompilerParams(
            # M axis shards across TensorCores when the batch is large.
            dimension_semantics=("parallel",),
            # Keep an explicit cap with headroom so the same tiling is safe on
            # v7x's 64 MiB physical VMEM (weights double-buffered ~= 11 MB f32).
            vmem_limit_bytes=32 * 1024 * 1024,
        ),
    )(xm, w1, b1.reshape(1, H1), w2, b2.reshape(1, H2), w3, b3.reshape(1, OUT))

    # TODO(synk): Independent(Normal(mu, sigma), 1) distribution object has no
    # Pallas equivalent; returning its parameters instead.
    return mu, sigma


def _init_linear(key, in_dim, out_dim, dtype=jnp.float32):
    """PyTorch nn.Linear default init, stored pre-transposed (in, out)."""
    kw, kb = jax.random.split(key)
    bound = 1.0 / (in_dim ** 0.5)
    w = jax.random.uniform(kw, (in_dim, out_dim), jnp.float32, -bound, bound)
    b = jax.random.uniform(kb, (out_dim,), jnp.float32, -bound, bound)
    return w.astype(dtype), b   # biases stay f32 (added to the f32 accumulator)


def _reference_forward(x, params, z_dim):
    """Pure-JAX reference (same dtypes / accumulation as the kernel)."""
    w1, b1, w2, b2, w3, b3 = params
    xm = x.reshape(x.shape[0], -1).astype(w1.dtype)
    h1 = jax.nn.relu(jnp.dot(xm, w1, preferred_element_type=jnp.float32) + b1)
    h2 = jax.nn.relu(jnp.dot(h1.astype(w2.dtype), w2,
                             preferred_element_type=jnp.float32) + b2)
    p = jnp.dot(h2.astype(w3.dtype), w3, preferred_element_type=jnp.float32) + b3
    mu = p[:, :z_dim]
    sigma = jax.nn.softplus(p[:, z_dim:]) + 1e-7
    return mu, sigma


if __name__ == "__main__":
    # Small, lane-friendly shapes consistent with Encoder(feature_dim, z_dim):
    # x: (batch, 4, 8, 8) -> feature_dim = 256, hidden = 1024, z_dim = 64.
    batch, c, hh, ww = 8, 4, 8, 8
    feature_dim = c * hh * ww                # 256
    hidden = 1024
    z_dim = 64                               # final layer width = 2*z_dim = 128

    key = jax.random.PRNGKey(0)
    kx, k1, k2, k3 = jax.random.split(key, 4)

    x = jax.random.normal(kx, (batch, c, hh, ww), jnp.float32)

    # --- f32 weights: exact semantics of the PyTorch module -----------------
    w1, b1 = _init_linear(k1, feature_dim, hidden)
    w2, b2 = _init_linear(k2, hidden, hidden)
    w3, b3 = _init_linear(k3, hidden, 2 * z_dim)
    params = (w1, b1, w2, b2, w3, b3)

    mu, sigma = encoder_forward(x, params, z_dim)
    jax.block_until_ready((mu, sigma))

    mu_ref, sigma_ref = _reference_forward(x, params, z_dim)
    assert mu.shape == (batch, z_dim) and sigma.shape == (batch, z_dim)
    assert jnp.allclose(mu, mu_ref, atol=2e-3, rtol=2e-3)
    assert jnp.allclose(sigma, sigma_ref, atol=2e-3, rtol=2e-3)
    assert bool(jnp.all(sigma > 0.0))

    # --- bf16 weights: halves HBM weight traffic (kernel is weight-DMA bound
    # at B=8); f32 accumulation keeps accuracy; tolerance relaxed (precision,
    # not a bug). --------------------------------------------------------------
    params_bf16 = (w1.astype(jnp.bfloat16), b1,
                   w2.astype(jnp.bfloat16), b2,
                   w3.astype(jnp.bfloat16), b3)
    mu_b, sigma_b = encoder_forward(x, params_bf16, z_dim)
    jax.block_until_ready((mu_b, sigma_b))
    assert jnp.allclose(mu_b, mu_ref, atol=5e-2, rtol=5e-2)
    assert jnp.allclose(sigma_b, sigma_ref, atol=5e-2, rtol=5e-2)
    assert bool(jnp.all(sigma_b > 0.0))

    print("KERNEL_OK")
</pallas_src>

<mosaic_0001>
module attributes {stable_mosaic.version = 11 : i64} {
  func.func @_encoder_kernel(%arg0: i32, %arg1: memref<8x256xf32, #tpu.memory_space<vmem>>, %arg2: memref<256x1024xf32, #tpu.memory_space<vmem>>, %arg3: memref<1x1024xf32, #tpu.memory_space<vmem>>, %arg4: memref<1024x1024xf32, #tpu.memory_space<vmem>>, %arg5: memref<1x1024xf32, #tpu.memory_space<vmem>>, %arg6: memref<1024x128xf32, #tpu.memory_space<vmem>>, %arg7: memref<1x128xf32, #tpu.memory_space<vmem>>, %arg8: memref<8x64xf32, #tpu.memory_space<vmem>>, %arg9: memref<8x64xf32, #tpu.memory_space<vmem>>) attributes {dimension_semantics = [#tpu.dimension_semantics<parallel>], iteration_bounds = array<i64: 1>, scalar_prefetch = 0 : i64, scratch_operands = 0 : i64, tpu.core_type = #tpu.core_type<tc>, window_params = [{transform_indices = @transform_0, window_bounds = array<i64: 8, 256>}, {pipeline_mode = #tpu.pipeline_mode<synchronous>, transform_indices = @transform_1, window_bounds = array<i64: 256, 1024>}, {pipeline_mode = #tpu.pipeline_mode<synchronous>, transform_indices = @transform_2, window_bounds = array<i64: 1, 1024>}, {pipeline_mode = #tpu.pipeline_mode<synchronous>, transform_indices = @transform_3, window_bounds = array<i64: 1024, 1024>}, {pipeline_mode = #tpu.pipeline_mode<synchronous>, transform_indices = @transform_4, window_bounds = array<i64: 1, 1024>}, {pipeline_mode = #tpu.pipeline_mode<synchronous>, transform_indices = @transform_5, window_bounds = array<i64: 1024, 128>}, {pipeline_mode = #tpu.pipeline_mode<synchronous>, transform_indices = @transform_6, window_bounds = array<i64: 1, 128>}, {transform_indices = @transform_7, window_bounds = array<i64: 8, 64>}, {transform_indices = @transform_8, window_bounds = array<i64: 8, 64>}]} {
    %c0 = arith.constant 0 : index
    %c0_0 = arith.constant 0 : index
    %0 = vector.load %arg1[%c0, %c0_0] : memref<8x256xf32, #tpu.memory_space<vmem>>, vector<8x256xf32>
    %c0_1 = arith.constant 0 : index
    %c0_2 = arith.constant 0 : index
    %1 = vector.load %arg2[%c0_1, %c0_2] : memref<256x1024xf32, #tpu.memory_space<vmem>>, vector<256x1024xf32>
    %cst = arith.constant dense<0.000000e+00> : vector<8x1024xf32>
    %2 = tpu.matmul %0, %1, %cst {dimension_numbers = #tpu.dot_dimension_numbers<[1], [0], [0], [1], [0, 0, 1, 1], [], []>} : vector<8x256xf32>, vector<256x1024xf32>, vector<8x1024xf32> -> vector<8x1024xf32>
    %c0_3 = arith.constant 0 : index
    %c0_4 = arith.constant 0 : index
    %3 = vector.load %arg3[%c0_3, %c0_4] : memref<1x1024xf32, #tpu.memory_space<vmem>>, vector<1x1024xf32>
    %4 = vector.broadcast %3 : vector<1x1024xf32> to vector<8x1024xf32>
    %5 = arith.addf %2, %4 : vector<8x1024xf32>
    %cst_5 = arith.constant 0.000000e+00 : f32
    %6 = vector.broadcast %cst_5 : f32 to vector<8x1024xf32>
    %7 = arith.maximumf %5, %6 : vector<8x1024xf32>
    %c0_6 = arith.constant 0 : index
    %c0_7 = arith.constant 0 : index
    %8 = vector.load %arg4[%c0_6, %c0_7] : memref<1024x1024xf32, #tpu.memory_space<vmem>>, vector<1024x1024xf32>
    %cst_8 = arith.constant dense<0.000000e+00> : vector<8x1024xf32>
    %9 = tpu.matmul %7, %8, %cst_8 {dimension_numbers = #tpu.dot_dimension_numbers<[1], [0], [0], [1], [0, 0, 1, 1], [], []>} : vector<8x1024xf32>, vector<1024x1024xf32>, vector<8x1024xf32> -> vector<8x1024xf32>
    %c0_9 = arith.constant 0 : index
    %c0_10 = arith.constant 0 : index
    %10 = vector.load %arg5[%c0_9, %c0_10] : memref<1x1024xf32, #tpu.memory_space<vmem>>, vector<1x1024xf32>
    %11 = vector.broadcast %10 : vector<1x1024xf32> to vector<8x1024xf32>
    %12 = arith.addf %9, %11 : vector<8x1024xf32>
    %cst_11 = arith.constant 0.000000e+00 : f32
    %13 = vector.broadcast %cst_11 : f32 to vector<8x1024xf32>
    %14 = arith.maximumf %12, %13 : vector<8x1024xf32>
    %c0_12 = arith.constant 0 : index
    %c0_13 = arith.constant 0 : index
    %15 = vector.load %arg6[%c0_12, %c0_13] : memref<1024x128xf32, #tpu.memory_space<vmem>>, vector<1024x128xf32>
    %cst_14 = arith.constant dense<0.000000e+00> : vector<8x128xf32>
    %16 = tpu.matmul %14, %15, %cst_14 {dimension_numbers = #tpu.dot_dimension_numbers<[1], [0], [0], [1], [0, 0, 1, 1], [], []>} : vector<8x1024xf32>, vector<1024x128xf32>, vector<8x128xf32> -> vector<8x128xf32>
    %c0_15 = arith.constant 0 : index
    %c0_16 = arith.constant 0 : index
    %17 = vector.load %arg7[%c0_15, %c0_16] : memref<1x128xf32, #tpu.memory_space<vmem>>, vector<1x128xf32>
    %18 = vector.broadcast %17 : vector<1x128xf32> to vector<8x128xf32>
    %19 = arith.addf %16, %18 : vector<8x128xf32>
    %20 = vector.extract_strided_slice %19 {offsets = [0, 0], sizes = [8, 64], strides = [1, 1]} : vector<8x128xf32> to vector<8x64xf32>
    %21 = vector.extract_strided_slice %19 {offsets = [0, 64], sizes = [8, 64], strides = [1, 1]} : vector<8x128xf32> to vector<8x64xf32>
    %cst_17 = arith.constant 0.000000e+00 : f32
    %22 = vector.broadcast %cst_17 : f32 to vector<8x64xf32>
    %23 = arith.maximumf %21, %22 : vector<8x64xf32>
    %24 = math.absf %21 : vector<8x64xf32>
    %cst_18 = arith.constant 0.000000e+00 : f32
    %25 = vector.broadcast %cst_18 : f32 to vector<8x64xf32>
    %26 = arith.subf %25, %24 : vector<8x64xf32>
    %27 = math.exp %26 : vector<8x64xf32>
    %cst_19 = arith.constant 1.000000e+00 : f32
    %28 = vector.broadcast %cst_19 : f32 to vector<8x64xf32>
    %29 = arith.addf %28, %27 : vector<8x64xf32>
    %30 = math.log %29 : vector<8x64xf32>
    %31 = arith.addf %23, %30 : vector<8x64xf32>
    %cst_20 = arith.constant 1.000000e-07 : f32
    %32 = vector.broadcast %cst_20 : f32 to vector<8x64xf32>
    %33 = arith.addf %31, %32 : vector<8x64xf32>
    %c0_21 = arith.constant 0 : index
    %c0_22 = arith.constant 0 : index
    %34 = vector.load %arg8[%c0_21, %c0_22] : memref<8x64xf32, #tpu.memory_space<vmem>>, vector<8x64xf32>
    tpu.vector_store %arg8[%c0_21, %c0_22], %20 {strides = array<i32>} : memref<8x64xf32, #tpu.memory_space<vmem>>, vector<8x64xf32>,
    %c0_23 = arith.constant 0 : index
    %c0_24 = arith.constant 0 : index
    %35 = vector.load %arg9[%c0_23, %c0_24] : memref<8x64xf32, #tpu.memory_space<vmem>>, vector<8x64xf32>
    tpu.vector_store %arg9[%c0_23, %c0_24], %33 {strides = array<i32>} : memref<8x64xf32, #tpu.memory_space<vmem>>, vector<8x64xf32>,
    return
  }
  func.func @transform_0(%arg0: i32) -> (i32, i32) {
    %c0_i32 = arith.constant 0 : i32
    %c0_i32_0 = arith.constant 0 : i32
    return %arg0, %c0_i32 : i32, i32
  }
  func.func @transform_1(%arg0: i32) -> (i32, i32) {
    %c0_i32 = arith.constant 0 : i32
    %c0_i32_0 = arith.constant 0 : i32
    %c0_i32_1 = arith.constant 0 : i32
    return %c0_i32, %c0_i32_0 : i32, i32
  }
  func.func @transform_2(%arg0: i32) -> (i32, i32) {
    %c0_i32 = arith.constant 0 : i32
    %c0_i32_0 = arith.constant 0 : i32
    %c0_i32_1 = arith.constant 0 : i32
    return %c0_i32, %c0_i32_0 : i32, i32
  }
  func.func @transform_3(%arg0: i32) -> (i32, i32) {
    %c0_i32 = arith.constant 0 : i32
    %c0_i32_0 = arith.constant 0 : i32
    %c0_i32_1 = arith.constant 0 : i32
    return %c0_i32, %c0_i32_0 : i32, i32
  }
  func.func @transform_4(%arg0: i32) -> (i32, i32) {
    %c0_i32 = arith.constant 0 : i32
    %c0_i32_0 = arith.constant 0 : i32
    %c0_i32_1 = arith.constant 0 : i32
    return %c0_i32, %c0_i32_0 : i32, i32
  }
  func.func @transform_5(%arg0: i32) -> (i32, i32) {
    %c0_i32 = arith.constant 0 : i32
    %c0_i32_0 = arith.constant 0 : i32
    %c0_i32_1 = arith.constant 0 : i32
    return %c0_i32, %c0_i32_0 : i32, i32
  }
  func.func @transform_6(%arg0: i32) -> (i32, i32) {
    %c0_i32 = arith.constant 0 : i32
    %c0_i32_0 = arith.constant 0 : i32
    %c0_i32_1 = arith.constant 0 : i32
    return %c0_i32, %c0_i32_0 : i32, i32
  }
  func.func @transform_7(%arg0: i32) -> (i32, i32) {
    %c0_i32 = arith.constant 0 : i32
    %c0_i32_0 = arith.constant 0 : i32
    return %arg0, %c0_i32 : i32, i32
  }
  func.func @transform_8(%arg0: i32) -> (i32, i32) {
    %c0_i32 = arith.constant 0 : i32
    %c0_i32_0 = arith.constant 0 : i32
    return %arg0, %c0_i32 : i32, i32
  }
}

</mosaic_0001>

<bundles_post_ra>
// kernel: tpu_custom_call.1
= control target key start
LH: loop header
LB: loop body
LE: loop exit
PB: predicated region body
PF: predicated region fallthrough
CT: control target
= control target key end

     0   :  { %14 = vsyncpa [#allocation3], 0  ;;  %s5511_s0 = inlined_call_operand.hbm [shape: f32[8,256], index: 0, kind: input, shape index: {}]   ;;  %s5512_s1 = inlined_call_operand.hbm [shape: f32[256,1024], index: 1, kind: input, shape index: {}]   ;;  %s5513_s2 = inlined_call_operand.hbm [shape: f32[1,1024], index: 2, kind: input, shape index: {}]   ;;  %s5514_s3 = inlined_call_operand.hbm [shape: f32[1024,1024], index: 3, kind: input, shape index: {}]   ;;  %s5515_s4 = inlined_call_operand.hbm [shape: f32[1,1024], index: 4, kind: input, shape index: {}]   ;;  %s5516_s5 = inlined_call_operand.hbm [shape: f32[1024,128], index: 5, kind: input, shape index: {}]   ;;  %s5517_s6 = inlined_call_operand.hbm [shape: f32[1,128], index: 6, kind: input, shape index: {}]   ;;  %s5518_s7 = inlined_call_operand.hbm [shape: f32[8,64], index: 7, kind: output, shape index: {0}]   ;;  %s5519_s8 = inlined_call_operand.hbm [shape: f32[8,64], index: 8, kind: output, shape index: {1}]  }
   0x1   :  { %15 = vsyncpa [#allocation6], 0 }
   0x2   :  { %16 = vsyncpa [#allocation9], 0 }
   0x3   :  { %17 = vsyncpa [#allocation12], 0 }
   0x4   :  { %18 = vsyncpa [#allocation4], 0 }
   0x5   :  { %19 = vsyncpa [#allocation16], 0  ;;  %s5192_s27 = smov [#allocation5]   ;;  %s4982_s9 = scalar_lea.hbm %s5512_s1, 32768 }
   0x6   :  { %s35_s28 = sshll.u32 %s5192_s27, 4  ;;  %p4983_p0 = scmp.ne.s32.totalorder %s5512_s1, %s4982_s9  ;;  %s36_s28 = int_to_ptr.vmem [resolvable:$true] %s35_s28 }
   0x7   :  { %p4986_p1 = scmp.lt.u32.totalorder %s4982_s9, %s5512_s1 }
   0x9   :  { %p4988_p2 = pnand %p4986_p1, %p4983_p0 }
   0xb   :  { %4991 = shalt.err (!%p4988_p2)
}
   0xc   :  { %s4992_s14 = scalar_lea.vmem %s36_s28, 32768  ;;  %p4997_p4 = scmp.lt.s32.totalorder %s36_s28, %s36_s28 }
   0xd   :  { %p4993_p3 = scmp.ne.s32.totalorder %s36_s28, %s4992_s14  ;;  %p4998_p5 = scmp.lt.s32.totalorder %s4992_s14, %s4992_s14 }
   0xf   :  { %p4999_p6 = por %p4998_p5, %p4997_p4 }
  0x11   :  { %p5000_p7 = pnand %p4999_p6, %p4993_p3 }
  0x13   :  { %5003 = shalt.err (!%p5000_p7)
}
  0x14   :  { %s5193_s15 = smov 1024   ;;  %s5194_s16 = smov 64  }
  0x15   :  { %41 = dma.hbm_to_vmem [thread:$0]  %s5512_s1, 32768, %s36_s28, [#allocation6], %s5193_s15, %s5193_s15, %s5194_s16  }
  0x16   :  { %s5195_s19 = smov [#allocation8]   ;;  %s5196_s21 = smov [#allocation11]  }
  0x17   :  { %s57_s20 = sshll.u32 %s5195_s19, 4  ;;  %s79_s22 = sshll.u32 %s5196_s21, 4  ;;  %s58_s20 = int_to_ptr.vmem [resolvable:$true] %s57_s20  ;;  %s80_s22 = int_to_ptr.vmem [resolvable:$true] %s79_s22 }
  0x18   :  { %s5004_s25 = scalar_lea.hbm %s5514_s3, 131072 }
  0x19   :  { %p5005_p8 = scmp.ne.s32.totalorder %s5514_s3, %s5004_s25  ;;  %p5008_p9 = scmp.lt.u32.totalorder %s5004_s25, %s5514_s3 }
  0x1b   :  { %p5010_p10 = pnand %p5008_p9, %p5005_p8 }
  0x1d   :  { %5013 = shalt.err (!%p5010_p10)
}
  0x1e   :  { %s5014_s1 = scalar_lea.vmem %s58_s20, 131072  ;;  %p5019_p12 = scmp.lt.s32.totalorder %s58_s20, %s58_s20 }
  0x1f   :  { %p5015_p11 = scmp.ne.s32.totalorder %s58_s20, %s5014_s1  ;;  %p5020_p13 = scmp.lt.s32.totalorder %s5014_s1, %s5014_s1 }
  0x21   :  { %p5021_p0 = por %p5020_p13, %p5019_p12 }
  0x23   :  { %p5022_p1 = pnand %p5021_p0, %p5015_p11 }
  0x25   :  { %5025 = shalt.err (!%p5022_p1)
}
  0x26   :  { %63 = dma.hbm_to_vmem [thread:$0]  %s5514_s3, 131072, %s58_s20, [#allocation9], %s5193_s15, %s5193_s15, %s5194_s16  }
  0x27   :  { %s5026_s12 = scalar_lea.hbm %s5516_s5, 16384 }
  0x28   :  { %p5027_p2 = scmp.ne.s32.totalorder %s5516_s5, %s5026_s12  ;;  %p5030_p3 = scmp.lt.u32.totalorder %s5026_s12, %s5516_s5 }
  0x2a   :  { %p5032_p4 = pnand %p5030_p3, %p5027_p2 }
  0x2c   :  { %5035 = shalt.err (!%p5032_p4)
}
  0x2d   :  { %s5036_s19 = scalar_lea.vmem %s80_s22, 16384  ;;  %p5041_p6 = scmp.lt.s32.totalorder %s80_s22, %s80_s22 }
  0x2e   :  { %p5037_p5 = scmp.ne.s32.totalorder %s80_s22, %s5036_s19  ;;  %p5042_p7 = scmp.lt.s32.totalorder %s5036_s19, %s5036_s19 }
  0x30   :  { %p5043_p8 = por %p5042_p7, %p5041_p6 }
  0x32   :  { %p5044_p9 = pnand %p5043_p8, %p5037_p5 }
  0x34   :  { %5047 = shalt.err (!%p5044_p9)
}
  0x35   :  { %s5197_s3 = smov 128   ;;  %s5198_s15 = smov 8  }
  0x36   :  { %85 = dma.hbm_to_vmem [thread:$0]  %s5516_s5, 16384, %s80_s22, [#allocation12], %s5197_s3, %s5197_s3, %s5198_s15  }
  0x37   :  { %s5199_s23 = smov [#allocation2]   ;;  %s5200_s25 = smov [#allocation7]  }
  0x38   :  { %s26_s24 = sshll.u32 %s5199_s23, 4  ;;  %s48_s26 = sshll.u32 %s5200_s25, 4  ;;  %s27_s24 = int_to_ptr.vmem [resolvable:$true] %s26_s24  ;;  %s49_s26 = int_to_ptr.vmem [resolvable:$true] %s48_s26 }
  0x39   :  { %s5048_s30 = scalar_lea.hbm %s5511_s0, 256 }
  0x3a   :  { %p5049_p10 = scmp.ne.s32.totalorder %s5511_s0, %s5048_s30  ;;  %p5052_p11 = scmp.lt.u32.totalorder %s5048_s30, %s5511_s0 }
  0x3c   :  { %p5054_p12 = pnand %p5052_p11, %p5049_p10 }
  0x3e   :  { %5057 = shalt.err (!%p5054_p12)
}
  0x3f   :  { %s5058_s5 = scalar_lea.vmem %s27_s24, 256  ;;  %p5063_p0 = scmp.lt.s32.totalorder %s27_s24, %s27_s24 }
  0x40   :  { %p5059_p13 = scmp.ne.s32.totalorder %s27_s24, %s5058_s5  ;;  %p5064_p1 = scmp.lt.s32.totalorder %s5058_s5, %s5058_s5 }
  0x42   :  { %p5065_p2 = por %p5064_p1, %p5063_p0 }
  0x44   :  { %p5066_p3 = pnand %p5065_p2, %p5059_p13 }
  0x46   :  { %5069 = shalt.err (!%p5066_p3)
}
  0x47   :  { %29 = dma.hbm_to_vmem [thread:$0]  %s5511_s0, 256, %s27_s24, [#allocation3]  }
  0x48   :  { %s5070_s14 = scalar_lea.hbm %s5513_s2, 128 }
  0x49   :  { %p5071_p4 = scmp.ne.s32.totalorder %s5513_s2, %s5070_s14  ;;  %p5074_p5 = scmp.lt.u32.totalorder %s5070_s14, %s5513_s2 }
  0x4b   :  { %p5076_p6 = pnand %p5074_p5, %p5071_p4 }
  0x4d   :  { %5079 = shalt.err (!%p5076_p6)
}
  0x4e   :  { %s5080_s15 = scalar_lea.vmem %s49_s26, 128  ;;  %p5085_p8 = scmp.lt.s32.totalorder %s49_s26, %s49_s26 }
  0x4f   :  { %p5081_p7 = scmp.ne.s32.totalorder %s49_s26, %s5080_s15  ;;  %p5086_p9 = scmp.lt.s32.totalorder %s5080_s15, %s5080_s15 }
  0x51   :  { %p5087_p10 = por %p5086_p9, %p5085_p8 }
  0x53   :  { %p5088_p11 = pnand %p5087_p10, %p5081_p7 }
  0x55   :  { %5091 = shalt.err (!%p5088_p11)
}
  0x56   :  { %51 = dma.hbm_to_vmem [thread:$0]  %s5513_s2, 128, %s49_s26, [#allocation6]  }
  0x57   :  { %s5201_s21 = smov [#allocation10]   ;;  %s5202_s24 = smov [#allocation13]  }
  0x58   :  { %s70_s23 = sshll.u32 %s5201_s21, 4  ;;  %s92_s25 = sshll.u32 %s5202_s24, 4  ;;  %s71_s23 = int_to_ptr.vmem [resolvable:$true] %s70_s23  ;;  %s93_s25 = int_to_ptr.vmem [resolvable:$true] %s92_s25 }
  0x59   :  { %s5092_s30 = scalar_lea.hbm %s5515_s4, 128 }
  0x5a   :  { %p5093_p12 = scmp.ne.s32.totalorder %s5515_s4, %s5092_s30  ;;  %p5096_p13 = scmp.lt.u32.totalorder %s5092_s30, %s5515_s4 }
  0x5c   :  { %p5098_p0 = pnand %p5096_p13, %p5093_p12 }
  0x5e   :  { %5101 = shalt.err (!%p5098_p0)
}
  0x5f   :  { %s5102_s2 = scalar_lea.vmem %s71_s23, 128  ;;  %p5107_p2 = scmp.lt.s32.totalorder %s71_s23, %s71_s23 }
  0x60   :  { %p5103_p1 = scmp.ne.s32.totalorder %s71_s23, %s5102_s2  ;;  %p5108_p3 = scmp.lt.s32.totalorder %s5102_s2, %s5102_s2 }
  0x62   :  { %p5109_p4 = por %p5108_p3, %p5107_p2 }
  0x64   :  { %p5110_p5 = pnand %p5109_p4, %p5103_p1 }
  0x66   :  { %5113 = shalt.err (!%p5110_p5)
}
  0x67   :  { %73 = dma.hbm_to_vmem [thread:$0]  %s5515_s4, 128, %s71_s23, [#allocation9]  }
  0x68   :  { %s5114_s12 = scalar_lea.hbm %s5517_s6, 16 }
  0x69   :  { %p5115_p6 = scmp.ne.s32.totalorder %s5517_s6, %s5114_s12  ;;  %p5118_p7 = scmp.lt.u32.totalorder %s5114_s12, %s5517_s6 }
  0x6b   :  { %p5120_p8 = pnand %p5118_p7, %p5115_p6 }
  0x6d   :  { %5123 = shalt.err (!%p5120_p8)
}
  0x6e   :  { %s5124_s19 = scalar_lea.vmem %s93_s25, 16  ;;  %s5128_s3 = scalar_lea.vmem %s93_s25, 32 }
  0x6f   :  { %p5125_p9 = scmp.ne.s32.totalorder %s93_s25, %s5124_s19  ;;  %p5129_p10 = scmp.lt.s32.totalorder %s93_s25, %s93_s25 }
  0x70   :  { %p5130_p11 = scmp.lt.s32.totalorder %s5128_s3, %s5124_s19 }
  0x72   :  { %p5131_p12 = por %p5130_p11, %p5129_p10 }
  0x74   :  { %p5132_p13 = pnand %p5131_p12, %p5125_p9 }
  0x76   :  { %5135 = shalt.err (!%p5132_p13)
}
  0x77   :  { %95 = dma.hbm_to_vmem [thread:$0]  %s5517_s6, 16, %s93_s25, [#allocation12]  }
  0x78   :  { %5180 = dma.done.wait [#allocation3], 256  }
  0x79   :  { %5181 = vsyncadd [#allocation3], 4294967040 }
  0x7a   :  { %5182 = dma.done.wait [#allocation6], 32896  }
  0x7b   :  { %5183 = vsyncadd [#allocation6], 4294934400 }
  0x7c   :  { %5184 = dma.done.wait [#allocation9], 131200  }
  0x7d   :  { %5185 = vsyncadd [#allocation9], 4294836096 }
  0x7e   :  { %5186 = dma.done.wait [#allocation12], 16400  }
  0x7f   :  { %5187 = vsyncadd [#allocation12], 4294950896  ;;  %v120_v0 = vld [vmem:[#allocation5 + $0x8] sm:$0xff]  ;;  %v119_v2 = vld [vmem:[#allocation5] sm:$0xff]  ;;  %vm3344_vm0 = vcmask 523264   ;;  %s5203_s6 = smov [#allocation14]  }
  0x80   :  { %v128_v1 = vld [vmem:[#allocation5 + $0x48] sm:$0xff]  ;;  %v127_v4 = vld [vmem:[#allocation5 + $0x40] sm:$0xff]  ;;  %v5336_v42 = vld [vmem:[#allocation2 + $0x8] sm:$0xff]  ;;  %s3357_s0 = sshll.u32 %s5203_s6, 4  ;;  %s3358_s0 = int_to_ptr.vmem [resolvable:$true] %s3357_s0 }
  0x81   :  { %v3524_v3 = vpack.c.bf16 %v128_v1, %v120_v0  ;;  %v136_v5 = vld [vmem:[#allocation5 + $0x88] sm:$0xff]  ;;  %v3526_v7 = vpack.c.bf16 %v127_v4, %v119_v2  ;;  %v135_v9 = vld [vmem:[#allocation5 + $0x80] sm:$0xff]  ;;  %v122_v43 = vld [vmem:[#allocation5 + $0x18] sm:$0xff]  ;;  %481 = vmatprep.mubr.f32.mxu0 %v5336_v42  ;;  %552 = vmatprep.mubr.f32.mxu1 %v5336_v42  ;;  %s5136_s20 = scalar_lea.vmem %s3358_s0, 128  ;;  %p5141_p1 = scmp.lt.s32.totalorder %s3358_s0, %s3358_s0 }
  0x82   :  { %v144_v6 = vld [vmem:[#allocation5 + $0xc8] sm:$0xff]  ;;  %v143_v10 = vld [vmem:[#allocation5 + $0xc0] sm:$0xff]  ;;  %v130_v45 = vld [vmem:[#allocation5 + $0x58] sm:$0xff]  ;;  %p5137_p0 = scmp.ne.s32.totalorder %s3358_s0, %s5136_s20  ;;  %p5142_p2 = scmp.lt.s32.totalorder %s5136_s20, %s5136_s20 }
  0x83   :  { %v3528_v8 = vpack.c.bf16 %v144_v6, %v136_v5  ;;  %v152_v11 = vld [vmem:[#allocation5 + $0x108] sm:$0xff]  ;;  %3525 = vmatprep.subr.bf16.mxu0 %v3524_v3  ;;  %v3530_v13 = vpack.c.bf16 %v143_v10, %v135_v9  ;;  %v151_v15 = vld [vmem:[#allocation5 + $0x100] sm:$0xff]  ;;  %v121_v46 = vld [vmem:[#allocation5 + $0x10] sm:$0xff]  ;;  %v3588_v47 = vpack.c.bf16 %v130_v45, %v122_v43 }
  0x84   :  { %v160_v12 = vld [vmem:[#allocation5 + $0x148] sm:$0xff]  ;;  %3527 = vmatpush1.bf16.msra.mxu0 %v3526_v7  ;;  %v159_v16 = vld [vmem:[#allocation5 + $0x140] sm:$0xff]  ;;  %v129_v48 = vld [vmem:[#allocation5 + $0x50] sm:$0xff]  ;;  %p5143_p3 = por %p5142_p2, %p5141_p1 }
  0x85   :  { %3529 = vmatprep.subr.bf16.mxu0 %v3528_v8  ;;  %v3532_v14 = vpack.c.bf16 %v160_v12, %v152_v11  ;;  %v168_v17 = vld [vmem:[#allocation5 + $0x188] sm:$0xff]  ;;  %v3534_v19 = vpack.c.bf16 %v159_v16, %v151_v15  ;;  %v167_v21 = vld [vmem:[#allocation5 + $0x180] sm:$0xff]  ;;  %v138_v49 = vld [vmem:[#allocation5 + $0x98] sm:$0xff]  ;;  %v3590_v52 = vpack.c.bf16 %v129_v48, %v121_v46  ;;  %3589 = vmatprep.subr.bf16.mxu1 %v3588_v47 }
  0x86   :  { %v176_v18 = vld [vmem:[#allocation5 + $0x1c8] sm:$0xff]  ;;  %v175_v22 = vld [vmem:[#allocation5 + $0x1c0] sm:$0xff]  ;;  %v146_v50 = vld [vmem:[#allocation5 + $0xd8] sm:$0xff]  ;;  %p5144_p4 = pnand %p5143_p3, %p5137_p0 }
  0x87   :  { %v3536_v20 = vpack.c.bf16 %v176_v18, %v168_v17  ;;  %v184_v23 = vld [vmem:[#allocation5 + $0x208] sm:$0xff]  ;;  %v3538_v25 = vpack.c.bf16 %v175_v22, %v167_v21  ;;  %v183_v27 = vld [vmem:[#allocation5 + $0x200] sm:$0xff]  ;;  %v3592_v53 = vpack.c.bf16 %v146_v50, %v138_v49  ;;  %v137_v54 = vld [vmem:[#allocation5 + $0x90] sm:$0xff]  ;;  %3591 = vmatpush1.bf16.msra.mxu1 %v3590_v52 }
  0x88   :  { %3531 = vmatpush1.bf16.msra.mxu0 %v3530_v13  ;;  %v192_v24 = vld [vmem:[#allocation5 + $0x248] sm:$0xff]  ;;  %v191_v28 = vld [vmem:[#allocation5 + $0x240] sm:$0xff]  ;;  %v145_v55 = vld [vmem:[#allocation5 + $0xd0] sm:$0xff] }
  0x89   :  { %3533 = vmatprep.subr.bf16.mxu0 %v3532_v14  ;;  %v3540_v26 = vpack.c.bf16 %v192_v24, %v184_v23  ;;  %v200_v29 = vld [vmem:[#allocation5 + $0x288] sm:$0xff]  ;;  %v3542_v31 = vpack.c.bf16 %v191_v28, %v183_v27  ;;  %v199_v33 = vld [vmem:[#allocation5 + $0x280] sm:$0xff]  ;;  %v154_v56 = vld [vmem:[#allocation5 + $0x118] sm:$0xff]  ;;  %v3594_v63 = vpack.c.bf16 %v145_v55, %v137_v54  ;;  %3593 = vmatprep.subr.bf16.mxu1 %v3592_v53 }
  0x8a   :  { %v208_v30 = vld [vmem:[#allocation5 + $0x2c8] sm:$0xff]  ;;  %v207_v34 = vld [vmem:[#allocation5 + $0x2c0] sm:$0xff]  ;;  %v162_v60 = vld [vmem:[#allocation5 + $0x158] sm:$0xff] }
  0x8b   :  { %v3544_v32 = vpack.c.bf16 %v208_v30, %v200_v29  ;;  %v216_v35 = vld [vmem:[#allocation5 + $0x308] sm:$0xff]  ;;  %v3546_v37 = vpack.c.bf16 %v207_v34, %v199_v33  ;;  %v215_v38 = vld [vmem:[#allocation5 + $0x300] sm:$0xff]  ;;  %v3596_v0 = vpack.c.bf16 %v162_v60, %v154_v56  ;;  %v153_v1 = vld [vmem:[#allocation5 + $0x110] sm:$0xff]  ;;  %3595 = vmatpush1.bf16.msra.mxu1 %v3594_v63 }
  0x8c   :  { %3535 = vmatpush1.bf16.msra.mxu0 %v3534_v19  ;;  %v224_v36 = vld [vmem:[#allocation5 + $0x348] sm:$0xff]  ;;  %v223_v39 = vld [vmem:[#allocation5 + $0x340] sm:$0xff]  ;;  %v161_v2 = vld [vmem:[#allocation5 + $0x150] sm:$0xff] }
  0x8d   :  { %3537 = vmatprep.subr.bf16.mxu0 %v3536_v20  ;;  %v3548_v40 = vpack.c.bf16 %v224_v36, %v216_v35  ;;  %v232_v41 = vld [vmem:[#allocation5 + $0x388] sm:$0xff]  ;;  %v3550_v51 = vpack.c.bf16 %v223_v39, %v215_v38  ;;  %v231_v58 = vld [vmem:[#allocation5 + $0x380] sm:$0xff]  ;;  %v170_v4 = vld [vmem:[#allocation5 + $0x198] sm:$0xff]  ;;  %v3598_v11 = vpack.c.bf16 %v161_v2, %v153_v1  ;;  %3597 = vmatprep.subr.bf16.mxu1 %v3596_v0 }
  0x8e   :  { %v240_v44 = vld [vmem:[#allocation5 + $0x3c8] sm:$0xff]  ;;  %v239_v59 = vld [vmem:[#allocation5 + $0x3c0] sm:$0xff]  ;;  %v178_v5 = vld [vmem:[#allocation5 + $0x1d8] sm:$0xff] }
  0x8f   :  { %v3552_v57 = vpack.c.bf16 %v240_v44, %v232_v41  ;;  %v248_v61 = vld [vmem:[#allocation5 + $0x408] sm:$0xff]  ;;  %v3554_v3 = vpack.c.bf16 %v239_v59, %v231_v58  ;;  %v247_v7 = vld [vmem:[#allocation5 + $0x400] sm:$0xff]  ;;  %v3600_v12 = vpack.c.bf16 %v178_v5, %v170_v4  ;;  %v169_v13 = vld [vmem:[#allocation5 + $0x190] sm:$0xff]  ;;  %3599 = vmatpush1.bf16.msra.mxu1 %v3598_v11 }
  0x90   :  { %3539 = vmatpush1.bf16.msra.mxu0 %v3538_v25  ;;  %v256_v62 = vld [vmem:[#allocation5 + $0x448] sm:$0xff]  ;;  %v255_v8 = vld [vmem:[#allocation5 + $0x440] sm:$0xff]  ;;  %v177_v14 = vld [vmem:[#allocation5 + $0x1d0] sm:$0xff] }
  0x91   :  { %3541 = vmatprep.subr.bf16.mxu0 %v3540_v26  ;;  %v3556_v6 = vpack.c.bf16 %v256_v62, %v248_v61  ;;  %v264_v9 = vld [vmem:[#allocation5 + $0x488] sm:$0xff]  ;;  %v3558_v15 = vpack.c.bf16 %v255_v8, %v247_v7  ;;  %v186_v16 = vld [vmem:[#allocation5 + $0x218] sm:$0xff]  ;;  %v263_v19 = vld [vmem:[#allocation5 + $0x480] sm:$0xff]  ;;  %v3602_v23 = vpack.c.bf16 %v177_v14, %v169_v13  ;;  %3601 = vmatprep.subr.bf16.mxu1 %v3600_v12 }
  0x92   :  { %v272_v10 = vld [vmem:[#allocation5 + $0x4c8] sm:$0xff]  ;;  %v194_v17 = vld [vmem:[#allocation5 + $0x258] sm:$0xff]  ;;  %v271_v20 = vld [vmem:[#allocation5 + $0x4c0] sm:$0xff] }
  0x93   :  { %v3560_v18 = vpack.c.bf16 %v272_v10, %v264_v9  ;;  %v280_v21 = vld [vmem:[#allocation5 + $0x508] sm:$0xff]  ;;  %v3604_v24 = vpack.c.bf16 %v194_v17, %v186_v16  ;;  %v185_v25 = vld [vmem:[#allocation5 + $0x210] sm:$0xff]  ;;  %v3562_v27 = vpack.c.bf16 %v271_v20, %v263_v19  ;;  %v202_v28 = vld [vmem:[#allocation5 + $0x298] sm:$0xff]  ;;  %3603 = vmatpush1.bf16.msra.mxu1 %v3602_v23 }
  0x94   :  { %3543 = vmatpush1.bf16.msra.mxu0 %v3542_v31  ;;  %v288_v22 = vld [vmem:[#allocation5 + $0x548] sm:$0xff]  ;;  %v193_v26 = vld [vmem:[#allocation5 + $0x250] sm:$0xff]  ;;  %v210_v29 = vld [vmem:[#allocation5 + $0x2d8] sm:$0xff] }
  0x95   :  { %3545 = vmatprep.subr.bf16.mxu0 %v3544_v32  ;;  %v3564_v30 = vpack.c.bf16 %v288_v22, %v280_v21  ;;  %v279_v31 = vld [vmem:[#allocation5 + $0x500] sm:$0xff]  ;;  %v296_v33 = vld [vmem:[#allocation5 + $0x588] sm:$0xff]  ;;  %v3606_v35 = vpack.c.bf16 %v193_v26, %v185_v25  ;;  %3605 = vmatprep.subr.bf16.mxu1 %v3604_v24  ;;  %v3608_v36 = vpack.c.bf16 %v210_v29, %v202_v28  ;;  %v209_v38 = vld [vmem:[#allocation5 + $0x2d0] sm:$0xff] }
  0x96   :  { %v287_v32 = vld [vmem:[#allocation5 + $0x540] sm:$0xff]  ;;  %v304_v34 = vld [vmem:[#allocation5 + $0x5c8] sm:$0xff]  ;;  %v226_v41 = vld [vmem:[#allocation5 + $0x358] sm:$0xff] }
  0x97   :  { %v3566_v39 = vpack.c.bf16 %v287_v32, %v279_v31  ;;  %v3568_v43 = vpack.c.bf16 %v304_v34, %v296_v33  ;;  %v295_v44 = vld [vmem:[#allocation5 + $0x580] sm:$0xff]  ;;  %v312_v46 = vld [vmem:[#allocation5 + $0x608] sm:$0xff]  ;;  %3607 = vmatpush1.bf16.msra.mxu1 %v3606_v35  ;;  %v217_v50 = vld [vmem:[#allocation5 + $0x310] sm:$0xff] }
  0x98   :  { %3547 = vmatpush1.bf16.msra.mxu0 %v3546_v37  ;;  %v201_v37 = vld [vmem:[#allocation5 + $0x290] sm:$0xff]  ;;  %v303_v45 = vld [vmem:[#allocation5 + $0x5c0] sm:$0xff]  ;;  %v320_v47 = vld [vmem:[#allocation5 + $0x648] sm:$0xff]  ;;  %3609 = vmatprep.subr.bf16.mxu1 %v3608_v36 }
  0x99   :  { %3549 = vmatprep.subr.bf16.mxu0 %v3548_v40  ;;  %v218_v40 = vld [vmem:[#allocation5 + $0x318] sm:$0xff]  ;;  %v3610_v48 = vpack.c.bf16 %v209_v38, %v201_v37  ;;  %v3570_v52 = vpack.c.bf16 %v303_v45, %v295_v44  ;;  %v3572_v55 = vpack.c.bf16 %v320_v47, %v312_v46  ;;  %v311_v56 = vld [vmem:[#allocation5 + $0x600] sm:$0xff]  ;;  %v328_v58 = vld [vmem:[#allocation5 + $0x688] sm:$0xff] }
  0x9a   :  { %v3612_v49 = vpack.c.bf16 %v226_v41, %v218_v40  ;;  %v234_v53 = vld [vmem:[#allocation5 + $0x398] sm:$0xff]  ;;  %v336_v59 = vld [vmem:[#allocation5 + $0x6c8] sm:$0xff]  ;;  %v233_v62 = vld [vmem:[#allocation5 + $0x390] sm:$0xff] }
  0x9b   :  { %v242_v54 = vld [vmem:[#allocation5 + $0x3d8] sm:$0xff]  ;;  %3611 = vmatpush1.bf16.msra.mxu1 %v3610_v48  ;;  %v241_v63 = vld [vmem:[#allocation5 + $0x3d0] sm:$0xff]  ;;  %v327_v4 = vld [vmem:[#allocation5 + $0x680] sm:$0xff] }
  0x9c   :  { %3551 = vmatpush1.bf16.msra.mxu0 %v3550_v51  ;;  %v225_v51 = vld [vmem:[#allocation5 + $0x350] sm:$0xff]  ;;  %3613 = vmatprep.subr.bf16.mxu1 %v3612_v49  ;;  %v3616_v61 = vpack.c.bf16 %v242_v54, %v234_v53  ;;  %v250_v1 = vld [vmem:[#allocation5 + $0x418] sm:$0xff]  ;;  %v335_v5 = vld [vmem:[#allocation5 + $0x6c0] sm:$0xff]  ;;  %v3618_v8 = vpack.c.bf16 %v241_v63, %v233_v62 }
  0x9d   :  { %3553 = vmatprep.subr.bf16.mxu0 %v3552_v57  ;;  %v319_v57 = vld [vmem:[#allocation5 + $0x640] sm:$0xff]  ;;  %v3614_v60 = vpack.c.bf16 %v225_v51, %v217_v50  ;;  %v258_v2 = vld [vmem:[#allocation5 + $0x458] sm:$0xff]  ;;  %v352_v7 = vld [vmem:[#allocation5 + $0x748] sm:$0xff]  ;;  %v3578_v12 = vpack.c.bf16 %v335_v5, %v327_v4 }
  0x9e   :  { %v3574_v0 = vpack.c.bf16 %v319_v57, %v311_v56  ;;  %v3620_v9 = vpack.c.bf16 %v258_v2, %v250_v1  ;;  %v249_v10 = vld [vmem:[#allocation5 + $0x410] sm:$0xff]  ;;  %v266_v13 = vld [vmem:[#allocation5 + $0x498] sm:$0xff]  ;;  %v343_v16 = vld [vmem:[#allocation5 + $0x700] sm:$0xff] }
  0x9f   :  { %3615 = vmatpush1.bf16.msra.mxu1 %v3614_v60  ;;  %v257_v11 = vld [vmem:[#allocation5 + $0x450] sm:$0xff]  ;;  %v274_v14 = vld [vmem:[#allocation5 + $0x4d8] sm:$0xff]  ;;  %v351_v17 = vld [vmem:[#allocation5 + $0x740] sm:$0xff] }
  0xa0   :  { %3555 = vmatpush1.bf16.msra.mxu0 %v3554_v3  ;;  %v3576_v3 = vpack.c.bf16 %v336_v59, %v328_v58  ;;  %3617 = vmatprep.subr.bf16.mxu1 %v3616_v61  ;;  %v368_v19 = vld [vmem:[#allocation5 + $0x7c8] sm:$0xff]  ;;  %v3622_v20 = vpack.c.bf16 %v257_v11, %v249_v10  ;;  %v3624_v21 = vpack.c.bf16 %v274_v14, %v266_v13  ;;  %v265_v22 = vld [vmem:[#allocation5 + $0x490] sm:$0xff]  ;;  %v282_v25 = vld [vmem:[#allocation5 + $0x518] sm:$0xff] }
  0xa1   :  { %3557 = vmatprep.subr.bf16.mxu0 %v3556_v6  ;;  %v344_v6 = vld [vmem:[#allocation5 + $0x708] sm:$0xff]  ;;  %v273_v23 = vld [vmem:[#allocation5 + $0x4d0] sm:$0xff]  ;;  %v3582_v24 = vpack.c.bf16 %v351_v17, %v343_v16  ;;  %v290_v26 = vld [vmem:[#allocation5 + $0x558] sm:$0xff] }
  0xa2   :  { %v359_v28 = vld [vmem:[#allocation5 + $0x780] sm:$0xff]  ;;  %v124_v31 = vld [vmem:[#allocation5 + $0x28] sm:$0xff]  ;;  %v3628_v33 = vpack.c.bf16 %v290_v26, %v282_v25  ;;  %v281_v34 = vld [vmem:[#allocation5 + $0x510] sm:$0xff] }
  0xa3   :  { %3619 = vmatpush1.bf16.msra.mxu1 %v3618_v8  ;;  %v367_v29 = vld [vmem:[#allocation5 + $0x7c0] sm:$0xff]  ;;  %v132_v32 = vld [vmem:[#allocation5 + $0x68] sm:$0xff]  ;;  %v289_v35 = vld [vmem:[#allocation5 + $0x550] sm:$0xff] }
  0xa4   :  { %3559 = vmatpush1.bf16.msra.mxu0 %v3558_v15  ;;  %v3580_v15 = vpack.c.bf16 %v352_v7, %v344_v6  ;;  %3621 = vmatprep.subr.bf16.mxu1 %v3620_v9  ;;  %v3586_v36 = vpack.c.bf16 %v367_v29, %v359_v28  ;;  %v298_v37 = vld [vmem:[#allocation5 + $0x598] sm:$0xff]  ;;  %v123_v40 = vld [vmem:[#allocation5 + $0x20] sm:$0xff]  ;;  %v140_v44 = vld [vmem:[#allocation5 + $0xa8] sm:$0xff] }
  0xa5   :  { %3561 = vmatprep.subr.bf16.mxu0 %v3560_v18  ;;  %v360_v18 = vld [vmem:[#allocation5 + $0x788] sm:$0xff]  ;;  %v306_v38 = vld [vmem:[#allocation5 + $0x5d8] sm:$0xff]  ;;  %v131_v41 = vld [vmem:[#allocation5 + $0x60] sm:$0xff] }
  0xa6   :  { %v148_v45 = vld [vmem:[#allocation5 + $0xe8] sm:$0xff]  ;;  %v3632_v46 = vpack.c.bf16 %v306_v38, %v298_v37  ;;  %v297_v47 = vld [vmem:[#allocation5 + $0x590] sm:$0xff]  ;;  %v314_v50 = vld [vmem:[#allocation5 + $0x618] sm:$0xff] }
  0xa7   :  { %3623 = vmatpush1.bf16.msra.mxu1 %v3622_v20  ;;  %v305_v48 = vld [vmem:[#allocation5 + $0x5d0] sm:$0xff]  ;;  %v322_v51 = vld [vmem:[#allocation5 + $0x658] sm:$0xff]  ;;  %v3656_v53 = vpack.c.bf16 %v148_v45, %v140_v44  ;;  %v139_v54 = vld [vmem:[#allocation5 + $0xa0] sm:$0xff] }
  0xa8   :  { %3563 = vmatpush1.bf16.msra.mxu0 %v3562_v27  ;;  %v3584_v27 = vpack.c.bf16 %v368_v19, %v360_v18  ;;  %3625 = vmatprep.subr.bf16.mxu1 %v3624_v21  ;;  %v5340_v49 = vld [vmem:[#allocation2] sm:$0xff]  ;;  %v3634_v56 = vpack.c.bf16 %v305_v48, %v297_v47  ;;  %v156_v57 = vld [vmem:[#allocation5 + $0x128] sm:$0xff]  ;;  %v3636_v59 = vpack.c.bf16 %v322_v51, %v314_v50  ;;  %v330_v62 = vld [vmem:[#allocation5 + $0x698] sm:$0xff] }
  0xa9   :  { %3565 = vmatprep.subr.bf16.mxu0 %v3564_v30  ;;  %v3626_v30 = vpack.c.bf16 %v273_v23, %v265_v22  ;;  %v164_v58 = vld [vmem:[#allocation5 + $0x168] sm:$0xff]  ;;  %v313_v60 = vld [vmem:[#allocation5 + $0x610] sm:$0xff]  ;;  %v338_v63 = vld [vmem:[#allocation5 + $0x6d8] sm:$0xff] }
  0xaa   :  { %v321_v61 = vld [vmem:[#allocation5 + $0x650] sm:$0xff]  ;;  %v3660_v1 = vpack.c.bf16 %v164_v58, %v156_v57  ;;  %v155_v2 = vld [vmem:[#allocation5 + $0x120] sm:$0xff]  ;;  %v172_v5 = vld [vmem:[#allocation5 + $0x1a8] sm:$0xff]  ;;  %v3640_v7 = vpack.c.bf16 %v338_v63, %v330_v62 }
  0xab   :  { %3627 = vmatpush1.bf16.msra.mxu1 %v3626_v30  ;;  %v3638_v4 = vpack.c.bf16 %v321_v61, %v313_v60  ;;  %v180_v6 = vld [vmem:[#allocation5 + $0x1e8] sm:$0xff]  ;;  %v329_v8 = vld [vmem:[#allocation5 + $0x690] sm:$0xff]  ;;  %v346_v10 = vld [vmem:[#allocation5 + $0x718] sm:$0xff] }
  0xac   :  { %3567 = vmatpush1.bf16.msra.mxu0 %v3566_v39  ;;  %v3652_v39 = vpack.c.bf16 %v132_v32, %v124_v31  ;;  %3629 = vmatprep.subr.bf16.mxu1 %v3628_v33  ;;  %v337_v9 = vld [vmem:[#allocation5 + $0x6d0] sm:$0xff]  ;;  %v354_v11 = vld [vmem:[#allocation5 + $0x758] sm:$0xff]  ;;  %v3664_v13 = vpack.c.bf16 %v180_v6, %v172_v5  ;;  %v171_v14 = vld [vmem:[#allocation5 + $0x1a0] sm:$0xff] }
  0xad   :  { %3569 = vmatprep.subr.bf16.mxu0 %v3568_v43  ;;  %v3630_v43 = vpack.c.bf16 %v289_v35, %v281_v34  ;;  %v3642_v16 = vpack.c.bf16 %v337_v9, %v329_v8  ;;  %v188_v17 = vld [vmem:[#allocation5 + $0x228] sm:$0xff]  ;;  %v3644_v19 = vpack.c.bf16 %v354_v11, %v346_v10  ;;  %v345_v20 = vld [vmem:[#allocation5 + $0x710] sm:$0xff]  ;;  %v362_v22 = vld [vmem:[#allocation5 + $0x798] sm:$0xff] }
  0xae   :  { %v196_v18 = vld [vmem:[#allocation5 + $0x268] sm:$0xff]  ;;  %v353_v21 = vld [vmem:[#allocation5 + $0x750] sm:$0xff]  ;;  %v370_v23 = vld [vmem:[#allocation5 + $0x7d8] sm:$0xff] }
  0xaf   :  { %3631 = vmatpush1.bf16.msra.mxu1 %v3630_v43  ;;  %v3668_v25 = vpack.c.bf16 %v196_v18, %v188_v17  ;;  %v187_v26 = vld [vmem:[#allocation5 + $0x220] sm:$0xff]  ;;  %v3646_v28 = vpack.c.bf16 %v353_v21, %v345_v20  ;;  %v204_v29 = vld [vmem:[#allocation5 + $0x2a8] sm:$0xff]  ;;  %v3648_v31 = vpack.c.bf16 %v370_v23, %v362_v22  ;;  %v361_v32 = vld [vmem:[#allocation5 + $0x790] sm:$0xff] }
  0xb0   :  { %3571 = vmatpush1.bf16.msra.mxu0 %v3570_v52  ;;  %v3654_v52 = vpack.c.bf16 %v131_v41, %v123_v40  ;;  %3633 = vmatprep.subr.bf16.mxu1 %v3632_v46  ;;  %v212_v30 = vld [vmem:[#allocation5 + $0x2e8] sm:$0xff]  ;;  %v369_v33 = vld [vmem:[#allocation5 + $0x7d0] sm:$0xff]  ;;  %v126_v35 = vld [vmem:[#allocation5 + $0x38] sm:$0xff] }
  0xb1   :  { %3573 = vmatprep.subr.bf16.mxu0 %v3572_v55  ;;  %v147_v55 = vld [vmem:[#allocation5 + $0xe0] sm:$0xff]  ;;  %v3672_v37 = vpack.c.bf16 %v212_v30, %v204_v29  ;;  %v3650_v40 = vpack.c.bf16 %v369_v33, %v361_v32  ;;  %v220_v41 = vld [vmem:[#allocation5 + $0x328] sm:$0xff]  ;;  %v125_v45 = vld [vmem:[#allocation5 + $0x30] sm:$0xff] }
  0xb2   :  { %v203_v38 = vld [vmem:[#allocation5 + $0x2a0] sm:$0xff]  ;;  %v228_v43 = vld [vmem:[#allocation5 + $0x368] sm:$0xff]  ;;  %v133_v46 = vld [vmem:[#allocation5 + $0x70] sm:$0xff] }
  0xb3   :  { %3635 = vmatpush1.bf16.msra.mxu1 %v3634_v56  ;;  %v142_v48 = vld [vmem:[#allocation5 + $0xb8] sm:$0xff]  ;;  %v3676_v51 = vpack.c.bf16 %v228_v43, %v220_v41  ;;  %v244_v56 = vld [vmem:[#allocation5 + $0x3e8] sm:$0xff]  ;;  %v141_v58 = vld [vmem:[#allocation5 + $0xb0] sm:$0xff] }
  0xb4   :  { %3575 = vmatpush1.bf16.msra.mxu0 %v3574_v0  ;;  %v3658_v0 = vpack.c.bf16 %v147_v55, %v139_v54  ;;  %3637 = vmatprep.subr.bf16.mxu1 %v3636_v59  ;;  %v150_v50 = vld [vmem:[#allocation5 + $0xf8] sm:$0xff]  ;;  %v3718_v54 = vpack.c.bf16 %v133_v46, %v125_v45  ;;  %v236_v55 = vld [vmem:[#allocation5 + $0x3a8] sm:$0xff]  ;;  %v149_v59 = vld [vmem:[#allocation5 + $0xf0] sm:$0xff] }
  0xb5   :  { %3577 = vmatprep.subr.bf16.mxu0 %v3576_v3  ;;  %v163_v3 = vld [vmem:[#allocation5 + $0x160] sm:$0xff]  ;;  %v3720_v57 = vpack.c.bf16 %v150_v50, %v142_v48  ;;  %v158_v61 = vld [vmem:[#allocation5 + $0x138] sm:$0xff]  ;;  %v3680_v63 = vpack.c.bf16 %v244_v56, %v236_v55  ;;  %v157_v6 = vld [vmem:[#allocation5 + $0x130] sm:$0xff] }
  0xb6   :  { %v166_v62 = vld [vmem:[#allocation5 + $0x178] sm:$0xff]  ;;  %v173_v18 = vld [vmem:[#allocation5 + $0x1b0] sm:$0xff]  ;;  %v267_v23 = vld [vmem:[#allocation5 + $0x4a0] sm:$0xff] }
  0xb7   :  { %3639 = vmatpush1.bf16.msra.mxu1 %v3638_v4  ;;  %v260_v4 = vld [vmem:[#allocation5 + $0x468] sm:$0xff]  ;;  %v3724_v5 = vpack.c.bf16 %v166_v62, %v158_v61  ;;  %v174_v9 = vld [vmem:[#allocation5 + $0x1b8] sm:$0xff]  ;;  %v189_v29 = vld [vmem:[#allocation5 + $0x230] sm:$0xff] }
  0xb8   :  { %3579 = vmatpush1.bf16.msra.mxu0 %v3578_v12  ;;  %v3662_v12 = vpack.c.bf16 %v163_v3, %v155_v2  ;;  %3641 = vmatprep.subr.bf16.mxu1 %v3640_v7  ;;  %v3722_v2 = vpack.c.bf16 %v149_v59, %v141_v58  ;;  %v252_v3 = vld [vmem:[#allocation5 + $0x428] sm:$0xff]  ;;  %v165_v7 = vld [vmem:[#allocation5 + $0x170] sm:$0xff]  ;;  %v182_v10 = vld [vmem:[#allocation5 + $0x1f8] sm:$0xff] }
  0xb9   :  { %3581 = vmatprep.subr.bf16.mxu0 %v3580_v15  ;;  %v179_v15 = vld [vmem:[#allocation5 + $0x1e0] sm:$0xff]  ;;  %v3684_v11 = vpack.c.bf16 %v260_v4, %v252_v3  ;;  %v3728_v17 = vpack.c.bf16 %v182_v10, %v174_v9  ;;  %v190_v20 = vld [vmem:[#allocation5 + $0x238] sm:$0xff]  ;;  %v197_v30 = vld [vmem:[#allocation5 + $0x270] sm:$0xff] }
  0xba   :  { %v198_v21 = vld [vmem:[#allocation5 + $0x278] sm:$0xff]  ;;  %v205_v41 = vld [vmem:[#allocation5 + $0x2b0] sm:$0xff]  ;;  %v299_v48 = vld [vmem:[#allocation5 + $0x5a0] sm:$0xff] }
  0xbb   :  { %3643 = vmatpush1.bf16.msra.mxu1 %v3642_v16  ;;  %v276_v16 = vld [vmem:[#allocation5 + $0x4e8] sm:$0xff]  ;;  %v206_v32 = vld [vmem:[#allocation5 + $0x2b8] sm:$0xff]  ;;  %v213_v43 = vld [vmem:[#allocation5 + $0x2f0] sm:$0xff] }
  0xbc   :  { %3583 = vmatpush1.bf16.msra.mxu0 %v3582_v24  ;;  %v3666_v24 = vpack.c.bf16 %v179_v15, %v171_v14  ;;  %3645 = vmatprep.subr.bf16.mxu1 %v3644_v19  ;;  %v3726_v14 = vpack.c.bf16 %v165_v7, %v157_v6  ;;  %v268_v15 = vld [vmem:[#allocation5 + $0x4a8] sm:$0xff]  ;;  %v214_v33 = vld [vmem:[#allocation5 + $0x2f8] sm:$0xff]  ;;  %v307_v50 = vld [vmem:[#allocation5 + $0x5e0] sm:$0xff] }
  0xbd   :  { %3585 = vmatprep.subr.bf16.mxu0 %v3584_v27  ;;  %v195_v27 = vld [vmem:[#allocation5 + $0x260] sm:$0xff]  ;;  %v3688_v22 = vpack.c.bf16 %v276_v16, %v268_v15  ;;  %v222_v45 = vld [vmem:[#allocation5 + $0x338] sm:$0xff]  ;;  %v221_v55 = vld [vmem:[#allocation5 + $0x330] sm:$0xff] }
  0xbe   :  { %v3670_v34 = vpack.c.bf16 %v195_v27, %v187_v26  ;;  %v284_v26 = vld [vmem:[#allocation5 + $0x528] sm:$0xff]  ;;  %v230_v46 = vld [vmem:[#allocation5 + $0x378] sm:$0xff]  ;;  %v229_v56 = vld [vmem:[#allocation5 + $0x370] sm:$0xff] }
  0xbf   :  { %3647 = vmatpush1.bf16.msra.mxu1 %v3646_v28  ;;  %v292_v27 = vld [vmem:[#allocation5 + $0x568] sm:$0xff]  ;;  %v3732_v28 = vpack.c.bf16 %v198_v21, %v190_v20  ;;  %v238_v58 = vld [vmem:[#allocation5 + $0x3b8] sm:$0xff]  ;;  %v315_v61 = vld [vmem:[#allocation5 + $0x620] sm:$0xff] }
  0xc0   :  { %3587 = vmatpush1.bf16.msra.mxu0 %v3586_v36  ;;  %v134_v36 = vld [vmem:[#allocation5 + $0x78] sm:$0xff]  ;;  %3649 = vmatprep.subr.bf16.mxu1 %v3648_v31  ;;  %v323_v62 = vld [vmem:[#allocation5 + $0x660] sm:$0xff]  ;;  %v237_v3 = vld [vmem:[#allocation5 + $0x3b0] sm:$0xff] }
  0xc1   :  { %3653 = vmatprep.subr.bf16.mxu0 %v3652_v39  ;;  %v211_v39 = vld [vmem:[#allocation5 + $0x2e0] sm:$0xff]  ;;  %v3716_v44 = vpack.c.bf16 %v134_v36, %v126_v35  ;;  %v246_v59 = vld [vmem:[#allocation5 + $0x3f8] sm:$0xff]  ;;  %v245_v4 = vld [vmem:[#allocation5 + $0x3f0] sm:$0xff] }
  0xc2   :  { %v3674_v47 = vpack.c.bf16 %v211_v39, %v203_v38  ;;  %v283_v35 = vld [vmem:[#allocation5 + $0x520] sm:$0xff]  ;;  %v300_v38 = vld [vmem:[#allocation5 + $0x5a8] sm:$0xff]  ;;  %v254_v6 = vld [vmem:[#allocation5 + $0x438] sm:$0xff] }
  0xc3   :  { %482 = vmatmul.mubr.f32.vlgmr.msra.gmra.mrb[0].mxu0 %v5340_v49  ;;  %3651 = vmatpush1.bf16.msra.mxu1 %v3650_v40  ;;  %v291_v36 = vld [vmem:[#allocation5 + $0x560] sm:$0xff]  ;;  %v308_v39 = vld [vmem:[#allocation5 + $0x5e8] sm:$0xff]  ;;  %v3736_v40 = vpack.c.bf16 %v214_v33, %v206_v32  ;;  %v262_v7 = vld [vmem:[#allocation5 + $0x478] sm:$0xff] }
  0xc4   :  { %3655 = vmatpush1.bf16.msra.mxu0 %v3654_v52  ;;  %623 = vmatprep.mubr.f32.mxu0 %v5336_v42  ;;  %v219_v52 = vld [vmem:[#allocation5 + $0x320] sm:$0xff]  ;;  %v253_v15 = vld [vmem:[#allocation5 + $0x430] sm:$0xff] }
  0xc5   :  { %3657 = vmatprep.subr.bf16.mxu0 %v3656_v53  ;;  %v227_v53 = vld [vmem:[#allocation5 + $0x360] sm:$0xff]  ;;  %3717 = vmatprep.subr.bf16.mxu1 %v3716_v44  ;;  %v3694_v44 = vpack.c.bf16 %v291_v36, %v283_v35  ;;  %v261_v16 = vld [vmem:[#allocation5 + $0x470] sm:$0xff] }
  0xc6   :  { %v3678_v60 = vpack.c.bf16 %v227_v53, %v219_v52  ;;  %553 = vmatmul.mubr.f32.vlgmr.msra.gmra.mrb[0].mxu1 %v5340_v49  ;;  %v316_v52 = vld [vmem:[#allocation5 + $0x628] sm:$0xff]  ;;  %v331_v9 = vld [vmem:[#allocation5 + $0x6a0] sm:$0xff]  ;;  %v710_v35 = vld [vmem:[#allocation8 + $0x8] sm:$0xff] }
  0xc7   :  { %3719 = vmatpush1.bf16.msra.mxu1 %v3718_v54  ;;  %694 = vmatprep.mubr.f32.mxu1 %v5336_v42  ;;  %v181_v42 = vld [vmem:[#allocation5 + $0x1f0] sm:$0xff]  ;;  %v324_v53 = vld [vmem:[#allocation5 + $0x668] sm:$0xff]  ;;  %v3740_v54 = vpack.c.bf16 %v230_v46, %v222_v45  ;;  %v339_v10 = vld [vmem:[#allocation5 + $0x6e0] sm:$0xff] }
  0xc8   :  { %3659 = vmatpush1.bf16.msra.mxu0 %v3658_v0  ;;  %v235_v0 = vld [vmem:[#allocation5 + $0x3a0] sm:$0xff]  ;;  %3721 = vmatprep.subr.bf16.mxu1 %v3720_v57  ;;  %v3698_v57 = vpack.c.bf16 %v307_v50, %v299_v48  ;;  %v718_v36 = vld [vmem:[#allocation8 + $0x48] sm:$0xff]  ;;  %v709_v45 = vld [vmem:[#allocation8] sm:$0xff] }
  0xc9   :  { %3661 = vmatprep.subr.bf16.mxu0 %v3660_v1  ;;  %v243_v1 = vld [vmem:[#allocation5 + $0x3e0] sm:$0xff]  ;;  %v717_v46 = vld [vmem:[#allocation8 + $0x40] sm:$0xff]  ;;  %v726_v48 = vld [vmem:[#allocation8 + $0x88] sm:$0xff] }
  0xca   :  { %v3682_v8 = vpack.c.bf16 %v243_v1, %v235_v0  ;;  %v332_v0 = vld [vmem:[#allocation5 + $0x6a8] sm:$0xff]  ;;  %v347_v20 = vld [vmem:[#allocation5 + $0x720] sm:$0xff]  ;;  %v734_v50 = vld [vmem:[#allocation8 + $0xc8] sm:$0xff] }
  0xcb   :  { %3723 = vmatpush1.bf16.msra.mxu1 %v3722_v2  ;;  %v340_v1 = vld [vmem:[#allocation5 + $0x6e8] sm:$0xff]  ;;  %v3744_v2 = vpack.c.bf16 %v246_v59, %v238_v58  ;;  %v355_v21 = vld [vmem:[#allocation5 + $0x760] sm:$0xff] }
  0xcc   :  { %3663 = vmatpush1.bf16.msra.mxu0 %v3662_v12  ;;  %v251_v12 = vld [vmem:[#allocation5 + $0x420] sm:$0xff]  ;;  %3725 = vmatprep.subr.bf16.mxu1 %v3724_v5  ;;  %v3702_v5 = vpack.c.bf16 %v323_v62, %v315_v61  ;;  %v725_v58 = vld [vmem:[#allocation8 + $0x80] sm:$0xff]  ;;  %v742_v61 = vld [vmem:[#allocation8 + $0x108] sm:$0xff] }
  0xcd   :  { %3665 = vmatprep.subr.bf16.mxu0 %v3664_v13  ;;  %v259_v13 = vld [vmem:[#allocation5 + $0x460] sm:$0xff]  ;;  %v733_v59 = vld [vmem:[#allocation8 + $0xc0] sm:$0xff]  ;;  %v750_v62 = vld [vmem:[#allocation8 + $0x148] sm:$0xff] }
  0xce   :  { %v3686_v19 = vpack.c.bf16 %v259_v13, %v251_v12  ;;  %v348_v12 = vld [vmem:[#allocation5 + $0x728] sm:$0xff]  ;;  %v363_v32 = vld [vmem:[#allocation5 + $0x7a0] sm:$0xff] }
  0xcf   :  { %3727 = vmatpush1.bf16.msra.mxu1 %v3726_v14  ;;  %v356_v13 = vld [vmem:[#allocation5 + $0x768] sm:$0xff]  ;;  %v3748_v14 = vpack.c.bf16 %v262_v7, %v254_v6  ;;  %v371_v33 = vld [vmem:[#allocation5 + $0x7e0] sm:$0xff] }
  0xd0   :  { %3667 = vmatpush1.bf16.msra.mxu0 %v3666_v24  ;;  %v275_v24 = vld [vmem:[#allocation5 + $0x4e0] sm:$0xff]  ;;  %3729 = vmatprep.subr.bf16.mxu1 %v3728_v17  ;;  %v3706_v17 = vpack.c.bf16 %v339_v10, %v331_v9  ;;  %v741_v6 = vld [vmem:[#allocation8 + $0x100] sm:$0xff]  ;;  %v758_v9 = vld [vmem:[#allocation8 + $0x188] sm:$0xff] }
  0xd1   :  { %3669 = vmatprep.subr.bf16.mxu0 %v3668_v25  ;;  %v3730_v25 = vpack.c.bf16 %v181_v42, %v173_v18  ;;  %v3690_v31 = vpack.c.bf16 %v275_v24, %v267_v23  ;;  %v270_v18 = vld [vmem:[#allocation5 + $0x4b8] sm:$0xff]  ;;  %v364_v23 = vld [vmem:[#allocation5 + $0x7a8] sm:$0xff]  ;;  %v766_v10 = vld [vmem:[#allocation8 + $0x1c8] sm:$0xff] }
  0xd2   :  { %v278_v42 = vld [vmem:[#allocation5 + $0x4f8] sm:$0xff]  ;;  %v372_v24 = vld [vmem:[#allocation5 + $0x7e8] sm:$0xff] }
  0xd3   :  { %3731 = vmatpush1.bf16.msra.mxu1 %v3730_v25  ;;  %v3752_v25 = vpack.c.bf16 %v278_v42, %v270_v18  ;;  %v749_v7 = vld [vmem:[#allocation8 + $0x140] sm:$0xff] }
  0xd4   :  { %3671 = vmatpush1.bf16.msra.mxu0 %v3670_v34  ;;  %v3692_v34 = vpack.c.bf16 %v292_v27, %v284_v26  ;;  %3733 = vmatprep.subr.bf16.mxu1 %v3732_v28  ;;  %v269_v26 = vld [vmem:[#allocation5 + $0x4b0] sm:$0xff]  ;;  %v3710_v28 = vpack.c.bf16 %v355_v21, %v347_v20  ;;  %v757_v18 = vld [vmem:[#allocation8 + $0x180] sm:$0xff] }
  0xd5   :  { %3673 = vmatprep.subr.bf16.mxu0 %v3672_v37  ;;  %v3734_v37 = vpack.c.bf16 %v197_v30, %v189_v29  ;;  %v277_v27 = vld [vmem:[#allocation5 + $0x4f0] sm:$0xff]  ;;  %v286_v29 = vld [vmem:[#allocation5 + $0x538] sm:$0xff]  ;;  %v765_v42 = vld [vmem:[#allocation8 + $0x1c0] sm:$0xff] }
  0xd6   :  { %v294_v30 = vld [vmem:[#allocation5 + $0x578] sm:$0xff]  ;;  %v774_v20 = vld [vmem:[#allocation8 + $0x208] sm:$0xff] }
  0xd7   :  { %3735 = vmatpush1.bf16.msra.mxu1 %v3734_v37  ;;  %v3756_v37 = vpack.c.bf16 %v294_v30, %v286_v29  ;;  %v782_v21 = vld [vmem:[#allocation8 + $0x248] sm:$0xff]  ;;  %v773_v29 = vld [vmem:[#allocation8 + $0x200] sm:$0xff] }
  0xd8   :  { %3675 = vmatpush1.bf16.msra.mxu0 %v3674_v47  ;;  %v3696_v47 = vpack.c.bf16 %v308_v39, %v300_v38  ;;  %3737 = vmatprep.subr.bf16.mxu1 %v3736_v40  ;;  %v285_v38 = vld [vmem:[#allocation5 + $0x530] sm:$0xff]  ;;  %v3714_v40 = vpack.c.bf16 %v371_v33, %v363_v32  ;;  %v781_v30 = vld [vmem:[#allocation8 + $0x240] sm:$0xff] }
  0xd9   :  { %3677 = vmatprep.subr.bf16.mxu0 %v3676_v51  ;;  %v3738_v51 = vpack.c.bf16 %v213_v43, %v205_v41  ;;  %v293_v39 = vld [vmem:[#allocation5 + $0x570] sm:$0xff]  ;;  %v302_v41 = vld [vmem:[#allocation5 + $0x5b8] sm:$0xff] }
  0xda   :  { %v310_v43 = vld [vmem:[#allocation5 + $0x5f8] sm:$0xff]  ;;  %v790_v32 = vld [vmem:[#allocation8 + $0x288] sm:$0xff] }
  0xdb   :  { %3739 = vmatpush1.bf16.msra.mxu1 %v3738_v51  ;;  %v3760_v51 = vpack.c.bf16 %v310_v43, %v302_v41  ;;  %v798_v33 = vld [vmem:[#allocation8 + $0x2c8] sm:$0xff]  ;;  %v789_v41 = vld [vmem:[#allocation8 + $0x280] sm:$0xff] }
  0xdc   :  { %3679 = vmatpush1.bf16.msra.mxu0 %v3678_v60  ;;  %v3700_v60 = vpack.c.bf16 %v324_v53, %v316_v52  ;;  %3741 = vmatprep.subr.bf16.mxu1 %v3740_v54  ;;  %v301_v52 = vld [vmem:[#allocation5 + $0x5b0] sm:$0xff]  ;;  %v318_v54 = vld [vmem:[#allocation5 + $0x638] sm:$0xff]  ;;  %v797_v43 = vld [vmem:[#allocation8 + $0x2c0] sm:$0xff] }
  0xdd   :  { %3681 = vmatprep.subr.bf16.mxu0 %v3680_v63  ;;  %v3742_v63 = vpack.c.bf16 %v229_v56, %v221_v55  ;;  %v309_v53 = vld [vmem:[#allocation5 + $0x5f0] sm:$0xff]  ;;  %v326_v55 = vld [vmem:[#allocation5 + $0x678] sm:$0xff]  ;;  %v3782_v56 = vpack.c.bf16 %v717_v46, %v709_v45 }
  0xde   :  { %v806_v45 = vld [vmem:[#allocation8 + $0x308] sm:$0xff] }
  0xdf   :  { %3743 = vmatpush1.bf16.msra.mxu1 %v3742_v63  ;;  %v3764_v63 = vpack.c.bf16 %v326_v55, %v318_v54  ;;  %v814_v46 = vld [vmem:[#allocation8 + $0x348] sm:$0xff]  ;;  %v805_v55 = vld [vmem:[#allocation8 + $0x300] sm:$0xff] }
  0xe0   :  { %3683 = vmatpush1.bf16.msra.mxu0 %v3682_v8  ;;  %v3704_v8 = vpack.c.bf16 %v340_v1, %v332_v0  ;;  %3745 = vmatprep.subr.bf16.mxu1 %v3744_v2  ;;  %v317_v0 = vld [vmem:[#allocation5 + $0x630] sm:$0xff]  ;;  %v334_v2 = vld [vmem:[#allocation5 + $0x6b8] sm:$0xff]  ;;  %v3804_v54 = vpack.c.bf16 %v814_v46, %v806_v45  ;;  %v808_v46 = vld [vmem:[#allocation8 + $0x318] sm:$0xff] }
  0xe1   :  { %3685 = vmatprep.subr.bf16.mxu0 %v3684_v11  ;;  %v3746_v11 = vpack.c.bf16 %v245_v4, %v237_v3  ;;  %v325_v1 = vld [vmem:[#allocation5 + $0x670] sm:$0xff]  ;;  %v342_v3 = vld [vmem:[#allocation5 + $0x6f8] sm:$0xff]  ;;  %v3786_v4 = vpack.c.bf16 %v733_v59, %v725_v58 }
  0xe2   :  { %v822_v58 = vld [vmem:[#allocation8 + $0x388] sm:$0xff]  ;;  %v799_v45 = vld [vmem:[#allocation8 + $0x2d0] sm:$0xff] }
  0xe3   :  { %3747 = vmatpush1.bf16.msra.mxu1 %v3746_v11  ;;  %v3768_v11 = vpack.c.bf16 %v342_v3, %v334_v2  ;;  %v830_v59 = vld [vmem:[#allocation8 + $0x3c8] sm:$0xff]  ;;  %v821_v3 = vld [vmem:[#allocation8 + $0x380] sm:$0xff] }
  0xe4   :  { %3687 = vmatpush1.bf16.msra.mxu0 %v3686_v19  ;;  %v3708_v19 = vpack.c.bf16 %v356_v13, %v348_v12  ;;  %3749 = vmatprep.subr.bf16.mxu1 %v3748_v14  ;;  %v333_v12 = vld [vmem:[#allocation5 + $0x6b0] sm:$0xff]  ;;  %v350_v14 = vld [vmem:[#allocation5 + $0x738] sm:$0xff]  ;;  %v3808_v2 = vpack.c.bf16 %v830_v59, %v822_v58  ;;  %v824_v59 = vld [vmem:[#allocation8 + $0x398] sm:$0xff] }
  0xe5   :  { %3689 = vmatprep.subr.bf16.mxu0 %v3688_v22  ;;  %v3750_v22 = vpack.c.bf16 %v261_v16, %v253_v15  ;;  %v341_v13 = vld [vmem:[#allocation5 + $0x6f0] sm:$0xff]  ;;  %v358_v15 = vld [vmem:[#allocation5 + $0x778] sm:$0xff]  ;;  %v3790_v16 = vpack.c.bf16 %v749_v7, %v741_v6 }
  0xe6   :  { %v838_v6 = vld [vmem:[#allocation8 + $0x408] sm:$0xff]  ;;  %v815_v58 = vld [vmem:[#allocation8 + $0x350] sm:$0xff] }
  0xe7   :  { %3751 = vmatpush1.bf16.msra.mxu1 %v3750_v22  ;;  %v3772_v22 = vpack.c.bf16 %v358_v15, %v350_v14  ;;  %v846_v7 = vld [vmem:[#allocation8 + $0x448] sm:$0xff]  ;;  %v837_v15 = vld [vmem:[#allocation8 + $0x400] sm:$0xff] }
  0xe8   :  { %3691 = vmatpush1.bf16.msra.mxu0 %v3690_v31  ;;  %v3712_v31 = vpack.c.bf16 %v372_v24, %v364_v23  ;;  %3753 = vmatprep.subr.bf16.mxu1 %v3752_v25  ;;  %v349_v23 = vld [vmem:[#allocation5 + $0x730] sm:$0xff]  ;;  %v366_v25 = vld [vmem:[#allocation5 + $0x7b8] sm:$0xff]  ;;  %v3812_v14 = vpack.c.bf16 %v846_v7, %v838_v6  ;;  %v840_v7 = vld [vmem:[#allocation8 + $0x418] sm:$0xff] }
  0xe9   :  { %3693 = vmatprep.subr.bf16.mxu0 %v3692_v34  ;;  %v3754_v34 = vpack.c.bf16 %v277_v27, %v269_v26  ;;  %v357_v24 = vld [vmem:[#allocation5 + $0x770] sm:$0xff]  ;;  %v374_v26 = vld [vmem:[#allocation5 + $0x7f8] sm:$0xff]  ;;  %v3794_v27 = vpack.c.bf16 %v765_v42, %v757_v18 }
  0xea   :  { %v862_v18 = vld [vmem:[#allocation8 + $0x4c8] sm:$0xff]  ;;  %v831_v6 = vld [vmem:[#allocation8 + $0x3d0] sm:$0xff] }
  0xeb   :  { %3755 = vmatpush1.bf16.msra.mxu1 %v3754_v34  ;;  %v3776_v34 = vpack.c.bf16 %v374_v26, %v366_v25  ;;  %v853_v25 = vld [vmem:[#allocation8 + $0x480] sm:$0xff] }
  0xec   :  { %3695 = vmatpush1.bf16.msra.mxu0 %v3694_v44  ;;  %v3780_v44 = vpack.c.bf16 %v718_v36, %v710_v35  ;;  %3757 = vmatprep.subr.bf16.mxu1 %v3756_v37  ;;  %v365_v35 = vld [vmem:[#allocation5 + $0x7b0] sm:$0xff]  ;;  %v712_v37 = vld [vmem:[#allocation8 + $0x18] sm:$0xff]  ;;  %v861_v26 = vld [vmem:[#allocation8 + $0x4c0] sm:$0xff] }
  0xed   :  { %3697 = vmatprep.subr.bf16.mxu0 %v3696_v47  ;;  %v3758_v47 = vpack.c.bf16 %v293_v39, %v285_v38  ;;  %v373_v36 = vld [vmem:[#allocation5 + $0x7f0] sm:$0xff]  ;;  %v720_v38 = vld [vmem:[#allocation8 + $0x58] sm:$0xff]  ;;  %v3798_v39 = vpack.c.bf16 %v781_v30, %v773_v29 }
  0xee   :  { %v878_v29 = vld [vmem:[#allocation8 + $0x548] sm:$0xff] }
  0xef   :  { %3759 = vmatpush1.bf16.msra.mxu1 %v3758_v47  ;;  %v4036_v47 = vpack.c.bf16 %v720_v38, %v712_v37  ;;  %v869_v37 = vld [vmem:[#allocation8 + $0x500] sm:$0xff] }
  0xf0   :  { %3699 = vmatpush1.bf16.msra.mxu0 %v3698_v57  ;;  %v3784_v57 = vpack.c.bf16 %v734_v50, %v726_v48  ;;  %3761 = vmatprep.subr.bf16.mxu1 %v3760_v51  ;;  %v711_v48 = vld [vmem:[#allocation8 + $0x10] sm:$0xff]  ;;  %v728_v51 = vld [vmem:[#allocation8 + $0x98] sm:$0xff]  ;;  %v877_v38 = vld [vmem:[#allocation8 + $0x540] sm:$0xff] }
  0xf1   :  { %3701 = vmatprep.subr.bf16.mxu0 %v3700_v60  ;;  %v3762_v60 = vpack.c.bf16 %v309_v53, %v301_v52  ;;  %v719_v50 = vld [vmem:[#allocation8 + $0x50] sm:$0xff]  ;;  %v736_v52 = vld [vmem:[#allocation8 + $0xd8] sm:$0xff]  ;;  %v3802_v53 = vpack.c.bf16 %v797_v43, %v789_v41  ;;  %v894_v41 = vld [vmem:[#allocation8 + $0x5c8] sm:$0xff] }
  0xf3   :  { %3763 = vmatpush1.bf16.msra.mxu1 %v3762_v60  ;;  %v4040_v60 = vpack.c.bf16 %v736_v52, %v728_v51  ;;  %v885_v51 = vld [vmem:[#allocation8 + $0x580] sm:$0xff] }
  0xf4   :  { %3703 = vmatpush1.bf16.msra.mxu0 %v3702_v5  ;;  %v3788_v5 = vpack.c.bf16 %v750_v62, %v742_v61  ;;  %3765 = vmatprep.subr.bf16.mxu1 %v3764_v63  ;;  %v727_v61 = vld [vmem:[#allocation8 + $0x90] sm:$0xff]  ;;  %v744_v63 = vld [vmem:[#allocation8 + $0x118] sm:$0xff]  ;;  %v893_v52 = vld [vmem:[#allocation8 + $0x5c0] sm:$0xff] }
  0xf5   :  { %3705 = vmatprep.subr.bf16.mxu0 %v3704_v8  ;;  %v3766_v8 = vpack.c.bf16 %v325_v1, %v317_v0  ;;  %v735_v62 = vld [vmem:[#allocation8 + $0xd0] sm:$0xff]  ;;  %v752_v0 = vld [vmem:[#allocation8 + $0x158] sm:$0xff] }
  0xf7   :  { %3767 = vmatpush1.bf16.msra.mxu1 %v3766_v8  ;;  %v4044_v8 = vpack.c.bf16 %v752_v0, %v744_v63  ;;  %v901_v63 = vld [vmem:[#allocation8 + $0x600] sm:$0xff] }
  0xf8   :  { %3707 = vmatpush1.bf16.msra.mxu0 %v3706_v17  ;;  %v3792_v17 = vpack.c.bf16 %v766_v10, %v758_v9  ;;  %3769 = vmatprep.subr.bf16.mxu1 %v3768_v11  ;;  %v743_v9 = vld [vmem:[#allocation8 + $0x110] sm:$0xff]  ;;  %v760_v11 = vld [vmem:[#allocation8 + $0x198] sm:$0xff]  ;;  %v909_v0 = vld [vmem:[#allocation8 + $0x640] sm:$0xff] }
  0xf9   :  { %3709 = vmatprep.subr.bf16.mxu0 %v3708_v19  ;;  %v3770_v19 = vpack.c.bf16 %v341_v13, %v333_v12  ;;  %v751_v10 = vld [vmem:[#allocation8 + $0x150] sm:$0xff]  ;;  %v768_v12 = vld [vmem:[#allocation8 + $0x1d8] sm:$0xff] }
  0xfa   :  { %v4048_v42 = vpack.c.bf16 %v768_v12, %v760_v11  ;;  %v917_v11 = vld [vmem:[#allocation8 + $0x680] sm:$0xff] }
  0xfb   :  { %3771 = vmatpush1.bf16.msra.mxu1 %v3770_v19  ;;  %v759_v19 = vld [vmem:[#allocation8 + $0x190] sm:$0xff]  ;;  %v925_v12 = vld [vmem:[#allocation8 + $0x6c0] sm:$0xff] }
  0xfc   :  { %3711 = vmatpush1.bf16.msra.mxu0 %v3710_v28  ;;  %v3796_v28 = vpack.c.bf16 %v782_v21, %v774_v20  ;;  %3773 = vmatprep.subr.bf16.mxu1 %v3772_v22  ;;  %v767_v20 = vld [vmem:[#allocation8 + $0x1d0] sm:$0xff]  ;;  %v776_v21 = vld [vmem:[#allocation8 + $0x218] sm:$0xff] }
  0xfd   :  { %3713 = vmatprep.subr.bf16.mxu0 %v3712_v31  ;;  %v3774_v31 = vpack.c.bf16 %v357_v24, %v349_v23  ;;  %v784_v22 = vld [vmem:[#allocation8 + $0x258] sm:$0xff] }
  0xfe   :  { %v4052_v30 = vpack.c.bf16 %v784_v22, %v776_v21  ;;  %v933_v21 = vld [vmem:[#allocation8 + $0x700] sm:$0xff] }
  0xff   :  { %3775 = vmatpush1.bf16.msra.mxu1 %v3774_v31  ;;  %v775_v31 = vld [vmem:[#allocation8 + $0x210] sm:$0xff]  ;;  %v941_v22 = vld [vmem:[#allocation8 + $0x740] sm:$0xff] }
 0x100   :  { %3715 = vmatpush1.bf16.msra.mxu0 %v3714_v40  ;;  %v3800_v40 = vpack.c.bf16 %v798_v33, %v790_v32  ;;  %3777 = vmatprep.subr.bf16.mxu1 %v3776_v34  ;;  %v783_v32 = vld [vmem:[#allocation8 + $0x250] sm:$0xff]  ;;  %v792_v33 = vld [vmem:[#allocation8 + $0x298] sm:$0xff] }
 0x101   :  { %3781 = vmatprep.subr.bf16.mxu0 %v3780_v44  ;;  %v3778_v44 = vpack.c.bf16 %v373_v36, %v365_v35  ;;  %v800_v34 = vld [vmem:[#allocation8 + $0x2d8] sm:$0xff]  ;;  %v3818_v35 = vpack.c.bf16 %v861_v26, %v853_v25  ;;  %v958_v25 = vld [vmem:[#allocation8 + $0x7c8] sm:$0xff] }
 0x102   :  { %v4056_v43 = vpack.c.bf16 %v800_v34, %v792_v33  ;;  %v949_v33 = vld [vmem:[#allocation8 + $0x780] sm:$0xff] }
 0x103   :  { %624 = vmatmul.mubr.f32.vlgmr.msra.gmra.mrb[2].mxu0 %v5340_v49  ;;  %3779 = vmatpush1.bf16.msra.mxu1 %v3778_v44  ;;  %v791_v44 = vld [vmem:[#allocation8 + $0x290] sm:$0xff]  ;;  %v957_v34 = vld [vmem:[#allocation8 + $0x7c0] sm:$0xff] }
 0x104   :  { %3783 = vmatpush1.bf16.msra.mxu0 %v3782_v56  ;;  %v813_v56 = vld [vmem:[#allocation8 + $0x340] sm:$0xff]  ;;  %4037 = vmatprep.subr.bf16.mxu1 %v4036_v47  ;;  %v816_v47 = vld [vmem:[#allocation8 + $0x358] sm:$0xff] }
 0x105   :  { %3785 = vmatprep.subr.bf16.mxu0 %v3784_v57  ;;  %v4038_v57 = vpack.c.bf16 %v719_v50, %v711_v48  ;;  %v3806_v1 = vpack.c.bf16 %v813_v56, %v805_v55  ;;  %v3822_v48 = vpack.c.bf16 %v877_v38, %v869_v37  ;;  %v910_v55 = vld [vmem:[#allocation8 + $0x648] sm:$0xff]  ;;  %v4060_v56 = vpack.c.bf16 %v816_v47, %v808_v46 }
 0x106   :  { %695 = vmatmul.mubr.f32.vlgmr.msra.gmra.mrb[2].mxu1 %v5340_v49  ;;  %v845_v49 = vld [vmem:[#allocation8 + $0x440] sm:$0xff]  ;;  %v974_v37 = vld [vmem:[#allocation8 + $0x848] sm:$0xff] }
 0x107   :  { %4039 = vmatpush1.bf16.msra.mxu1 %v4038_v57  ;;  %v3814_v23 = vpack.c.bf16 %v845_v49, %v837_v15  ;;  %v807_v57 = vld [vmem:[#allocation8 + $0x310] sm:$0xff]  ;;  %v942_v15 = vld [vmem:[#allocation8 + $0x748] sm:$0xff] }
 0x108   :  { %3787 = vmatpush1.bf16.msra.mxu0 %v3786_v4  ;;  %v829_v4 = vld [vmem:[#allocation8 + $0x3c0] sm:$0xff]  ;;  %4041 = vmatprep.subr.bf16.mxu1 %v4040_v60  ;;  %v832_v60 = vld [vmem:[#allocation8 + $0x3d8] sm:$0xff] }
 0x109   :  { %3789 = vmatprep.subr.bf16.mxu0 %v3788_v5  ;;  %v4042_v5 = vpack.c.bf16 %v735_v62, %v727_v61  ;;  %v3810_v13 = vpack.c.bf16 %v829_v4, %v821_v3  ;;  %v3826_v61 = vpack.c.bf16 %v893_v52, %v885_v51  ;;  %v926_v3 = vld [vmem:[#allocation8 + $0x6c8] sm:$0xff]  ;;  %v4064_v4 = vpack.c.bf16 %v832_v60, %v824_v59  ;;  %v904_v51 = vld [vmem:[#allocation8 + $0x618] sm:$0xff] }
 0x10a   :  { %v912_v52 = vld [vmem:[#allocation8 + $0x658] sm:$0xff] }
 0x10b   :  { %4043 = vmatpush1.bf16.msra.mxu1 %v4042_v5  ;;  %v823_v5 = vld [vmem:[#allocation8 + $0x390] sm:$0xff] }
 0x10c   :  { %3791 = vmatpush1.bf16.msra.mxu0 %v3790_v16  ;;  %v4046_v16 = vpack.c.bf16 %v751_v10, %v743_v9  ;;  %4045 = vmatprep.subr.bf16.mxu1 %v4044_v8  ;;  %v848_v8 = vld [vmem:[#allocation8 + $0x458] sm:$0xff]  ;;  %v3830_v9 = vpack.c.bf16 %v909_v0, %v901_v63 }
 0x10d   :  { %3793 = vmatprep.subr.bf16.mxu0 %v3792_v17  ;;  %v854_v17 = vld [vmem:[#allocation8 + $0x488] sm:$0xff]  ;;  %v4068_v49 = vpack.c.bf16 %v848_v8, %v840_v7  ;;  %v936_v63 = vld [vmem:[#allocation8 + $0x718] sm:$0xff] }
 0x10e   :  { %v3816_v24 = vpack.c.bf16 %v862_v18, %v854_v17  ;;  %v847_v17 = vld [vmem:[#allocation8 + $0x450] sm:$0xff]  ;;  %v856_v18 = vld [vmem:[#allocation8 + $0x498] sm:$0xff] }
 0x10f   :  { %4047 = vmatpush1.bf16.msra.mxu1 %v4046_v16  ;;  %v839_v16 = vld [vmem:[#allocation8 + $0x410] sm:$0xff]  ;;  %v944_v0 = vld [vmem:[#allocation8 + $0x758] sm:$0xff] }
 0x110   :  { %3795 = vmatpush1.bf16.msra.mxu0 %v3794_v27  ;;  %v4050_v27 = vpack.c.bf16 %v767_v20, %v759_v19  ;;  %4049 = vmatprep.subr.bf16.mxu1 %v4048_v42  ;;  %v864_v42 = vld [vmem:[#allocation8 + $0x4d8] sm:$0xff]  ;;  %v3834_v19 = vpack.c.bf16 %v925_v12, %v917_v11 }
 0x111   :  { %3797 = vmatprep.subr.bf16.mxu0 %v3796_v28  ;;  %v870_v28 = vld [vmem:[#allocation8 + $0x508] sm:$0xff]  ;;  %v4072_v26 = vpack.c.bf16 %v864_v42, %v856_v18  ;;  %v968_v11 = vld [vmem:[#allocation8 + $0x818] sm:$0xff] }
 0x112   :  { %v3820_v36 = vpack.c.bf16 %v878_v29, %v870_v28  ;;  %v863_v28 = vld [vmem:[#allocation8 + $0x4d0] sm:$0xff]  ;;  %v872_v29 = vld [vmem:[#allocation8 + $0x518] sm:$0xff] }
 0x113   :  { %4051 = vmatpush1.bf16.msra.mxu1 %v4050_v27  ;;  %v855_v27 = vld [vmem:[#allocation8 + $0x490] sm:$0xff]  ;;  %v976_v12 = vld [vmem:[#allocation8 + $0x858] sm:$0xff] }
 0x114   :  { %3799 = vmatpush1.bf16.msra.mxu0 %v3798_v39  ;;  %v4054_v39 = vpack.c.bf16 %v783_v32, %v775_v31  ;;  %4053 = vmatprep.subr.bf16.mxu1 %v4052_v30  ;;  %v880_v30 = vld [vmem:[#allocation8 + $0x558] sm:$0xff]  ;;  %v3838_v31 = vpack.c.bf16 %v941_v22, %v933_v21  ;;  %v965_v21 = vld [vmem:[#allocation8 + $0x800] sm:$0xff] }
 0x115   :  { %3801 = vmatprep.subr.bf16.mxu0 %v3800_v40  ;;  %v886_v40 = vld [vmem:[#allocation8 + $0x588] sm:$0xff]  ;;  %v4076_v38 = vpack.c.bf16 %v880_v30, %v872_v29  ;;  %v973_v22 = vld [vmem:[#allocation8 + $0x840] sm:$0xff]  ;;  %v984_v30 = vld [vmem:[#allocation8 + $0x898] sm:$0xff] }
 0x116   :  { %v3824_v50 = vpack.c.bf16 %v894_v41, %v886_v40  ;;  %v879_v40 = vld [vmem:[#allocation8 + $0x550] sm:$0xff]  ;;  %v888_v41 = vld [vmem:[#allocation8 + $0x598] sm:$0xff]  ;;  %v990_v29 = vld [vmem:[#allocation8 + $0x8c8] sm:$0xff] }
 0x117   :  { %4055 = vmatpush1.bf16.msra.mxu1 %v4054_v39  ;;  %v871_v39 = vld [vmem:[#allocation8 + $0x510] sm:$0xff] }
 0x118   :  { %3803 = vmatpush1.bf16.msra.mxu0 %v3802_v53  ;;  %v4058_v53 = vpack.c.bf16 %v799_v45, %v791_v44  ;;  %4057 = vmatprep.subr.bf16.mxu1 %v4056_v43  ;;  %v896_v43 = vld [vmem:[#allocation8 + $0x5d8] sm:$0xff]  ;;  %v3842_v44 = vpack.c.bf16 %v957_v34, %v949_v33  ;;  %v4078_v46 = vpack.c.bf16 %v879_v40, %v871_v39  ;;  %v983_v40 = vld [vmem:[#allocation8 + $0x890] sm:$0xff] }
 0x119   :  { %3805 = vmatprep.subr.bf16.mxu0 %v3804_v54  ;;  %v902_v54 = vld [vmem:[#allocation8 + $0x608] sm:$0xff]  ;;  %v4080_v47 = vpack.c.bf16 %v896_v43, %v888_v41  ;;  %v3846_v33 = vpack.c.bf16 %v973_v22, %v965_v21  ;;  %v991_v41 = vld [vmem:[#allocation8 + $0x8d0] sm:$0xff]  ;;  %v1048_v21 = vld [vmem:[#allocation8 + $0xa98] sm:$0xff] }
 0x11a   :  { %v3828_v62 = vpack.c.bf16 %v910_v55, %v902_v54  ;;  %v4084_v54 = vpack.c.bf16 %v912_v52, %v904_v51  ;;  %v903_v55 = vld [vmem:[#allocation8 + $0x610] sm:$0xff]  ;;  %v998_v43 = vld [vmem:[#allocation8 + $0x908] sm:$0xff]  ;;  %v1005_v51 = vld [vmem:[#allocation8 + $0x940] sm:$0xff] }
 0x11b   :  { %4059 = vmatpush1.bf16.msra.mxu1 %v4058_v53  ;;  %v1056_v22 = vld [vmem:[#allocation8 + $0xad8] sm:$0xff] }
 0x11c   :  { %3807 = vmatpush1.bf16.msra.mxu0 %v3806_v1  ;;  %v4062_v1 = vpack.c.bf16 %v815_v58, %v807_v57  ;;  %4061 = vmatprep.subr.bf16.mxu1 %v4060_v56  ;;  %v911_v56 = vld [vmem:[#allocation8 + $0x650] sm:$0xff]  ;;  %v920_v57 = vld [vmem:[#allocation8 + $0x698] sm:$0xff] }
 0x11d   :  { %3809 = vmatprep.subr.bf16.mxu0 %v3808_v2  ;;  %v918_v2 = vld [vmem:[#allocation8 + $0x688] sm:$0xff]  ;;  %v928_v58 = vld [vmem:[#allocation8 + $0x6d8] sm:$0xff]  ;;  %v4086_v59 = vpack.c.bf16 %v911_v56, %v903_v55  ;;  %v1007_v55 = vld [vmem:[#allocation8 + $0x950] sm:$0xff] }
 0x11e   :  { %v3832_v10 = vpack.c.bf16 %v926_v3, %v918_v2  ;;  %v4088_v60 = vpack.c.bf16 %v928_v58, %v920_v57  ;;  %v4092_v2 = vpack.c.bf16 %v944_v0, %v936_v63  ;;  %v935_v3 = vld [vmem:[#allocation8 + $0x710] sm:$0xff]  ;;  %v1014_v56 = vld [vmem:[#allocation8 + $0x988] sm:$0xff]  ;;  %v1016_v58 = vld [vmem:[#allocation8 + $0x998] sm:$0xff] }
 0x11f   :  { %4063 = vmatpush1.bf16.msra.mxu1 %v4062_v1  ;;  %v1022_v57 = vld [vmem:[#allocation8 + $0x9c8] sm:$0xff]  ;;  %v1021_v63 = vld [vmem:[#allocation8 + $0x9c0] sm:$0xff] }
 0x120   :  { %3811 = vmatpush1.bf16.msra.mxu0 %v3810_v13  ;;  %v4066_v13 = vpack.c.bf16 %v831_v6, %v823_v5  ;;  %4065 = vmatprep.subr.bf16.mxu1 %v4064_v4  ;;  %v943_v4 = vld [vmem:[#allocation8 + $0x750] sm:$0xff]  ;;  %v952_v5 = vld [vmem:[#allocation8 + $0x798] sm:$0xff]  ;;  %v3856_v0 = vpack.c.bf16 %v1022_v57, %v1014_v56 }
 0x121   :  { %3813 = vmatprep.subr.bf16.mxu0 %v3812_v14  ;;  %v934_v14 = vld [vmem:[#allocation8 + $0x708] sm:$0xff]  ;;  %v960_v6 = vld [vmem:[#allocation8 + $0x7d8] sm:$0xff]  ;;  %v4094_v7 = vpack.c.bf16 %v943_v4, %v935_v3  ;;  %v1023_v3 = vld [vmem:[#allocation8 + $0x9d0] sm:$0xff] }
 0x122   :  { %v3836_v20 = vpack.c.bf16 %v942_v15, %v934_v14  ;;  %v4096_v8 = vpack.c.bf16 %v960_v6, %v952_v5  ;;  %v4100_v14 = vpack.c.bf16 %v976_v12, %v968_v11  ;;  %v377_v15 = vlaneseq  ;;  %v1030_v4 = vld [vmem:[#allocation8 + $0xa08] sm:$0xff]  ;;  %v1032_v6 = vld [vmem:[#allocation8 + $0xa18] sm:$0xff]  ;;  %v1037_v11 = vld [vmem:[#allocation8 + $0xa40] sm:$0xff] }
 0x123   :  { %4067 = vmatpush1.bf16.msra.mxu1 %v4066_v13  ;;  %v1038_v5 = vld [vmem:[#allocation8 + $0xa48] sm:$0xff] }
 0x124   :  { %3815 = vmatpush1.bf16.msra.mxu0 %v3814_v23  ;;  %v4070_v23 = vpack.c.bf16 %v847_v17, %v839_v16  ;;  %4069 = vmatprep.subr.bf16.mxu1 %v4068_v49  ;;  %v5348_v49 = vshrl.u32 %v377_v15, 7  ;;  %v5351_v17 = vld [vmem:[#allocation7] sm:$0xff]  ;;  %v1031_v15 = vld [vmem:[#allocation8 + $0xa10] sm:$0xff] }
 0x125   :  { %3817 = vmatprep.subr.bf16.mxu0 %v3816_v24  ;;  %v950_v24 = vld [vmem:[#allocation8 + $0x788] sm:$0xff] }
 0x126   :  { %v3840_v32 = vpack.c.bf16 %v958_v25, %v950_v24  ;;  %v379_v16 = vsub.s32 0, %v5348_v49  ;;  %v383_v18 = vsub.s32 1, %v5348_v49  ;;  %v967_v25 = vld [vmem:[#allocation8 + $0x810] sm:$0xff]  ;;  %v391_v12 = vsub.s32 3, %v5348_v49 }
 0x127   :  { %4071 = vmatpush1.bf16.msra.mxu1 %v4070_v23 }
 0x128   :  { %3819 = vmatpush1.bf16.msra.mxu0 %v3818_v35  ;;  %v4074_v35 = vpack.c.bf16 %v863_v28, %v855_v27  ;;  %4073 = vmatprep.subr.bf16.mxu1 %v4072_v26  ;;  %v380_v42 = vrot.slane %v5351_v17, %v379_v16  ;;  %v975_v26 = vld [vmem:[#allocation8 + $0x850] sm:$0xff]  ;;  %v982_v27 = vld [vmem:[#allocation8 + $0x888] sm:$0xff] }
 0x129   :  { %3821 = vmatprep.subr.bf16.mxu0 %v3820_v36  ;;  %v966_v36 = vld [vmem:[#allocation8 + $0x808] sm:$0xff]  ;;  %v4102_v34 = vpack.c.bf16 %v975_v26, %v967_v25  ;;  %v1045_v25 = vld [vmem:[#allocation8 + $0xa80] sm:$0xff] }
 0x12a   :  { %v3844_v45 = vpack.c.bf16 %v974_v37, %v966_v36  ;;  %v989_v36 = vld [vmem:[#allocation8 + $0x8c0] sm:$0xff] }
 0x12b   :  { %4075 = vmatpush1.bf16.msra.mxu1 %v4074_v35  ;;  %v981_v35 = vld [vmem:[#allocation8 + $0x880] sm:$0xff] }
 0x12c   :  { %3823 = vmatpush1.bf16.msra.mxu0 %v3822_v48  ;;  %4077 = vmatprep.subr.bf16.mxu1 %v4076_v38  ;;  %v887_v48 = vld [vmem:[#allocation8 + $0x590] sm:$0xff]  ;;  %v3848_v38 = vpack.c.bf16 %v990_v29, %v982_v27  ;;  %v1053_v26 = vld [vmem:[#allocation8 + $0xac0] sm:$0xff]  ;;  %v392_v27 = vrot.slane %v5351_v17, %v391_v12  ;;  %v4120_v29 = vpack.c.bf16 %v1056_v22, %v1048_v21 }
 0x12d   :  { %3825 = vmatprep.subr.bf16.mxu0 %v3824_v50  ;;  %v895_v50 = vld [vmem:[#allocation8 + $0x5d0] sm:$0xff]  ;;  %v1109_v21 = vld [vmem:[#allocation8 + $0xc80] sm:$0xff] }
 0x12e   :  { %v4082_v53 = vpack.c.bf16 %v895_v50, %v887_v48  ;;  %v4106_v48 = vpack.c.bf16 %v991_v41, %v983_v40  ;;  %v997_v50 = vld [vmem:[#allocation8 + $0x900] sm:$0xff]  ;;  %v3866_v40 = vpack.c.bf16 %v1053_v26, %v1045_v25  ;;  %v1111_v25 = vld [vmem:[#allocation8 + $0xc90] sm:$0xff] }
 0x12f   :  { %4079 = vmatpush1.bf16.msra.mxu1 %v4078_v46  ;;  %v1008_v46 = vld [vmem:[#allocation8 + $0x958] sm:$0xff]  ;;  %v1117_v22 = vld [vmem:[#allocation8 + $0xcc0] sm:$0xff]  ;;  %v1119_v26 = vld [vmem:[#allocation8 + $0xcd0] sm:$0xff] }
 0x130   :  { %3827 = vmatpush1.bf16.msra.mxu0 %v3826_v61  ;;  %4081 = vmatprep.subr.bf16.mxu1 %v4080_v47  ;;  %v919_v61 = vld [vmem:[#allocation8 + $0x690] sm:$0xff]  ;;  %v3850_v47 = vpack.c.bf16 %v989_v36, %v981_v35  ;;  %v1064_v35 = vld [vmem:[#allocation8 + $0xb18] sm:$0xff] }
 0x131   :  { %3829 = vmatprep.subr.bf16.mxu0 %v3828_v62  ;;  %v927_v62 = vld [vmem:[#allocation8 + $0x6d0] sm:$0xff]  ;;  %v1072_v36 = vld [vmem:[#allocation8 + $0xb58] sm:$0xff] }
 0x132   :  { %v4090_v1 = vpack.c.bf16 %v927_v62, %v919_v61  ;;  %v1013_v62 = vld [vmem:[#allocation8 + $0x980] sm:$0xff] }
 0x133   :  { %4083 = vmatpush1.bf16.msra.mxu1 %v4082_v53 }
 0x134   :  { %3831 = vmatpush1.bf16.msra.mxu0 %v3830_v9  ;;  %4085 = vmatprep.subr.bf16.mxu1 %v4084_v54  ;;  %v951_v9 = vld [vmem:[#allocation8 + $0x790] sm:$0xff] }
 0x135   :  { %3833 = vmatprep.subr.bf16.mxu0 %v3832_v10  ;;  %v959_v10 = vld [vmem:[#allocation8 + $0x7d0] sm:$0xff] }
 0x136   :  { %v4098_v13 = vpack.c.bf16 %v959_v10, %v951_v9  ;;  %v999_v54 = vld [vmem:[#allocation8 + $0x910] sm:$0xff]  ;;  %v1029_v10 = vld [vmem:[#allocation8 + $0xa00] sm:$0xff] }
 0x137   :  { %4087 = vmatpush1.bf16.msra.mxu1 %v4086_v59  ;;  %v1024_v59 = vld [vmem:[#allocation8 + $0x9d8] sm:$0xff]  ;;  %v4110_v61 = vpack.c.bf16 %v1007_v55, %v999_v54 }
 0x138   :  { %3835 = vmatpush1.bf16.msra.mxu0 %v3834_v19  ;;  %4089 = vmatprep.subr.bf16.mxu1 %v4088_v60  ;;  %v384_v19 = vrot.slane %v5351_v17, %v383_v18  ;;  %v3854_v60 = vpack.c.bf16 %v1005_v51, %v997_v50  ;;  %v1071_v50 = vld [vmem:[#allocation8 + $0xb50] sm:$0xff]  ;;  %v1078_v51 = vld [vmem:[#allocation8 + $0xb88] sm:$0xff]  ;;  %v1088_v54 = vld [vmem:[#allocation8 + $0xbd8] sm:$0xff] }
 0x139   :  { %3837 = vmatprep.subr.bf16.mxu0 %v3836_v20 }
 0x13b   :  { %4091 = vmatpush1.bf16.msra.mxu1 %v4090_v1  ;;  %v4112_v1 = vpack.c.bf16 %v1024_v59, %v1016_v58  ;;  %v1077_v58 = vld [vmem:[#allocation8 + $0xb80] sm:$0xff] }
 0x13c   :  { %3839 = vmatpush1.bf16.msra.mxu0 %v3838_v31  ;;  %4093 = vmatprep.subr.bf16.mxu1 %v4092_v2  ;;  %v992_v31 = vld [vmem:[#allocation8 + $0x8d8] sm:$0xff]  ;;  %v1015_v2 = vld [vmem:[#allocation8 + $0x990] sm:$0xff]  ;;  %v1085_v59 = vld [vmem:[#allocation8 + $0xbc0] sm:$0xff] }
 0x13d   :  { %3841 = vmatprep.subr.bf16.mxu0 %v3840_v32  ;;  %v4104_v39 = vpack.c.bf16 %v992_v31, %v984_v30  ;;  %v4114_v9 = vpack.c.bf16 %v1023_v3, %v1015_v2  ;;  %v1047_v30 = vld [vmem:[#allocation8 + $0xa90] sm:$0xff]  ;;  %v1096_v2 = vld [vmem:[#allocation8 + $0xc18] sm:$0xff] }
 0x13e   :  { %v1055_v31 = vld [vmem:[#allocation8 + $0xad0] sm:$0xff]  ;;  %v1104_v3 = vld [vmem:[#allocation8 + $0xc58] sm:$0xff] }
 0x13f   :  { %4095 = vmatpush1.bf16.msra.mxu1 %v4094_v7  ;;  %v1040_v7 = vld [vmem:[#allocation8 + $0xa58] sm:$0xff]  ;;  %v4122_v41 = vpack.c.bf16 %v1055_v31, %v1047_v30  ;;  %v3882_v31 = vpack.c.bf16 %v1117_v22, %v1109_v21  ;;  %v1198_v21 = vld [vmem:[#allocation8 + $0xf48] sm:$0xff] }
 0x140   :  { %3843 = vmatpush1.bf16.msra.mxu0 %v3842_v44  ;;  %4097 = vmatprep.subr.bf16.mxu1 %v4096_v8  ;;  %v1006_v44 = vld [vmem:[#allocation8 + $0x948] sm:$0xff]  ;;  %v3858_v8 = vpack.c.bf16 %v1021_v63, %v1013_v62  ;;  %v1079_v62 = vld [vmem:[#allocation8 + $0xb90] sm:$0xff]  ;;  %v1136_v30 = vld [vmem:[#allocation8 + $0xd58] sm:$0xff] }
 0x141   :  { %3845 = vmatprep.subr.bf16.mxu0 %v3844_v45  ;;  %v1000_v45 = vld [vmem:[#allocation8 + $0x918] sm:$0xff]  ;;  %v3852_v52 = vpack.c.bf16 %v1006_v44, %v998_v43  ;;  %v1061_v43 = vld [vmem:[#allocation8 + $0xb00] sm:$0xff]  ;;  %v1087_v63 = vld [vmem:[#allocation8 + $0xbd0] sm:$0xff] }
 0x142   :  { %v4108_v53 = vpack.c.bf16 %v1008_v46, %v1000_v45  ;;  %v1069_v44 = vld [vmem:[#allocation8 + $0xb40] sm:$0xff]  ;;  %v1192_v22 = vld [vmem:[#allocation8 + $0xf18] sm:$0xff] }
 0x143   :  { %4099 = vmatpush1.bf16.msra.mxu1 %v4098_v13  ;;  %v3860_v13 = vpack.c.bf16 %v1038_v5, %v1030_v4  ;;  %v3870_v56 = vpack.c.bf16 %v1069_v44, %v1061_v43  ;;  %v3874_v4 = vpack.c.bf16 %v1085_v59, %v1077_v58  ;;  %v4130_v5 = vpack.c.bf16 %v1087_v63, %v1079_v62  ;;  %v1142_v43 = vld [vmem:[#allocation8 + $0xd88] sm:$0xff]  ;;  %v1160_v59 = vld [vmem:[#allocation8 + $0xe18] sm:$0xff]  ;;  %v1157_v63 = vld [vmem:[#allocation8 + $0xe00] sm:$0xff] }
 0x144   :  { %4101 = vmatprep.subr.bf16.mxu1 %v4100_v14  ;;  %v4116_v14 = vpack.c.bf16 %v1040_v7, %v1032_v6  ;;  %v1093_v6 = vld [vmem:[#allocation8 + $0xc00] sm:$0xff]  ;;  %v1150_v44 = vld [vmem:[#allocation8 + $0xdc8] sm:$0xff] }
 0x145   :  { %v1101_v7 = vld [vmem:[#allocation8 + $0xc40] sm:$0xff]  ;;  %v1166_v58 = vld [vmem:[#allocation8 + $0xe48] sm:$0xff] }
 0x196   :  { %v483_v20 = vpop.f32.mrb[0].mxu0 }
 0x197   :  { %v484_v23 = vadd.f32 %v483_v20, %v380_v42  ;;  %v485_v24 = vpop.f32.mrb[1].mxu0  ;;  %v1039_v42 = vld [vmem:[#allocation8 + $0xa50] sm:$0xff]  ;;  %v1054_v20 = vld [vmem:[#allocation8 + $0xac8] sm:$0xff] }
 0x198   :  { %v486_v28 = vadd.f32 %v485_v24, %v384_v19  ;;  %v1046_v19 = vld [vmem:[#allocation8 + $0xa88] sm:$0xff]  ;;  %v4118_v24 = vpack.c.bf16 %v1039_v42, %v1031_v15  ;;  %v1112_v15 = vld [vmem:[#allocation8 + $0xc98] sm:$0xff] }
 0x199   :  { %v5362_v37 = vmax.f32 %v484_v23, 0.0  ;;  %v3862_v23 = vpack.c.bf16 %v1037_v11, %v1029_v10  ;;  %v1095_v10 = vld [vmem:[#allocation8 + $0xc10] sm:$0xff]  ;;  %v1120_v42 = vld [vmem:[#allocation8 + $0xcd8] sm:$0xff] }
 0x19a   :  { %v5360_v32 = vmax.f32 %v486_v28, 0.0  ;;  %v3864_v28 = vpack.c.bf16 %v1054_v20, %v1046_v19  ;;  %v1103_v11 = vld [vmem:[#allocation8 + $0xc50] sm:$0xff]  ;;  %v3878_v19 = vpack.c.bf16 %v1101_v7, %v1093_v6  ;;  %v1182_v6 = vld [vmem:[#allocation8 + $0xec8] sm:$0xff]  ;;  %v1176_v7 = vld [vmem:[#allocation8 + $0xe98] sm:$0xff] }
 0x19b   :  { %v4134_v20 = vpack.c.bf16 %v1103_v11, %v1095_v10  ;;  %v1173_v11 = vld [vmem:[#allocation8 + $0xe80] sm:$0xff] }
 0x19c   :  { %1839 = vmatprep.mubr.f32.mxu0 %v5360_v32  ;;  %2123 = vmatprep.mubr.f32.mxu1 %v5360_v32 }
 0x19d   :  { %1840 = vmatmul.mubr.f32.vlgmr.msra.gmra.mrb[4].mxu0 %v5362_v37  ;;  %2124 = vmatmul.mubr.f32.vlgmr.msra.gmra.mrb[4].mxu1 %v5362_v37 }
 0x19e   :  { %3847 = vmatpush1.bf16.msra.mxu0 %v3846_v33  ;;  %4103 = vmatpush1.bf16.msra.mxu1 %v4102_v34  ;;  %v1062_v33 = vld [vmem:[#allocation8 + $0xb08] sm:$0xff] }
 0x19f   :  { %3849 = vmatprep.subr.bf16.mxu0 %v3848_v38  ;;  %4105 = vmatprep.subr.bf16.mxu1 %v4104_v39  ;;  %v1070_v34 = vld [vmem:[#allocation8 + $0xb48] sm:$0xff]  ;;  %v5372_v38 = vpop.f32.mrb[0].mxu1 }
 0x1a0   :  { %v556_v39 = vpop.f32.mrb[1].mxu1  ;;  %v3868_v46 = vpack.c.bf16 %v1070_v34, %v1062_v33  ;;  %v4138_v33 = vpack.c.bf16 %v1119_v26, %v1111_v25  ;;  %v1125_v34 = vld [vmem:[#allocation8 + $0xd00] sm:$0xff] }
 0x1a1   :  { %v557_v45 = vadd.f32 %v556_v39, %v392_v27  ;;  %v1126_v27 = vld [vmem:[#allocation8 + $0xd08] sm:$0xff] }
 0x1a2   :  { %3851 = vmatpush1.bf16.msra.mxu0 %v3850_v47  ;;  %4107 = vmatpush1.bf16.msra.mxu1 %v4106_v48  ;;  %v4124_v47 = vpack.c.bf16 %v1072_v36, %v1064_v35  ;;  %v1063_v48 = vld [vmem:[#allocation8 + $0xb10] sm:$0xff]  ;;  %v1133_v35 = vld [vmem:[#allocation8 + $0xd40] sm:$0xff] }
 0x1a3   :  { %3853 = vmatprep.subr.bf16.mxu0 %v3852_v52  ;;  %4109 = vmatprep.subr.bf16.mxu1 %v4108_v53  ;;  %v1086_v52 = vld [vmem:[#allocation8 + $0xbc8] sm:$0xff]  ;;  %v1080_v53 = vld [vmem:[#allocation8 + $0xb98] sm:$0xff]  ;;  %v5374_v55 = vmax.f32 %v557_v45, 0.0  ;;  %v4126_v57 = vpack.c.bf16 %v1071_v50, %v1063_v48  ;;  %v1141_v50 = vld [vmem:[#allocation8 + $0xd80] sm:$0xff] }
 0x1a4   :  { %v1144_v45 = vld [vmem:[#allocation8 + $0xd98] sm:$0xff] }
 0x1a5   :  { %1910 = vmatprep.mubr.f32.mxu0 %v5374_v55  ;;  %2194 = vmatprep.mubr.f32.mxu1 %v5374_v55 }
 0x1a6   :  { %3855 = vmatpush1.bf16.msra.mxu0 %v3854_v60  ;;  %4111 = vmatpush1.bf16.msra.mxu1 %v4110_v61  ;;  %v3872_v60 = vpack.c.bf16 %v1086_v52, %v1078_v51  ;;  %v4128_v61 = vpack.c.bf16 %v1088_v54, %v1080_v53  ;;  %v1149_v51 = vld [vmem:[#allocation8 + $0xdc0] sm:$0xff]  ;;  %v3888_v52 = vpack.c.bf16 %v1150_v44, %v1142_v43  ;;  %v1143_v54 = vld [vmem:[#allocation8 + $0xd90] sm:$0xff] }
 0x1a7   :  { %3857 = vmatprep.subr.bf16.mxu0 %v3856_v0  ;;  %4113 = vmatprep.subr.bf16.mxu1 %v4112_v1  ;;  %v1094_v0 = vld [vmem:[#allocation8 + $0xc08] sm:$0xff] }
 0x1a8   :  { %v1102_v1 = vld [vmem:[#allocation8 + $0xc48] sm:$0xff] }
 0x1aa   :  { %3859 = vmatpush1.bf16.msra.mxu0 %v3858_v8  ;;  %4115 = vmatpush1.bf16.msra.mxu1 %v4114_v9  ;;  %v3876_v8 = vpack.c.bf16 %v1102_v1, %v1094_v0  ;;  %v4132_v9 = vpack.c.bf16 %v1104_v3, %v1096_v2  ;;  %v1165_v0 = vld [vmem:[#allocation8 + $0xe40] sm:$0xff]  ;;  %v1159_v3 = vld [vmem:[#allocation8 + $0xe10] sm:$0xff] }
 0x1ab   :  { %3861 = vmatprep.subr.bf16.mxu0 %v3860_v13  ;;  %4117 = vmatprep.subr.bf16.mxu1 %v4116_v14  ;;  %v1110_v13 = vld [vmem:[#allocation8 + $0xc88] sm:$0xff] }
 0x1ac   :  { %v1118_v14 = vld [vmem:[#allocation8 + $0xcc8] sm:$0xff] }
 0x1ae   :  { %3863 = vmatpush1.bf16.msra.mxu0 %v3862_v23  ;;  %4119 = vmatpush1.bf16.msra.mxu1 %v4118_v24  ;;  %v3880_v23 = vpack.c.bf16 %v1118_v14, %v1110_v13  ;;  %v4136_v24 = vpack.c.bf16 %v1120_v42, %v1112_v15  ;;  %v1181_v13 = vld [vmem:[#allocation8 + $0xec0] sm:$0xff]  ;;  %v1175_v42 = vld [vmem:[#allocation8 + $0xe90] sm:$0xff] }
 0x1af   :  { %3865 = vmatprep.subr.bf16.mxu0 %v3864_v28  ;;  %4121 = vmatprep.subr.bf16.mxu1 %v4120_v29  ;;  %v1134_v28 = vld [vmem:[#allocation8 + $0xd48] sm:$0xff]  ;;  %v1128_v29 = vld [vmem:[#allocation8 + $0xd18] sm:$0xff]  ;;  %v3898_v25 = vpack.c.bf16 %v1181_v13, %v1173_v11  ;;  %v1237_v11 = vld [vmem:[#allocation8 + $0x1080] sm:$0xff] }
 0x1b0   :  { %v3884_v36 = vpack.c.bf16 %v1134_v28, %v1126_v27  ;;  %v4140_v39 = vpack.c.bf16 %v1136_v30, %v1128_v29  ;;  %v1189_v27 = vld [vmem:[#allocation8 + $0xf00] sm:$0xff] }
 0x1b1   :  { %v1197_v28 = vld [vmem:[#allocation8 + $0xf40] sm:$0xff] }
 0x1b2   :  { %3867 = vmatpush1.bf16.msra.mxu0 %v3866_v40  ;;  %4123 = vmatpush1.bf16.msra.mxu1 %v4122_v41  ;;  %v1127_v40 = vld [vmem:[#allocation8 + $0xd10] sm:$0xff]  ;;  %v3902_v43 = vpack.c.bf16 %v1197_v28, %v1189_v27  ;;  %v1245_v13 = vld [vmem:[#allocation8 + $0x10c0] sm:$0xff] }
 0x1b3   :  { %3869 = vmatprep.subr.bf16.mxu0 %v3868_v46  ;;  %4125 = vmatprep.subr.bf16.mxu1 %v4124_v47  ;;  %v1135_v41 = vld [vmem:[#allocation8 + $0xd50] sm:$0xff]  ;;  %v1152_v46 = vld [vmem:[#allocation8 + $0xdd8] sm:$0xff]  ;;  %v3886_v47 = vpack.c.bf16 %v1133_v35, %v1125_v34  ;;  %v1206_v34 = vld [vmem:[#allocation8 + $0xf88] sm:$0xff] }
 0x1b4   :  { %v4142_v48 = vpack.c.bf16 %v1135_v41, %v1127_v40  ;;  %v4144_v53 = vpack.c.bf16 %v1152_v46, %v1144_v45  ;;  %v1214_v35 = vld [vmem:[#allocation8 + $0xfc8] sm:$0xff]  ;;  %v399_v40 = vsub.s32 5, %v5348_v49  ;;  %v1205_v45 = vld [vmem:[#allocation8 + $0xf80] sm:$0xff] }
 0x1b5   :  { %v1213_v46 = vld [vmem:[#allocation8 + $0xfc0] sm:$0xff] }
 0x1b6   :  { %3871 = vmatpush1.bf16.msra.mxu0 %v3870_v56  ;;  %4127 = vmatpush1.bf16.msra.mxu1 %v4126_v57  ;;  %v1151_v56 = vld [vmem:[#allocation8 + $0xdd0] sm:$0xff]  ;;  %v1158_v57 = vld [vmem:[#allocation8 + $0xe08] sm:$0xff]  ;;  %v1253_v28 = vld [vmem:[#allocation8 + $0x1100] sm:$0xff] }
 0x1b7   :  { %3873 = vmatprep.subr.bf16.mxu0 %v3872_v60  ;;  %4129 = vmatprep.subr.bf16.mxu1 %v4128_v61  ;;  %v1168_v60 = vld [vmem:[#allocation8 + $0xe58] sm:$0xff]  ;;  %v3890_v61 = vpack.c.bf16 %v1149_v51, %v1141_v50  ;;  %v4146_v62 = vpack.c.bf16 %v1151_v56, %v1143_v54  ;;  %v3892_v1 = vpack.c.bf16 %v1166_v58, %v1158_v57  ;;  %v1207_v50 = vld [vmem:[#allocation8 + $0xf90] sm:$0xff] }
 0x1b8   :  { %v4148_v2 = vpack.c.bf16 %v1168_v60, %v1160_v59  ;;  %v1215_v51 = vld [vmem:[#allocation8 + $0xfd0] sm:$0xff]  ;;  %v1224_v54 = vld [vmem:[#allocation8 + $0x1018] sm:$0xff]  ;;  %v400_v57 = vrot.slane %v5351_v17, %v399_v40  ;;  %v3906_v59 = vpack.c.bf16 %v1213_v46, %v1205_v45  ;;  %v1269_v45 = vld [vmem:[#allocation8 + $0x1180] sm:$0xff] }
 0x1b9   :  { %v1232_v56 = vld [vmem:[#allocation8 + $0x1058] sm:$0xff]  ;;  %v4162_v60 = vpack.c.bf16 %v1215_v51, %v1207_v50  ;;  %v1277_v46 = vld [vmem:[#allocation8 + $0x11c0] sm:$0xff]  ;;  %v1271_v50 = vld [vmem:[#allocation8 + $0x1190] sm:$0xff] }
 0x1ba   :  { %3875 = vmatpush1.bf16.msra.mxu0 %v3874_v4  ;;  %4131 = vmatpush1.bf16.msra.mxu1 %v4130_v5  ;;  %v1167_v4 = vld [vmem:[#allocation8 + $0xe50] sm:$0xff]  ;;  %v1174_v5 = vld [vmem:[#allocation8 + $0xe88] sm:$0xff] }
 0x1bb   :  { %3877 = vmatprep.subr.bf16.mxu0 %v3876_v8  ;;  %4133 = vmatprep.subr.bf16.mxu1 %v4132_v9  ;;  %v1184_v8 = vld [vmem:[#allocation8 + $0xed8] sm:$0xff]  ;;  %v3894_v9 = vpack.c.bf16 %v1165_v0, %v1157_v63  ;;  %v4150_v10 = vpack.c.bf16 %v1167_v4, %v1159_v3  ;;  %v3896_v14 = vpack.c.bf16 %v1182_v6, %v1174_v5  ;;  %v1231_v3 = vld [vmem:[#allocation8 + $0x1050] sm:$0xff]  ;;  %v1238_v4 = vld [vmem:[#allocation8 + $0x1088] sm:$0xff] }
 0x1bc   :  { %v4152_v15 = vpack.c.bf16 %v1184_v8, %v1176_v7  ;;  %v1246_v6 = vld [vmem:[#allocation8 + $0x10c8] sm:$0xff]  ;;  %v1248_v7 = vld [vmem:[#allocation8 + $0x10d8] sm:$0xff]  ;;  %v1279_v51 = vld [vmem:[#allocation8 + $0x11d0] sm:$0xff] }
 0x1be   :  { %3879 = vmatpush1.bf16.msra.mxu0 %v3878_v19  ;;  %4135 = vmatpush1.bf16.msra.mxu1 %v4134_v20  ;;  %v1183_v19 = vld [vmem:[#allocation8 + $0xed0] sm:$0xff]  ;;  %v1190_v20 = vld [vmem:[#allocation8 + $0xf08] sm:$0xff] }
 0x1bf   :  { %3881 = vmatprep.subr.bf16.mxu0 %v3880_v23  ;;  %4137 = vmatprep.subr.bf16.mxu1 %v4136_v24  ;;  %v1200_v23 = vld [vmem:[#allocation8 + $0xf58] sm:$0xff]  ;;  %v387_v24 = vsub.s32 2, %v5348_v49  ;;  %v4154_v26 = vpack.c.bf16 %v1183_v19, %v1175_v42  ;;  %v3900_v29 = vpack.c.bf16 %v1198_v21, %v1190_v20  ;;  %v1239_v42 = vld [vmem:[#allocation8 + $0x1090] sm:$0xff]  ;;  %v1254_v20 = vld [vmem:[#allocation8 + $0x1108] sm:$0xff] }
 0x1c0   :  { %v4156_v30 = vpack.c.bf16 %v1200_v23, %v1192_v22  ;;  %v1247_v19 = vld [vmem:[#allocation8 + $0x10d0] sm:$0xff]  ;;  %v1262_v21 = vld [vmem:[#allocation8 + $0x1148] sm:$0xff]  ;;  %v1256_v22 = vld [vmem:[#allocation8 + $0x1118] sm:$0xff] }
 0x1c1   :  { %v388_v41 = vrot.slane %v5351_v17, %v387_v24  ;;  %v1240_v17 = vld [vmem:[#allocation8 + $0x1098] sm:$0xff]  ;;  %v4170_v27 = vpack.c.bf16 %v1247_v19, %v1239_v42 }
 0x1c2   :  { %3883 = vmatpush1.bf16.msra.mxu0 %v3882_v31  ;;  %4139 = vmatpush1.bf16.msra.mxu1 %v4138_v33  ;;  %v1191_v31 = vld [vmem:[#allocation8 + $0xf10] sm:$0xff]  ;;  %v1264_v23 = vld [vmem:[#allocation8 + $0x1158] sm:$0xff] }
 0x1c3   :  { %3885 = vmatprep.subr.bf16.mxu0 %v3884_v36  ;;  %4141 = vmatprep.subr.bf16.mxu1 %v4140_v39  ;;  %v1199_v33 = vld [vmem:[#allocation8 + $0xf50] sm:$0xff]  ;;  %v1208_v36 = vld [vmem:[#allocation8 + $0xf98] sm:$0xff]  ;;  %v555_v58 = vadd.f32 %v5372_v38, %v388_v41 }
 0x1c4   :  { %v1216_v39 = vld [vmem:[#allocation8 + $0xfd8] sm:$0xff]  ;;  %v4158_v44 = vpack.c.bf16 %v1199_v33, %v1191_v31  ;;  %v4172_v31 = vpack.c.bf16 %v1264_v23, %v1256_v22  ;;  %v1255_v33 = vld [vmem:[#allocation8 + $0x1110] sm:$0xff] }
 0x1c5   :  { %v5389_v8 = vmax.f32 %v555_v58, 0.0  ;;  %v1280_v41 = vld [vmem:[#allocation8 + $0x11d8] sm:$0xff]  ;;  %v4178_v58 = vpack.c.bf16 %v1279_v51, %v1271_v50  ;;  %v1350_v50 = vld [vmem:[#allocation8 + $0x1408] sm:$0xff] }
 0x1c6   :  { %3887 = vmatpush1.bf16.msra.mxu0 %v3886_v47  ;;  %4143 = vmatpush1.bf16.msra.mxu1 %v4142_v48  ;;  %v3904_v47 = vpack.c.bf16 %v1214_v35, %v1206_v34  ;;  %v4160_v48 = vpack.c.bf16 %v1216_v39, %v1208_v36  ;;  %v1263_v34 = vld [vmem:[#allocation8 + $0x1150] sm:$0xff]  ;;  %v1270_v35 = vld [vmem:[#allocation8 + $0x1188] sm:$0xff]  ;;  %v1272_v39 = vld [vmem:[#allocation8 + $0x1198] sm:$0xff] }
 0x1c7   :  { %3889 = vmatprep.subr.bf16.mxu0 %v3888_v52  ;;  %4145 = vmatprep.subr.bf16.mxu1 %v4144_v53  ;;  %v1222_v52 = vld [vmem:[#allocation8 + $0x1008] sm:$0xff]  ;;  %v1320_v42 = vld [vmem:[#allocation8 + $0x1318] sm:$0xff] }
 0x1c8   :  { %v1230_v53 = vld [vmem:[#allocation8 + $0x1048] sm:$0xff]  ;;  %v1328_v19 = vld [vmem:[#allocation8 + $0x1358] sm:$0xff] }
 0x1c9   :  { %v3908_v0 = vpack.c.bf16 %v1230_v53, %v1222_v52  ;;  %v1278_v36 = vld [vmem:[#allocation8 + $0x11c8] sm:$0xff] }
 0x1ca   :  { %3891 = vmatpush1.bf16.msra.mxu0 %v3890_v61  ;;  %4147 = vmatpush1.bf16.msra.mxu1 %v4146_v62  ;;  %v1221_v61 = vld [vmem:[#allocation8 + $0x1000] sm:$0xff]  ;;  %v1286_v52 = vld [vmem:[#allocation8 + $0x1208] sm:$0xff] }
 0x1cb   :  { %3893 = vmatprep.subr.bf16.mxu0 %v3892_v1  ;;  %4149 = vmatprep.subr.bf16.mxu1 %v4148_v2  ;;  %v1229_v62 = vld [vmem:[#allocation8 + $0x1040] sm:$0xff]  ;;  %v4164_v1 = vpack.c.bf16 %v1232_v56, %v1224_v54  ;;  %v1223_v2 = vld [vmem:[#allocation8 + $0x1010] sm:$0xff]  ;;  %v1294_v53 = vld [vmem:[#allocation8 + $0x1248] sm:$0xff] }
 0x1cc   :  { %v1288_v54 = vld [vmem:[#allocation8 + $0x1218] sm:$0xff]  ;;  %v1358_v51 = vld [vmem:[#allocation8 + $0x1448] sm:$0xff] }
 0x1cd   :  { %v1296_v56 = vld [vmem:[#allocation8 + $0x1258] sm:$0xff] }
 0x1ce   :  { %3895 = vmatpush1.bf16.msra.mxu0 %v3894_v9  ;;  %4151 = vmatpush1.bf16.msra.mxu1 %v4150_v10  ;;  %v3910_v9 = vpack.c.bf16 %v1229_v62, %v1221_v61  ;;  %v4166_v10 = vpack.c.bf16 %v1231_v3, %v1223_v2  ;;  %v3924_v61 = vpack.c.bf16 %v1294_v53, %v1286_v52  ;;  %v1302_v2 = vld [vmem:[#allocation8 + $0x1288] sm:$0xff]  ;;  %v1352_v52 = vld [vmem:[#allocation8 + $0x1418] sm:$0xff] }
 0x1cf   :  { %3897 = vmatprep.subr.bf16.mxu0 %v3896_v14  ;;  %4153 = vmatprep.subr.bf16.mxu1 %v4152_v15  ;;  %v3912_v14 = vpack.c.bf16 %v1246_v6, %v1238_v4  ;;  %v4168_v15 = vpack.c.bf16 %v1248_v7, %v1240_v17  ;;  %v4180_v62 = vpack.c.bf16 %v1296_v56, %v1288_v54  ;;  %v1310_v3 = vld [vmem:[#allocation8 + $0x12c8] sm:$0xff]  ;;  %v1304_v4 = vld [vmem:[#allocation8 + $0x1298] sm:$0xff]  ;;  %v1301_v7 = vld [vmem:[#allocation8 + $0x1280] sm:$0xff] }
 0x1d0   :  { %v1360_v53 = vld [vmem:[#allocation8 + $0x1458] sm:$0xff] }
 0x1d2   :  { %3899 = vmatpush1.bf16.msra.mxu0 %v3898_v25  ;;  %4155 = vmatpush1.bf16.msra.mxu1 %v4154_v26  ;;  %v3914_v26 = vpack.c.bf16 %v1245_v13, %v1237_v11  ;;  %v1303_v11 = vld [vmem:[#allocation8 + $0x1290] sm:$0xff] }
 0x1d3   :  { %3901 = vmatprep.subr.bf16.mxu0 %v3900_v29  ;;  %4157 = vmatprep.subr.bf16.mxu1 %v4156_v30  ;;  %v1261_v29 = vld [vmem:[#allocation8 + $0x1140] sm:$0xff]  ;;  %v3916_v30 = vpack.c.bf16 %v1262_v21, %v1254_v20  ;;  %v1311_v13 = vld [vmem:[#allocation8 + $0x12d0] sm:$0xff] }
 0x1d4   :  { %v4186_v23 = vpack.c.bf16 %v1311_v13, %v1303_v11  ;;  %v1382_v11 = vld [vmem:[#allocation8 + $0x1508] sm:$0xff] }
 0x1d5   :  { %v1390_v13 = vld [vmem:[#allocation8 + $0x1548] sm:$0xff] }
 0x1d6   :  { %3903 = vmatpush1.bf16.msra.mxu0 %v3902_v43  ;;  %4159 = vmatpush1.bf16.msra.mxu1 %v4158_v44  ;;  %v5387_v63 = vpop.f32.mrb[2].mxu0  ;;  %v3918_v43 = vpack.c.bf16 %v1261_v29, %v1253_v28  ;;  %v4174_v44 = vpack.c.bf16 %v1263_v34, %v1255_v33  ;;  %v4188_v29 = vpack.c.bf16 %v1328_v19, %v1320_v42  ;;  %v1334_v33 = vld [vmem:[#allocation8 + $0x1388] sm:$0xff] }
 0x1d7   :  { %3905 = vmatprep.subr.bf16.mxu0 %v3904_v47  ;;  %4161 = vmatprep.subr.bf16.mxu1 %v4160_v48  ;;  %v627_v5 = vpop.f32.mrb[3].mxu0  ;;  %v3920_v47 = vpack.c.bf16 %v1278_v36, %v1270_v35  ;;  %v4176_v48 = vpack.c.bf16 %v1280_v41, %v1272_v39  ;;  %v1342_v34 = vld [vmem:[#allocation8 + $0x13c8] sm:$0xff]  ;;  %v1336_v35 = vld [vmem:[#allocation8 + $0x1398] sm:$0xff] }
 0x1d8   :  { %v628_v38 = vadd.f32 %v627_v5, %v400_v57  ;;  %v3922_v57 = vpack.c.bf16 %v1277_v46, %v1269_v45  ;;  %v1312_v5 = vld [vmem:[#allocation8 + $0x12d8] sm:$0xff]  ;;  %v3936_v45 = vpack.c.bf16 %v1342_v34, %v1334_v33 }
 0x1d9   :  { %v5397_v20 = vpop.f32.mrb[2].mxu1  ;;  %v1344_v36 = vld [vmem:[#allocation8 + $0x13d8] sm:$0xff] }
 0x1da   :  { %3907 = vmatpush1.bf16.msra.mxu0 %v3906_v59  ;;  %4163 = vmatpush1.bf16.msra.mxu1 %v4162_v60  ;;  %v5391_v25 = vmax.f32 %v628_v38, 0.0  ;;  %v1285_v59 = vld [vmem:[#allocation8 + $0x1200] sm:$0xff]  ;;  %v5399_v21 = vpop.f32.mrb[3].mxu1  ;;  %v4192_v46 = vpack.c.bf16 %v1344_v36, %v1336_v35  ;;  %v1400_v33 = vld [vmem:[#allocation8 + $0x1598] sm:$0xff] }
 0x1db   :  { %3909 = vmatprep.subr.bf16.mxu0 %v3908_v0  ;;  %4165 = vmatprep.subr.bf16.mxu1 %v4164_v1  ;;  %v1293_v60 = vld [vmem:[#allocation8 + $0x1240] sm:$0xff]  ;;  %v1287_v0 = vld [vmem:[#allocation8 + $0x1210] sm:$0xff]  ;;  %v1408_v34 = vld [vmem:[#allocation8 + $0x15d8] sm:$0xff] }
 0x1dc   :  { %v1295_v1 = vld [vmem:[#allocation8 + $0x1250] sm:$0xff]  ;;  %v3926_v6 = vpack.c.bf16 %v1293_v60, %v1285_v59  ;;  %v1309_v38 = vld [vmem:[#allocation8 + $0x12c0] sm:$0xff]  ;;  %v3940_v59 = vpack.c.bf16 %v1358_v51, %v1350_v50  ;;  %v4196_v60 = vpack.c.bf16 %v1360_v53, %v1352_v52  ;;  %v1416_v50 = vld [vmem:[#allocation8 + $0x1618] sm:$0xff] }
 0x1dd   :  { %1911 = vmatmul.mubr.f32.vlgmr.msra.gmra.mrb[4].mxu0 %v5389_v8  ;;  %2195 = vmatmul.mubr.f32.vlgmr.msra.gmra.mrb[4].mxu1 %v5389_v8  ;;  %v4182_v17 = vpack.c.bf16 %v1295_v1, %v1287_v0  ;;  %v3930_v22 = vpack.c.bf16 %v1309_v38, %v1301_v7  ;;  %v1366_v0 = vld [vmem:[#allocation8 + $0x1488] sm:$0xff]  ;;  %v1424_v51 = vld [vmem:[#allocation8 + $0x1658] sm:$0xff] }
 0x1de   :  { %3911 = vmatpush1.bf16.msra.mxu0 %v3910_v9  ;;  %4167 = vmatpush1.bf16.msra.mxu1 %v4166_v10  ;;  %v3928_v9 = vpack.c.bf16 %v1310_v3, %v1302_v2  ;;  %v4184_v10 = vpack.c.bf16 %v1312_v5, %v1304_v4  ;;  %v1374_v1 = vld [vmem:[#allocation8 + $0x14c8] sm:$0xff]  ;;  %v1368_v2 = vld [vmem:[#allocation8 + $0x1498] sm:$0xff] }
 0x1df   :  { %3913 = vmatprep.subr.bf16.mxu0 %v3912_v14  ;;  %4169 = vmatprep.subr.bf16.mxu1 %v4168_v15  ;;  %v1318_v14 = vld [vmem:[#allocation8 + $0x1308] sm:$0xff]  ;;  %v1376_v3 = vld [vmem:[#allocation8 + $0x14d8] sm:$0xff]  ;;  %v3944_v7 = vpack.c.bf16 %v1374_v1, %v1366_v0 }
 0x1e0   :  { %1981 = vmatprep.mubr.f32.mxu0 %v5391_v25  ;;  %2265 = vmatprep.mubr.f32.mxu1 %v5391_v25  ;;  %v1326_v15 = vld [vmem:[#allocation8 + $0x1348] sm:$0xff]  ;;  %v4200_v38 = vpack.c.bf16 %v1376_v3, %v1368_v2  ;;  %v1432_v0 = vld [vmem:[#allocation8 + $0x1698] sm:$0xff] }
 0x1e1   :  { %v3932_v28 = vpack.c.bf16 %v1326_v15, %v1318_v14  ;;  %v1384_v14 = vld [vmem:[#allocation8 + $0x1518] sm:$0xff] }
 0x1e2   :  { %3915 = vmatpush1.bf16.msra.mxu0 %v3914_v26  ;;  %4171 = vmatpush1.bf16.msra.mxu1 %v4170_v27  ;;  %v1317_v26 = vld [vmem:[#allocation8 + $0x1300] sm:$0xff]  ;;  %v1392_v15 = vld [vmem:[#allocation8 + $0x1558] sm:$0xff] }
 0x1e3   :  { %3917 = vmatprep.subr.bf16.mxu0 %v3916_v30  ;;  %4173 = vmatprep.subr.bf16.mxu1 %v4172_v31  ;;  %v1325_v27 = vld [vmem:[#allocation8 + $0x1340] sm:$0xff]  ;;  %v1319_v30 = vld [vmem:[#allocation8 + $0x1310] sm:$0xff]  ;;  %v1440_v1 = vld [vmem:[#allocation8 + $0x16d8] sm:$0xff] }
 0x1e4   :  { %v1327_v31 = vld [vmem:[#allocation8 + $0x1350] sm:$0xff]  ;;  %v3934_v39 = vpack.c.bf16 %v1325_v27, %v1317_v26  ;;  %v3948_v26 = vpack.c.bf16 %v1390_v13, %v1382_v11  ;;  %v4204_v27 = vpack.c.bf16 %v1392_v15, %v1384_v14  ;;  %v1448_v11 = vld [vmem:[#allocation8 + $0x1718] sm:$0xff]  ;;  %v395_v14 = vsub.s32 4, %v5348_v49 }
 0x1e5   :  { %v4190_v41 = vpack.c.bf16 %v1327_v31, %v1319_v30  ;;  %v1398_v30 = vld [vmem:[#allocation8 + $0x1588] sm:$0xff]  ;;  %v1456_v13 = vld [vmem:[#allocation8 + $0x1758] sm:$0xff] }
 0x1e6   :  { %3919 = vmatpush1.bf16.msra.mxu0 %v3918_v43  ;;  %4175 = vmatpush1.bf16.msra.mxu1 %v4174_v44  ;;  %v1333_v43 = vld [vmem:[#allocation8 + $0x1380] sm:$0xff]  ;;  %v1406_v31 = vld [vmem:[#allocation8 + $0x15c8] sm:$0xff] }
 0x1e7   :  { %3921 = vmatprep.subr.bf16.mxu0 %v3920_v47  ;;  %4177 = vmatprep.subr.bf16.mxu1 %v4176_v48  ;;  %v1341_v44 = vld [vmem:[#allocation8 + $0x13c0] sm:$0xff]  ;;  %v1335_v47 = vld [vmem:[#allocation8 + $0x1390] sm:$0xff] }
 0x1e8   :  { %v1343_v48 = vld [vmem:[#allocation8 + $0x13d0] sm:$0xff]  ;;  %v3938_v54 = vpack.c.bf16 %v1341_v44, %v1333_v43  ;;  %v3952_v43 = vpack.c.bf16 %v1406_v31, %v1398_v30  ;;  %v4208_v44 = vpack.c.bf16 %v1408_v34, %v1400_v33  ;;  %v1470_v30 = vld [vmem:[#allocation8 + $0x17c8] sm:$0xff]  ;;  %v1464_v31 = vld [vmem:[#allocation8 + $0x1798] sm:$0xff]  ;;  %v407_v34 = vsub.s32 7, %v5348_v49 }
 0x1e9   :  { %v4194_v56 = vpack.c.bf16 %v1343_v48, %v1335_v47  ;;  %v1414_v47 = vld [vmem:[#allocation8 + $0x1608] sm:$0xff]  ;;  %v1472_v33 = vld [vmem:[#allocation8 + $0x17d8] sm:$0xff] }
 0x1ea   :  { %3923 = vmatpush1.bf16.msra.mxu0 %v3922_v57  ;;  %4179 = vmatpush1.bf16.msra.mxu1 %v4178_v58  ;;  %v1349_v57 = vld [vmem:[#allocation8 + $0x1400] sm:$0xff]  ;;  %v1422_v48 = vld [vmem:[#allocation8 + $0x1648] sm:$0xff] }
 0x1eb   :  { %3925 = vmatprep.subr.bf16.mxu0 %v3924_v61  ;;  %4181 = vmatprep.subr.bf16.mxu1 %v4180_v62  ;;  %v1357_v58 = vld [vmem:[#allocation8 + $0x1440] sm:$0xff]  ;;  %v1351_v61 = vld [vmem:[#allocation8 + $0x1410] sm:$0xff] }
 0x1ec   :  { %v1359_v62 = vld [vmem:[#allocation8 + $0x1450] sm:$0xff]  ;;  %v3942_v4 = vpack.c.bf16 %v1357_v58, %v1349_v57  ;;  %v3956_v57 = vpack.c.bf16 %v1422_v48, %v1414_v47  ;;  %v4212_v58 = vpack.c.bf16 %v1424_v51, %v1416_v50  ;;  %v1478_v50 = vld [vmem:[#allocation8 + $0x1808] sm:$0xff] }
 0x1ed   :  { %v4198_v5 = vpack.c.bf16 %v1359_v62, %v1351_v61  ;;  %v1430_v61 = vld [vmem:[#allocation8 + $0x1688] sm:$0xff]  ;;  %v1463_v47 = vld [vmem:[#allocation8 + $0x1790] sm:$0xff] }
 0x1ee   :  { %3927 = vmatpush1.bf16.msra.mxu0 %v3926_v6  ;;  %4183 = vmatpush1.bf16.msra.mxu1 %v4182_v17  ;;  %v1365_v6 = vld [vmem:[#allocation8 + $0x1480] sm:$0xff]  ;;  %v1438_v62 = vld [vmem:[#allocation8 + $0x16c8] sm:$0xff]  ;;  %v1471_v48 = vld [vmem:[#allocation8 + $0x17d0] sm:$0xff] }
 0x1ef   :  { %3929 = vmatprep.subr.bf16.mxu0 %v3928_v9  ;;  %4185 = vmatprep.subr.bf16.mxu1 %v4184_v10  ;;  %v1373_v17 = vld [vmem:[#allocation8 + $0x14c0] sm:$0xff]  ;;  %v1367_v9 = vld [vmem:[#allocation8 + $0x1490] sm:$0xff]  ;;  %v1486_v51 = vld [vmem:[#allocation8 + $0x1848] sm:$0xff] }
 0x1f0   :  { %v1375_v10 = vld [vmem:[#allocation8 + $0x14d0] sm:$0xff]  ;;  %v3946_v42 = vpack.c.bf16 %v1373_v17, %v1365_v6  ;;  %v3960_v6 = vpack.c.bf16 %v1438_v62, %v1430_v61  ;;  %v4216_v17 = vpack.c.bf16 %v1440_v1, %v1432_v0  ;;  %v3972_v61 = vpack.c.bf16 %v1486_v51, %v1478_v50 }
 0x1f1   :  { %v4202_v19 = vpack.c.bf16 %v1375_v10, %v1367_v9  ;;  %v1446_v9 = vld [vmem:[#allocation8 + $0x1708] sm:$0xff]  ;;  %v1479_v0 = vld [vmem:[#allocation8 + $0x1810] sm:$0xff] }
 0x1f2   :  { %3931 = vmatpush1.bf16.msra.mxu0 %v3930_v22  ;;  %4187 = vmatpush1.bf16.msra.mxu1 %v4186_v23  ;;  %v1381_v22 = vld [vmem:[#allocation8 + $0x1500] sm:$0xff]  ;;  %v1454_v10 = vld [vmem:[#allocation8 + $0x1748] sm:$0xff]  ;;  %v1487_v1 = vld [vmem:[#allocation8 + $0x1850] sm:$0xff] }
 0x1f3   :  { %3933 = vmatprep.subr.bf16.mxu0 %v3932_v28  ;;  %4189 = vmatprep.subr.bf16.mxu1 %v4188_v29  ;;  %v1389_v23 = vld [vmem:[#allocation8 + $0x1540] sm:$0xff]  ;;  %v1383_v28 = vld [vmem:[#allocation8 + $0x1510] sm:$0xff] }
 0x1f4   :  { %v1391_v29 = vld [vmem:[#allocation8 + $0x1550] sm:$0xff]  ;;  %v3950_v35 = vpack.c.bf16 %v1389_v23, %v1381_v22  ;;  %v1453_v22 = vld [vmem:[#allocation8 + $0x1740] sm:$0xff]  ;;  %v3964_v23 = vpack.c.bf16 %v1454_v10, %v1446_v9 }
 0x1f5   :  { %v4206_v36 = vpack.c.bf16 %v1391_v29, %v1383_v28  ;;  %v1455_v28 = vld [vmem:[#allocation8 + $0x1750] sm:$0xff]  ;;  %v1462_v29 = vld [vmem:[#allocation8 + $0x1788] sm:$0xff]  ;;  %v1501_v9 = vld [vmem:[#allocation8 + $0x18c0] sm:$0xff] }
 0x1f6   :  { %3935 = vmatpush1.bf16.msra.mxu0 %v3934_v39  ;;  %4191 = vmatpush1.bf16.msra.mxu1 %v4190_v41  ;;  %v1397_v39 = vld [vmem:[#allocation8 + $0x1580] sm:$0xff] }
 0x1f7   :  { %3937 = vmatprep.subr.bf16.mxu0 %v3936_v45  ;;  %4193 = vmatprep.subr.bf16.mxu1 %v4192_v46  ;;  %v1405_v41 = vld [vmem:[#allocation8 + $0x15c0] sm:$0xff]  ;;  %v1399_v45 = vld [vmem:[#allocation8 + $0x1590] sm:$0xff] }
 0x1f8   :  { %v1407_v46 = vld [vmem:[#allocation8 + $0x15d0] sm:$0xff]  ;;  %v3954_v52 = vpack.c.bf16 %v1405_v41, %v1397_v39 }
 0x1f9   :  { %v4210_v53 = vpack.c.bf16 %v1407_v46, %v1399_v45  ;;  %v3968_v45 = vpack.c.bf16 %v1470_v30, %v1462_v29  ;;  %v4224_v46 = vpack.c.bf16 %v1472_v33, %v1464_v31  ;;  %v1517_v29 = vld [vmem:[#allocation8 + $0x1940] sm:$0xff]  ;;  %v1511_v33 = vld [vmem:[#allocation8 + $0x1910] sm:$0xff] }
 0x1fa   :  { %3939 = vmatpush1.bf16.msra.mxu0 %v3938_v54  ;;  %4195 = vmatpush1.bf16.msra.mxu1 %v4194_v56  ;;  %v1413_v54 = vld [vmem:[#allocation8 + $0x1600] sm:$0xff] }
 0x1fb   :  { %3941 = vmatprep.subr.bf16.mxu0 %v3940_v59  ;;  %4197 = vmatprep.subr.bf16.mxu1 %v4196_v60  ;;  %v1421_v56 = vld [vmem:[#allocation8 + $0x1640] sm:$0xff]  ;;  %v1415_v59 = vld [vmem:[#allocation8 + $0x1610] sm:$0xff] }
 0x1fc   :  { %v1423_v60 = vld [vmem:[#allocation8 + $0x1650] sm:$0xff]  ;;  %v3958_v2 = vpack.c.bf16 %v1421_v56, %v1413_v54 }
 0x1fd   :  { %v4214_v3 = vpack.c.bf16 %v1423_v60, %v1415_v59  ;;  %v1477_v59 = vld [vmem:[#allocation8 + $0x1800] sm:$0xff] }
 0x1fe   :  { %3943 = vmatpush1.bf16.msra.mxu0 %v3942_v4  ;;  %4199 = vmatpush1.bf16.msra.mxu1 %v4198_v5  ;;  %v1429_v4 = vld [vmem:[#allocation8 + $0x1680] sm:$0xff] }
 0x1ff   :  { %3945 = vmatprep.subr.bf16.mxu0 %v3944_v7  ;;  %4201 = vmatprep.subr.bf16.mxu1 %v4200_v38  ;;  %v1437_v5 = vld [vmem:[#allocation8 + $0x16c0] sm:$0xff]  ;;  %v1431_v7 = vld [vmem:[#allocation8 + $0x1690] sm:$0xff] }
 0x200   :  { %v1439_v38 = vld [vmem:[#allocation8 + $0x16d0] sm:$0xff]  ;;  %v3962_v15 = vpack.c.bf16 %v1437_v5, %v1429_v4  ;;  %v1485_v60 = vld [vmem:[#allocation8 + $0x1840] sm:$0xff]  ;;  %v1496_v4 = vld [vmem:[#allocation8 + $0x1898] sm:$0xff] }
 0x201   :  { %v1504_v5 = vld [vmem:[#allocation8 + $0x18d8] sm:$0xff] }
 0x202   :  { %3947 = vmatpush1.bf16.msra.mxu0 %v3946_v42  ;;  %4203 = vmatpush1.bf16.msra.mxu1 %v4202_v19  ;;  %v4218_v42 = vpack.c.bf16 %v1439_v38, %v1431_v7  ;;  %v1445_v19 = vld [vmem:[#allocation8 + $0x1700] sm:$0xff]  ;;  %v4230_v7 = vpack.c.bf16 %v1487_v1, %v1479_v0 }
 0x203   :  { %3949 = vmatprep.subr.bf16.mxu0 %v3948_v26  ;;  %4205 = vmatprep.subr.bf16.mxu1 %v4204_v27  ;;  %v4220_v26 = vpack.c.bf16 %v1456_v13, %v1448_v11  ;;  %v1447_v27 = vld [vmem:[#allocation8 + $0x1710] sm:$0xff]  ;;  %v3966_v39 = vpack.c.bf16 %v1453_v22, %v1445_v19  ;;  %v1493_v38 = vld [vmem:[#allocation8 + $0x1880] sm:$0xff]  ;;  %v4232_v11 = vpack.c.bf16 %v1504_v5, %v1496_v4  ;;  %v1518_v19 = vld [vmem:[#allocation8 + $0x1948] sm:$0xff] }
 0x204   :  { %v4222_v41 = vpack.c.bf16 %v1455_v28, %v1447_v27  ;;  %v1495_v13 = vld [vmem:[#allocation8 + $0x1890] sm:$0xff]  ;;  %v1512_v22 = vld [vmem:[#allocation8 + $0x1918] sm:$0xff]  ;;  %v1509_v28 = vld [vmem:[#allocation8 + $0x1900] sm:$0xff] }
 0x205   :  { %v1558_v4 = vld [vmem:[#allocation8 + $0x1a88] sm:$0xff] }
 0x206   :  { %3951 = vmatpush1.bf16.msra.mxu0 %v3950_v35  ;;  %4207 = vmatpush1.bf16.msra.mxu1 %v4206_v36  ;;  %v5403_v35 = vld [vmem:[#allocation7] sm:$0xff]  ;;  %v1566_v5 = vld [vmem:[#allocation8 + $0x1ac8] sm:$0xff] }
 0x207   :  { %3953 = vmatprep.subr.bf16.mxu0 %v3952_v43  ;;  %4209 = vmatprep.subr.bf16.mxu1 %v4208_v44  ;;  %v396_v36 = vrot.slane %v5403_v35, %v395_v14  ;;  %v1461_v43 = vld [vmem:[#allocation8 + $0x1780] sm:$0xff]  ;;  %v408_v54 = vrot.slane %v5403_v35, %v407_v34 }
 0x208   :  { %v1469_v44 = vld [vmem:[#allocation8 + $0x17c0] sm:$0xff] }
 0x209   :  { %v626_v56 = vadd.f32 %v5387_v63, %v396_v36  ;;  %v3974_v63 = vpack.c.bf16 %v1485_v60, %v1477_v59  ;;  %v1519_v36 = vld [vmem:[#allocation8 + $0x1950] sm:$0xff] }
 0x20a   :  { %3955 = vmatpush1.bf16.msra.mxu0 %v3954_v52  ;;  %4211 = vmatpush1.bf16.msra.mxu1 %v4210_v53  ;;  %v1480_v52 = vld [vmem:[#allocation8 + $0x1818] sm:$0xff] }
 0x20b   :  { %3957 = vmatprep.subr.bf16.mxu0 %v3956_v57  ;;  %4213 = vmatprep.subr.bf16.mxu1 %v4212_v58  ;;  %v1488_v53 = vld [vmem:[#allocation8 + $0x1858] sm:$0xff]  ;;  %v3970_v57 = vpack.c.bf16 %v1469_v44, %v1461_v43  ;;  %v4226_v58 = vpack.c.bf16 %v1471_v48, %v1463_v47  ;;  %v1525_v47 = vld [vmem:[#allocation8 + $0x1980] sm:$0xff] }
 0x20c   :  { %v4228_v62 = vpack.c.bf16 %v1488_v53, %v1480_v52  ;;  %v1528_v43 = vld [vmem:[#allocation8 + $0x1998] sm:$0xff]  ;;  %v1533_v48 = vld [vmem:[#allocation8 + $0x19c0] sm:$0xff]  ;;  %v1527_v52 = vld [vmem:[#allocation8 + $0x1990] sm:$0xff] }
 0x20d   :  { %v1536_v44 = vld [vmem:[#allocation8 + $0x19d8] sm:$0xff]  ;;  %v1535_v53 = vld [vmem:[#allocation8 + $0x19d0] sm:$0xff]  ;;  %v3986_v59 = vpack.c.bf16 %v1533_v48, %v1525_v47  ;;  %v1589_v48 = vld [vmem:[#allocation8 + $0x1b80] sm:$0xff] }
 0x20e   :  { %3959 = vmatpush1.bf16.msra.mxu0 %v3958_v2  ;;  %4215 = vmatpush1.bf16.msra.mxu1 %v4214_v3  ;;  %v1494_v2 = vld [vmem:[#allocation8 + $0x1888] sm:$0xff]  ;;  %v4240_v51 = vpack.c.bf16 %v1536_v44, %v1528_v43  ;;  %v4242_v60 = vpack.c.bf16 %v1535_v53, %v1527_v52  ;;  %v1592_v44 = vld [vmem:[#allocation8 + $0x1b98] sm:$0xff]  ;;  %v1591_v53 = vld [vmem:[#allocation8 + $0x1b90] sm:$0xff] }
 0x20f   :  { %3961 = vmatprep.subr.bf16.mxu0 %v3960_v6  ;;  %4217 = vmatprep.subr.bf16.mxu1 %v4216_v17  ;;  %v1502_v3 = vld [vmem:[#allocation8 + $0x18c8] sm:$0xff]  ;;  %v699_v6 = vadd.f32 %v5399_v21, %v408_v54  ;;  %v5413_v17 = vmax.f32 %v626_v56, 0.0  ;;  %v3978_v21 = vpack.c.bf16 %v1501_v9, %v1493_v38  ;;  %v1557_v9 = vld [vmem:[#allocation8 + $0x1a80] sm:$0xff] }
 0x210   :  { %v3976_v10 = vpack.c.bf16 %v1502_v3, %v1494_v2  ;;  %v1542_v54 = vld [vmem:[#allocation8 + $0x1a08] sm:$0xff]  ;;  %v1543_v2 = vld [vmem:[#allocation8 + $0x1a10] sm:$0xff] }
 0x211   :  { %v1550_v56 = vld [vmem:[#allocation8 + $0x1a48] sm:$0xff]  ;;  %v1551_v3 = vld [vmem:[#allocation8 + $0x1a50] sm:$0xff] }
 0x212   :  { %3963 = vmatpush1.bf16.msra.mxu0 %v3962_v15  ;;  %4219 = vmatpush1.bf16.msra.mxu1 %v4218_v42  ;;  %v1503_v15 = vld [vmem:[#allocation8 + $0x18d0] sm:$0xff]  ;;  %v1510_v42 = vld [vmem:[#allocation8 + $0x1908] sm:$0xff]  ;;  %v3988_v0 = vpack.c.bf16 %v1550_v56, %v1542_v54  ;;  %v4246_v38 = vpack.c.bf16 %v1551_v3, %v1543_v2 }
 0x213   :  { %3965 = vmatprep.subr.bf16.mxu0 %v3964_v23  ;;  %4221 = vmatprep.subr.bf16.mxu1 %v4220_v26  ;;  %v1520_v23 = vld [vmem:[#allocation8 + $0x1958] sm:$0xff]  ;;  %v5415_v26 = vmax.f32 %v699_v6, 0.0  ;;  %v4234_v27 = vpack.c.bf16 %v1503_v15, %v1495_v13  ;;  %v3980_v30 = vpack.c.bf16 %v1518_v19, %v1510_v42  ;;  %v1559_v15 = vld [vmem:[#allocation8 + $0x1a90] sm:$0xff]  ;;  %v1574_v19 = vld [vmem:[#allocation8 + $0x1b08] sm:$0xff] }
 0x214   :  { %v4236_v31 = vpack.c.bf16 %v1520_v23, %v1512_v22  ;;  %v1560_v6 = vld [vmem:[#allocation8 + $0x1a98] sm:$0xff]  ;;  %v1567_v42 = vld [vmem:[#allocation8 + $0x1ad0] sm:$0xff]  ;;  %v1582_v22 = vld [vmem:[#allocation8 + $0x1b48] sm:$0xff] }
 0x215   :  { %v1576_v23 = vld [vmem:[#allocation8 + $0x1b18] sm:$0xff]  ;;  %v1598_v43 = vld [vmem:[#allocation8 + $0x1bc8] sm:$0xff]  ;;  %v1599_v54 = vld [vmem:[#allocation8 + $0x1bd0] sm:$0xff] }
 0x216   :  { %3967 = vmatpush1.bf16.msra.mxu0 %v3966_v39  ;;  %4223 = vmatpush1.bf16.msra.mxu1 %v4222_v41  ;;  %v1526_v39 = vld [vmem:[#allocation8 + $0x1988] sm:$0xff]  ;;  %v1607_v3 = vld [vmem:[#allocation8 + $0x1c10] sm:$0xff] }
 0x217   :  { %3969 = vmatprep.subr.bf16.mxu0 %v3968_v45  ;;  %4225 = vmatprep.subr.bf16.mxu1 %v4224_v46  ;;  %v1534_v41 = vld [vmem:[#allocation8 + $0x19c8] sm:$0xff]  ;;  %v3982_v45 = vpack.c.bf16 %v1517_v29, %v1509_v28  ;;  %v4238_v46 = vpack.c.bf16 %v1519_v36, %v1511_v33  ;;  %v4250_v28 = vpack.c.bf16 %v1567_v42, %v1559_v15  ;;  %v1573_v29 = vld [vmem:[#allocation8 + $0x1b00] sm:$0xff]  ;;  %v1575_v36 = vld [vmem:[#allocation8 + $0x1b10] sm:$0xff] }
 0x218   :  { %v3984_v50 = vpack.c.bf16 %v1534_v41, %v1526_v39  ;;  %v1583_v39 = vld [vmem:[#allocation8 + $0x1b50] sm:$0xff]  ;;  %v1590_v41 = vld [vmem:[#allocation8 + $0x1b88] sm:$0xff] }
 0x219   :  { %v4254_v47 = vpack.c.bf16 %v1583_v39, %v1575_v36  ;;  %v1606_v56 = vld [vmem:[#allocation8 + $0x1c08] sm:$0xff]  ;;  %v1623_v42 = vld [vmem:[#allocation8 + $0x1c90] sm:$0xff] }
 0x21a   :  { %3971 = vmatpush1.bf16.msra.mxu0 %v3970_v57  ;;  %4227 = vmatpush1.bf16.msra.mxu1 %v4226_v58  ;;  %v1544_v57 = vld [vmem:[#allocation8 + $0x1a18] sm:$0xff]  ;;  %v1639_v39 = vld [vmem:[#allocation8 + $0x1d10] sm:$0xff] }
 0x21b   :  { %3973 = vmatprep.subr.bf16.mxu0 %v3972_v61  ;;  %4229 = vmatprep.subr.bf16.mxu1 %v4228_v62  ;;  %v1552_v58 = vld [vmem:[#allocation8 + $0x1a58] sm:$0xff]  ;;  %v1541_v61 = vld [vmem:[#allocation8 + $0x1a00] sm:$0xff] }
 0x21c   :  { %v1549_v62 = vld [vmem:[#allocation8 + $0x1a40] sm:$0xff]  ;;  %v4244_v1 = vpack.c.bf16 %v1552_v58, %v1544_v57  ;;  %v1614_v57 = vld [vmem:[#allocation8 + $0x1c48] sm:$0xff]  ;;  %v1608_v58 = vld [vmem:[#allocation8 + $0x1c18] sm:$0xff] }
 0x21d   :  { %1982 = vmatmul.mubr.f32.vlgmr.msra.gmra.mrb[4].mxu0 %v5413_v17  ;;  %2266 = vmatmul.mubr.f32.vlgmr.msra.gmra.mrb[4].mxu1 %v5413_v17 }
 0x21e   :  { %3975 = vmatpush1.bf16.msra.mxu0 %v3974_v63  ;;  %4231 = vmatpush1.bf16.msra.mxu1 %v4230_v7  ;;  %v1568_v63 = vld [vmem:[#allocation8 + $0x1ad8] sm:$0xff]  ;;  %v3990_v7 = vpack.c.bf16 %v1549_v62, %v1541_v61  ;;  %v4258_v61 = vpack.c.bf16 %v1599_v54, %v1591_v53  ;;  %v1605_v62 = vld [vmem:[#allocation8 + $0x1c00] sm:$0xff]  ;;  %v1655_v54 = vld [vmem:[#allocation8 + $0x1d90] sm:$0xff] }
 0x21f   :  { %3977 = vmatprep.subr.bf16.mxu0 %v3976_v10  ;;  %4233 = vmatprep.subr.bf16.mxu1 %v4232_v11  ;;  %v1565_v10 = vld [vmem:[#allocation8 + $0x1ac0] sm:$0xff]  ;;  %v3992_v11 = vpack.c.bf16 %v1566_v5, %v1558_v4  ;;  %v4248_v13 = vpack.c.bf16 %v1568_v63, %v1560_v6  ;;  %v1615_v4 = vld [vmem:[#allocation8 + $0x1c50] sm:$0xff]  ;;  %v1622_v5 = vld [vmem:[#allocation8 + $0x1c88] sm:$0xff] }
 0x220   :  { %2052 = vmatprep.mubr.f32.mxu0 %v5415_v26  ;;  %2336 = vmatprep.mubr.f32.mxu1 %v5415_v26  ;;  %v1630_v6 = vld [vmem:[#allocation8 + $0x1cc8] sm:$0xff]  ;;  %v1624_v63 = vld [vmem:[#allocation8 + $0x1c98] sm:$0xff] }
 0x222   :  { %3979 = vmatpush1.bf16.msra.mxu0 %v3978_v21  ;;  %4235 = vmatpush1.bf16.msra.mxu1 %v4234_v27  ;;  %v1584_v21 = vld [vmem:[#allocation8 + $0x1b58] sm:$0xff]  ;;  %v3994_v27 = vpack.c.bf16 %v1565_v10, %v1557_v9  ;;  %v4262_v9 = vpack.c.bf16 %v1615_v4, %v1607_v3  ;;  %v1621_v10 = vld [vmem:[#allocation8 + $0x1c80] sm:$0xff]  ;;  %v1671_v4 = vld [vmem:[#allocation8 + $0x1e10] sm:$0xff] }
 0x223   :  { %3981 = vmatprep.subr.bf16.mxu0 %v3980_v30  ;;  %4237 = vmatprep.subr.bf16.mxu1 %v4236_v31  ;;  %v1581_v30 = vld [vmem:[#allocation8 + $0x1b40] sm:$0xff]  ;;  %v3996_v31 = vpack.c.bf16 %v1582_v22, %v1574_v19  ;;  %v4252_v33 = vpack.c.bf16 %v1584_v21, %v1576_v23  ;;  %v1631_v19 = vld [vmem:[#allocation8 + $0x1cd0] sm:$0xff]  ;;  %v1638_v22 = vld [vmem:[#allocation8 + $0x1d08] sm:$0xff] }
 0x224   :  { %v1646_v23 = vld [vmem:[#allocation8 + $0x1d48] sm:$0xff]  ;;  %v1640_v21 = vld [vmem:[#allocation8 + $0x1d18] sm:$0xff] }
 0x226   :  { %3983 = vmatpush1.bf16.msra.mxu0 %v3982_v45  ;;  %4239 = vmatpush1.bf16.msra.mxu1 %v4238_v46  ;;  %v1600_v45 = vld [vmem:[#allocation8 + $0x1bd8] sm:$0xff]  ;;  %v3998_v46 = vpack.c.bf16 %v1581_v30, %v1573_v29  ;;  %v4266_v29 = vpack.c.bf16 %v1631_v19, %v1623_v42  ;;  %v1637_v30 = vld [vmem:[#allocation8 + $0x1d00] sm:$0xff]  ;;  %v1687_v19 = vld [vmem:[#allocation8 + $0x1e90] sm:$0xff] }
 0x227   :  { %3985 = vmatprep.subr.bf16.mxu0 %v3984_v50  ;;  %4241 = vmatprep.subr.bf16.mxu1 %v4240_v51  ;;  %v1597_v50 = vld [vmem:[#allocation8 + $0x1bc0] sm:$0xff]  ;;  %v4000_v51 = vpack.c.bf16 %v1598_v43, %v1590_v41  ;;  %v4256_v52 = vpack.c.bf16 %v1600_v45, %v1592_v44  ;;  %v1647_v41 = vld [vmem:[#allocation8 + $0x1d50] sm:$0xff]  ;;  %v1654_v43 = vld [vmem:[#allocation8 + $0x1d88] sm:$0xff] }
 0x228   :  { %v1662_v44 = vld [vmem:[#allocation8 + $0x1dc8] sm:$0xff]  ;;  %v1656_v45 = vld [vmem:[#allocation8 + $0x1d98] sm:$0xff] }
 0x22a   :  { %3987 = vmatpush1.bf16.msra.mxu0 %v3986_v59  ;;  %4243 = vmatpush1.bf16.msra.mxu1 %v4242_v60  ;;  %v1616_v59 = vld [vmem:[#allocation8 + $0x1c58] sm:$0xff]  ;;  %v4002_v60 = vpack.c.bf16 %v1597_v50, %v1589_v48  ;;  %v4270_v48 = vpack.c.bf16 %v1647_v41, %v1639_v39  ;;  %v1653_v50 = vld [vmem:[#allocation8 + $0x1d80] sm:$0xff] }
 0x22b   :  { %3989 = vmatprep.subr.bf16.mxu0 %v3988_v0  ;;  %4245 = vmatprep.subr.bf16.mxu1 %v4244_v1  ;;  %v1613_v0 = vld [vmem:[#allocation8 + $0x1c40] sm:$0xff]  ;;  %v4004_v1 = vpack.c.bf16 %v1614_v57, %v1606_v56  ;;  %v4260_v2 = vpack.c.bf16 %v1616_v59, %v1608_v58  ;;  %v1663_v56 = vld [vmem:[#allocation8 + $0x1dd0] sm:$0xff]  ;;  %v1670_v57 = vld [vmem:[#allocation8 + $0x1e08] sm:$0xff] }
 0x22c   :  { %v1678_v58 = vld [vmem:[#allocation8 + $0x1e48] sm:$0xff]  ;;  %v1672_v59 = vld [vmem:[#allocation8 + $0x1e18] sm:$0xff] }
 0x22e   :  { %3991 = vmatpush1.bf16.msra.mxu0 %v3990_v7  ;;  %4247 = vmatpush1.bf16.msra.mxu1 %v4246_v38  ;;  %v1632_v7 = vld [vmem:[#allocation8 + $0x1cd8] sm:$0xff]  ;;  %v4006_v38 = vpack.c.bf16 %v1613_v0, %v1605_v62  ;;  %v4274_v62 = vpack.c.bf16 %v1663_v56, %v1655_v54  ;;  %v1669_v0 = vld [vmem:[#allocation8 + $0x1e00] sm:$0xff] }
 0x22f   :  { %3993 = vmatprep.subr.bf16.mxu0 %v3992_v11  ;;  %4249 = vmatprep.subr.bf16.mxu1 %v4248_v13  ;;  %v1629_v11 = vld [vmem:[#allocation8 + $0x1cc0] sm:$0xff]  ;;  %v4008_v13 = vpack.c.bf16 %v1630_v6, %v1622_v5  ;;  %v4264_v15 = vpack.c.bf16 %v1632_v7, %v1624_v63  ;;  %v1679_v5 = vld [vmem:[#allocation8 + $0x1e50] sm:$0xff]  ;;  %v1686_v6 = vld [vmem:[#allocation8 + $0x1e88] sm:$0xff] }
 0x230   :  { %v1694_v63 = vld [vmem:[#allocation8 + $0x1ec8] sm:$0xff]  ;;  %v1688_v7 = vld [vmem:[#allocation8 + $0x1e98] sm:$0xff] }
 0x232   :  { %3995 = vmatpush1.bf16.msra.mxu0 %v3994_v27  ;;  %4251 = vmatpush1.bf16.msra.mxu1 %v4250_v28  ;;  %v1648_v27 = vld [vmem:[#allocation8 + $0x1d58] sm:$0xff]  ;;  %v4010_v28 = vpack.c.bf16 %v1629_v11, %v1621_v10  ;;  %v4278_v10 = vpack.c.bf16 %v1679_v5, %v1671_v4  ;;  %v1685_v11 = vld [vmem:[#allocation8 + $0x1e80] sm:$0xff] }
 0x233   :  { %3997 = vmatprep.subr.bf16.mxu0 %v3996_v31  ;;  %4253 = vmatprep.subr.bf16.mxu1 %v4252_v33  ;;  %v1645_v31 = vld [vmem:[#allocation8 + $0x1d40] sm:$0xff]  ;;  %v4012_v33 = vpack.c.bf16 %v1646_v23, %v1638_v22  ;;  %v4268_v36 = vpack.c.bf16 %v1648_v27, %v1640_v21  ;;  %v1695_v22 = vld [vmem:[#allocation8 + $0x1ed0] sm:$0xff]  ;;  %v1702_v23 = vld [vmem:[#allocation8 + $0x1f08] sm:$0xff] }
 0x234   :  { %v1710_v21 = vld [vmem:[#allocation8 + $0x1f48] sm:$0xff]  ;;  %v1704_v27 = vld [vmem:[#allocation8 + $0x1f18] sm:$0xff]  ;;  %v713_v5 = vld [vmem:[#allocation8 + $0x20] sm:$0xff] }
 0x235   :  { %v4028_v39 = vpack.c.bf16 %v1710_v21, %v1702_v23 }
 0x236   :  { %3999 = vmatpush1.bf16.msra.mxu0 %v3998_v46  ;;  %4255 = vmatpush1.bf16.msra.mxu1 %v4254_v47  ;;  %v1664_v46 = vld [vmem:[#allocation8 + $0x1dd8] sm:$0xff]  ;;  %v4014_v47 = vpack.c.bf16 %v1645_v31, %v1637_v30  ;;  %v4282_v30 = vpack.c.bf16 %v1695_v22, %v1687_v19  ;;  %v1701_v31 = vld [vmem:[#allocation8 + $0x1f00] sm:$0xff]  ;;  %v731_v22 = vld [vmem:[#allocation8 + $0xb0] sm:$0xff] }
 0x237   :  { %4001 = vmatprep.subr.bf16.mxu0 %v4000_v51  ;;  %4257 = vmatprep.subr.bf16.mxu1 %v4256_v52  ;;  %v1661_v51 = vld [vmem:[#allocation8 + $0x1dc0] sm:$0xff]  ;;  %v4016_v52 = vpack.c.bf16 %v1662_v44, %v1654_v43  ;;  %v4272_v53 = vpack.c.bf16 %v1664_v46, %v1656_v45  ;;  %v1703_v43 = vld [vmem:[#allocation8 + $0x1f10] sm:$0xff]  ;;  %v1718_v45 = vld [vmem:[#allocation8 + $0x1f88] sm:$0xff] }
 0x238   :  { %v1711_v44 = vld [vmem:[#allocation8 + $0x1f50] sm:$0xff]  ;;  %v1726_v46 = vld [vmem:[#allocation8 + $0x1fc8] sm:$0xff]  ;;  %v737_v19 = vld [vmem:[#allocation8 + $0xe0] sm:$0xff] }
 0x239   :  { %v4032_v56 = vpack.c.bf16 %v1726_v46, %v1718_v45  ;;  %v747_v45 = vld [vmem:[#allocation8 + $0x130] sm:$0xff] }
 0x23a   :  { %4003 = vmatpush1.bf16.msra.mxu0 %v4002_v60  ;;  %4259 = vmatpush1.bf16.msra.mxu1 %v4258_v61  ;;  %v1680_v60 = vld [vmem:[#allocation8 + $0x1e58] sm:$0xff]  ;;  %v4018_v61 = vpack.c.bf16 %v1661_v51, %v1653_v50  ;;  %v4286_v51 = vpack.c.bf16 %v1711_v44, %v1703_v43  ;;  %v745_v43 = vld [vmem:[#allocation8 + $0x120] sm:$0xff] }
 0x23b   :  { %4005 = vmatprep.subr.bf16.mxu0 %v4004_v1  ;;  %4261 = vmatprep.subr.bf16.mxu1 %v4260_v2  ;;  %v1677_v1 = vld [vmem:[#allocation8 + $0x1e40] sm:$0xff]  ;;  %v4020_v2 = vpack.c.bf16 %v1678_v58, %v1670_v57  ;;  %v4276_v3 = vpack.c.bf16 %v1680_v60, %v1672_v59  ;;  %v1719_v58 = vld [vmem:[#allocation8 + $0x1f90] sm:$0xff]  ;;  %v714_v60 = vld [vmem:[#allocation8 + $0x28] sm:$0xff] }
 0x23c   :  { %v1727_v59 = vld [vmem:[#allocation8 + $0x1fd0] sm:$0xff]  ;;  %v753_v44 = vld [vmem:[#allocation8 + $0x160] sm:$0xff] }
 0x23e   :  { %4007 = vmatpush1.bf16.msra.mxu0 %v4006_v38  ;;  %4263 = vmatpush1.bf16.msra.mxu1 %v4262_v9  ;;  %v1696_v38 = vld [vmem:[#allocation8 + $0x1ed8] sm:$0xff]  ;;  %v4022_v9 = vpack.c.bf16 %v1677_v1, %v1669_v0 }
 0x23f   :  { %4009 = vmatprep.subr.bf16.mxu0 %v4008_v13  ;;  %4265 = vmatprep.subr.bf16.mxu1 %v4264_v15  ;;  %v1693_v13 = vld [vmem:[#allocation8 + $0x1ec0] sm:$0xff]  ;;  %v4024_v15 = vpack.c.bf16 %v1694_v63, %v1686_v6  ;;  %v4280_v42 = vpack.c.bf16 %v1696_v38, %v1688_v7  ;;  %v724_v0 = vld [vmem:[#allocation8 + $0x78] sm:$0xff]  ;;  %v715_v63 = vld [vmem:[#allocation8 + $0x30] sm:$0xff] }
 0x240   :  { %v721_v6 = vld [vmem:[#allocation8 + $0x60] sm:$0xff]  ;;  %v723_v7 = vld [vmem:[#allocation8 + $0x70] sm:$0xff]  ;;  %v730_v38 = vld [vmem:[#allocation8 + $0xa8] sm:$0xff] }
 0x242   :  { %4011 = vmatpush1.bf16.msra.mxu0 %v4010_v28  ;;  %4267 = vmatpush1.bf16.msra.mxu1 %v4266_v29  ;;  %v1712_v28 = vld [vmem:[#allocation8 + $0x1f58] sm:$0xff]  ;;  %v4026_v29 = vpack.c.bf16 %v1693_v13, %v1685_v11  ;;  %v4294_v13 = vpack.c.bf16 %v721_v6, %v713_v5  ;;  %v785_v5 = vld [vmem:[#allocation8 + $0x260] sm:$0xff]  ;;  %v779_v6 = vld [vmem:[#allocation8 + $0x230] sm:$0xff] }
 0x243   :  { %4013 = vmatprep.subr.bf16.mxu0 %v4012_v33  ;;  %4269 = vmatprep.subr.bf16.mxu1 %v4268_v36  ;;  %v1709_v33 = vld [vmem:[#allocation8 + $0x1f40] sm:$0xff]  ;;  %v403_v36 = vsub.s32 6, %v5348_v49  ;;  %v4284_v41 = vpack.c.bf16 %v1712_v28, %v1704_v27  ;;  %v740_v11 = vld [vmem:[#allocation8 + $0xf8] sm:$0xff]  ;;  %v739_v27 = vld [vmem:[#allocation8 + $0xf0] sm:$0xff] }
 0x244   :  { %v4030_v50 = vpack.c.bf16 %v1709_v33, %v1701_v31  ;;  %v746_v28 = vld [vmem:[#allocation8 + $0x128] sm:$0xff]  ;;  %v756_v31 = vld [vmem:[#allocation8 + $0x178] sm:$0xff] }
 0x245   :  { %v404_v54 = vrot.slane %v5403_v35, %v403_v36 }
 0x246   :  { %4015 = vmatpush1.bf16.msra.mxu0 %v4014_v47  ;;  %4271 = vmatpush1.bf16.msra.mxu1 %v4270_v48  ;;  %v1720_v47 = vld [vmem:[#allocation8 + $0x1f98] sm:$0xff] }
 0x247   :  { %4017 = vmatprep.subr.bf16.mxu0 %v4016_v52  ;;  %4273 = vmatprep.subr.bf16.mxu1 %v4272_v53  ;;  %v1728_v48 = vld [vmem:[#allocation8 + $0x1fd8] sm:$0xff]  ;;  %v1717_v52 = vld [vmem:[#allocation8 + $0x1f80] sm:$0xff] }
 0x248   :  { %v1725_v53 = vld [vmem:[#allocation8 + $0x1fc0] sm:$0xff]  ;;  %v4288_v57 = vpack.c.bf16 %v1728_v48, %v1720_v47  ;;  %v755_v47 = vld [vmem:[#allocation8 + $0x170] sm:$0xff]  ;;  %v762_v48 = vld [vmem:[#allocation8 + $0x1a8] sm:$0xff] }
 0x249   :  { %v4034_v1 = vpack.c.bf16 %v1725_v53, %v1717_v52  ;;  %v772_v52 = vld [vmem:[#allocation8 + $0x1f8] sm:$0xff]  ;;  %v4302_v53 = vpack.c.bf16 %v753_v44, %v745_v43  ;;  %v809_v43 = vld [vmem:[#allocation8 + $0x320] sm:$0xff] }
 0x24a   :  { %4019 = vmatpush1.bf16.msra.mxu0 %v4018_v61  ;;  %4275 = vmatpush1.bf16.msra.mxu1 %v4274_v62  ;;  %v722_v61 = vld [vmem:[#allocation8 + $0x68] sm:$0xff]  ;;  %v716_v62 = vld [vmem:[#allocation8 + $0x38] sm:$0xff]  ;;  %v817_v44 = vld [vmem:[#allocation8 + $0x360] sm:$0xff] }
 0x24b   :  { %4021 = vmatprep.subr.bf16.mxu0 %v4020_v2  ;;  %4277 = vmatprep.subr.bf16.mxu1 %v4276_v3  ;;  %v4290_v2 = vpack.c.bf16 %v1727_v59, %v1719_v58  ;;  %v697_v3 = vadd.f32 %v5397_v20, %v404_v54  ;;  %v4292_v4 = vpack.c.bf16 %v722_v61, %v714_v60  ;;  %v763_v58 = vld [vmem:[#allocation8 + $0x1b0] sm:$0xff]  ;;  %v778_v61 = vld [vmem:[#allocation8 + $0x228] sm:$0xff] }
 0x24c   :  { %v4548_v35 = vpack.c.bf16 %v724_v0, %v716_v62  ;;  %v4550_v20 = vpack.c.bf16 %v723_v7, %v715_v63  ;;  %v4558_v54 = vpack.c.bf16 %v755_v47, %v747_v45  ;;  %v771_v60 = vld [vmem:[#allocation8 + $0x1f0] sm:$0xff]  ;;  %v786_v62 = vld [vmem:[#allocation8 + $0x268] sm:$0xff]  ;;  %v780_v0 = vld [vmem:[#allocation8 + $0x238] sm:$0xff] }
 0x24d   :  { %v787_v7 = vld [vmem:[#allocation8 + $0x270] sm:$0xff] }
 0x24e   :  { %4023 = vmatpush1.bf16.msra.mxu0 %v4022_v9  ;;  %4279 = vmatpush1.bf16.msra.mxu1 %v4278_v10  ;;  %v738_v9 = vld [vmem:[#allocation8 + $0xe8] sm:$0xff]  ;;  %v732_v10 = vld [vmem:[#allocation8 + $0xb8] sm:$0xff]  ;;  %v811_v45 = vld [vmem:[#allocation8 + $0x330] sm:$0xff] }
 0x24f   :  { %4025 = vmatprep.subr.bf16.mxu0 %v4024_v15  ;;  %4281 = vmatprep.subr.bf16.mxu1 %v4280_v42  ;;  %v5426_v15 = vmax.f32 %v697_v3, 0.0  ;;  %v729_v42 = vld [vmem:[#allocation8 + $0xa0] sm:$0xff]  ;;  %v4296_v23 = vpack.c.bf16 %v738_v9, %v730_v38  ;;  %v4552_v21 = vpack.c.bf16 %v740_v11, %v732_v10  ;;  %v4562_v3 = vpack.c.bf16 %v771_v60, %v763_v58  ;;  %v794_v38 = vld [vmem:[#allocation8 + $0x2a8] sm:$0xff]  ;;  %v796_v10 = vld [vmem:[#allocation8 + $0x2b8] sm:$0xff] }
 0x250   :  { %v4298_v33 = vpack.c.bf16 %v737_v19, %v729_v42  ;;  %v802_v9 = vld [vmem:[#allocation8 + $0x2e8] sm:$0xff]  ;;  %v804_v11 = vld [vmem:[#allocation8 + $0x2f8] sm:$0xff]  ;;  %v793_v19 = vld [vmem:[#allocation8 + $0x2a0] sm:$0xff] }
 0x251   :  { %v4312_v42 = vpack.c.bf16 %v802_v9, %v794_v38  ;;  %v819_v47 = vld [vmem:[#allocation8 + $0x370] sm:$0xff]  ;;  %v858_v38 = vld [vmem:[#allocation8 + $0x4a8] sm:$0xff] }
 0x252   :  { %4027 = vmatpush1.bf16.msra.mxu0 %v4026_v29  ;;  %4283 = vmatpush1.bf16.msra.mxu1 %v4282_v30  ;;  %v754_v29 = vld [vmem:[#allocation8 + $0x168] sm:$0xff]  ;;  %v748_v30 = vld [vmem:[#allocation8 + $0x138] sm:$0xff]  ;;  %v827_v58 = vld [vmem:[#allocation8 + $0x3b0] sm:$0xff] }
 0x253   :  { %4029 = vmatprep.subr.bf16.mxu0 %v4028_v39  ;;  %4285 = vmatprep.subr.bf16.mxu1 %v4284_v41  ;;  %v4554_v39 = vpack.c.bf16 %v739_v27, %v731_v22  ;;  %v4300_v41 = vpack.c.bf16 %v754_v29, %v746_v28  ;;  %v4556_v46 = vpack.c.bf16 %v756_v31, %v748_v30  ;;  %v801_v22 = vld [vmem:[#allocation8 + $0x2e0] sm:$0xff]  ;;  %v803_v27 = vld [vmem:[#allocation8 + $0x2f0] sm:$0xff]  ;;  %v810_v28 = vld [vmem:[#allocation8 + $0x328] sm:$0xff] }
 0x254   :  { %v818_v29 = vld [vmem:[#allocation8 + $0x368] sm:$0xff]  ;;  %v812_v30 = vld [vmem:[#allocation8 + $0x338] sm:$0xff]  ;;  %v835_v60 = vld [vmem:[#allocation8 + $0x3f0] sm:$0xff] }
 0x255   :  { %v820_v31 = vld [vmem:[#allocation8 + $0x378] sm:$0xff]  ;;  %v866_v9 = vld [vmem:[#allocation8 + $0x4e8] sm:$0xff] }
 0x256   :  { %4031 = vmatpush1.bf16.msra.mxu0 %v4030_v50  ;;  %4287 = vmatpush1.bf16.msra.mxu1 %v4286_v51  ;;  %v770_v50 = vld [vmem:[#allocation8 + $0x1e8] sm:$0xff]  ;;  %v764_v51 = vld [vmem:[#allocation8 + $0x1b8] sm:$0xff] }
 0x257   :  { %4033 = vmatprep.subr.bf16.mxu0 %v4032_v56  ;;  %4289 = vmatprep.subr.bf16.mxu1 %v4288_v57  ;;  %v4304_v56 = vpack.c.bf16 %v770_v50, %v762_v48  ;;  %v769_v57 = vld [vmem:[#allocation8 + $0x1e0] sm:$0xff]  ;;  %v4560_v59 = vpack.c.bf16 %v772_v52, %v764_v51  ;;  %v826_v48 = vld [vmem:[#allocation8 + $0x3a8] sm:$0xff]  ;;  %v828_v51 = vld [vmem:[#allocation8 + $0x3b8] sm:$0xff] }
 0x258   :  { %v834_v50 = vld [vmem:[#allocation8 + $0x3e8] sm:$0xff]  ;;  %v836_v52 = vld [vmem:[#allocation8 + $0x3f8] sm:$0xff] }
 0x25a   :  { %4035 = vmatpush1.bf16.msra.mxu0 %v4034_v1  ;;  %4291 = vmatpush1.bf16.msra.mxu1 %v4290_v2  ;;  %v788_v1 = vld [vmem:[#allocation8 + $0x278] sm:$0xff] }
 0x25b   :  { %4293 = vmatprep.subr.bf16.mxu0 %v4292_v4  ;;  %4549 = vmatprep.subr.bf16.mxu1 %v4548_v35  ;;  %v4308_v4 = vpack.c.bf16 %v786_v62, %v778_v61  ;;  %v777_v35 = vld [vmem:[#allocation8 + $0x220] sm:$0xff]  ;;  %v4564_v63 = vpack.c.bf16 %v788_v1, %v780_v0  ;;  %v842_v61 = vld [vmem:[#allocation8 + $0x428] sm:$0xff]  ;;  %v844_v0 = vld [vmem:[#allocation8 + $0x438] sm:$0xff] }
 0x25c   :  { %v850_v62 = vld [vmem:[#allocation8 + $0x468] sm:$0xff]  ;;  %v852_v1 = vld [vmem:[#allocation8 + $0x478] sm:$0xff] }
 0x25d   :  { %2053 = vmatmul.mubr.f32.vlgmr.msra.gmra.mrb[4].mxu0 %v5426_v15  ;;  %2337 = vmatmul.mubr.f32.vlgmr.msra.gmra.mrb[4].mxu1 %v5426_v15 }
 0x25e   :  { %4295 = vmatpush1.bf16.msra.mxu0 %v4294_v13  ;;  %2407 = vmatprep.mubr.f32.mxu0 %v5360_v32  ;;  %v4310_v13 = vpack.c.bf16 %v785_v5, %v777_v35  ;;  %v841_v35 = vld [vmem:[#allocation8 + $0x420] sm:$0xff] }
 0x25f   :  { %4551 = vmatpush1.bf16.msra.mxu1 %v4550_v20  ;;  %2691 = vmatprep.mubr.f32.mxu1 %v5360_v32  ;;  %v761_v32 = vld [vmem:[#allocation8 + $0x1a0] sm:$0xff]  ;;  %v4566_v20 = vpack.c.bf16 %v787_v7, %v779_v6  ;;  %v843_v6 = vld [vmem:[#allocation8 + $0x430] sm:$0xff] }
 0x260   :  { %4297 = vmatprep.subr.bf16.mxu0 %v4296_v23  ;;  %4553 = vmatprep.subr.bf16.mxu1 %v4552_v21  ;;  %v4306_v2 = vpack.c.bf16 %v769_v57, %v761_v32  ;;  %v795_v23 = vld [vmem:[#allocation8 + $0x2b0] sm:$0xff]  ;;  %v4568_v21 = vpack.c.bf16 %v804_v11, %v796_v10  ;;  %v825_v32 = vld [vmem:[#allocation8 + $0x3a0] sm:$0xff]  ;;  %v860_v10 = vld [vmem:[#allocation8 + $0x4b8] sm:$0xff] }
 0x261   :  { %v833_v57 = vld [vmem:[#allocation8 + $0x3e0] sm:$0xff]  ;;  %v851_v7 = vld [vmem:[#allocation8 + $0x470] sm:$0xff]  ;;  %v868_v11 = vld [vmem:[#allocation8 + $0x4f8] sm:$0xff] }
 0x262   :  { %4299 = vmatpush1.bf16.msra.mxu0 %v4298_v33  ;;  %v4314_v33 = vpack.c.bf16 %v801_v22, %v793_v19  ;;  %v849_v5 = vld [vmem:[#allocation8 + $0x460] sm:$0xff] }
 0x263   :  { %4555 = vmatpush1.bf16.msra.mxu1 %v4554_v39  ;;  %4301 = vmatprep.subr.bf16.mxu0 %v4300_v41  ;;  %v4570_v39 = vpack.c.bf16 %v803_v27, %v795_v23  ;;  %v4316_v41 = vpack.c.bf16 %v818_v29, %v810_v28  ;;  %v857_v19 = vld [vmem:[#allocation8 + $0x4a0] sm:$0xff]  ;;  %v859_v23 = vld [vmem:[#allocation8 + $0x4b0] sm:$0xff]  ;;  %v874_v28 = vld [vmem:[#allocation8 + $0x528] sm:$0xff] }
 0x264   :  { %4557 = vmatprep.subr.bf16.mxu1 %v4556_v46  ;;  %v4572_v46 = vpack.c.bf16 %v820_v31, %v812_v30  ;;  %v865_v22 = vld [vmem:[#allocation8 + $0x4e0] sm:$0xff]  ;;  %v867_v27 = vld [vmem:[#allocation8 + $0x4f0] sm:$0xff]  ;;  %v882_v29 = vld [vmem:[#allocation8 + $0x568] sm:$0xff] }
 0x265   :  { %v876_v30 = vld [vmem:[#allocation8 + $0x538] sm:$0xff] }
 0x266   :  { %4303 = vmatpush1.bf16.msra.mxu0 %v4302_v53  ;;  %v4318_v53 = vpack.c.bf16 %v817_v44, %v809_v43  ;;  %v884_v31 = vld [vmem:[#allocation8 + $0x578] sm:$0xff]  ;;  %v873_v43 = vld [vmem:[#allocation8 + $0x520] sm:$0xff] }
 0x267   :  { %4559 = vmatpush1.bf16.msra.mxu1 %v4558_v54  ;;  %4305 = vmatprep.subr.bf16.mxu0 %v4304_v56  ;;  %v4574_v54 = vpack.c.bf16 %v819_v47, %v811_v45  ;;  %v4320_v56 = vpack.c.bf16 %v834_v50, %v826_v48  ;;  %v881_v44 = vld [vmem:[#allocation8 + $0x560] sm:$0xff]  ;;  %v875_v45 = vld [vmem:[#allocation8 + $0x530] sm:$0xff]  ;;  %v890_v48 = vld [vmem:[#allocation8 + $0x5a8] sm:$0xff] }
 0x268   :  { %4561 = vmatprep.subr.bf16.mxu1 %v4560_v59  ;;  %v4576_v59 = vpack.c.bf16 %v836_v52, %v828_v51  ;;  %v883_v47 = vld [vmem:[#allocation8 + $0x570] sm:$0xff]  ;;  %v898_v50 = vld [vmem:[#allocation8 + $0x5e8] sm:$0xff]  ;;  %v892_v51 = vld [vmem:[#allocation8 + $0x5b8] sm:$0xff] }
 0x269   :  { %v900_v52 = vld [vmem:[#allocation8 + $0x5f8] sm:$0xff] }
 0x26a   :  { %4307 = vmatpush1.bf16.msra.mxu0 %v4306_v2  ;;  %v4322_v2 = vpack.c.bf16 %v833_v57, %v825_v32  ;;  %v889_v32 = vld [vmem:[#allocation8 + $0x5a0] sm:$0xff] }
 0x26b   :  { %4563 = vmatpush1.bf16.msra.mxu1 %v4562_v3  ;;  %4309 = vmatprep.subr.bf16.mxu0 %v4308_v4  ;;  %v4578_v3 = vpack.c.bf16 %v835_v60, %v827_v58  ;;  %v4324_v4 = vpack.c.bf16 %v850_v62, %v842_v61  ;;  %v897_v57 = vld [vmem:[#allocation8 + $0x5e0] sm:$0xff]  ;;  %v891_v58 = vld [vmem:[#allocation8 + $0x5b0] sm:$0xff]  ;;  %v906_v61 = vld [vmem:[#allocation8 + $0x628] sm:$0xff] }
 0x26c   :  { %4565 = vmatprep.subr.bf16.mxu1 %v4564_v63  ;;  %v4580_v63 = vpack.c.bf16 %v852_v1, %v844_v0  ;;  %v899_v60 = vld [vmem:[#allocation8 + $0x5f0] sm:$0xff]  ;;  %v914_v62 = vld [vmem:[#allocation8 + $0x668] sm:$0xff]  ;;  %v908_v0 = vld [vmem:[#allocation8 + $0x638] sm:$0xff] }
 0x26d   :  { %v916_v1 = vld [vmem:[#allocation8 + $0x678] sm:$0xff] }
 0x26e   :  { %4311 = vmatpush1.bf16.msra.mxu0 %v4310_v13  ;;  %v4326_v13 = vpack.c.bf16 %v849_v5, %v841_v35  ;;  %v905_v35 = vld [vmem:[#allocation8 + $0x620] sm:$0xff] }
 0x26f   :  { %4567 = vmatpush1.bf16.msra.mxu1 %v4566_v20  ;;  %4313 = vmatprep.subr.bf16.mxu0 %v4312_v42  ;;  %v4582_v20 = vpack.c.bf16 %v851_v7, %v843_v6  ;;  %v4328_v42 = vpack.c.bf16 %v866_v9, %v858_v38  ;;  %v913_v5 = vld [vmem:[#allocation8 + $0x660] sm:$0xff]  ;;  %v907_v6 = vld [vmem:[#allocation8 + $0x630] sm:$0xff]  ;;  %v922_v38 = vld [vmem:[#allocation8 + $0x6a8] sm:$0xff] }
 0x270   :  { %4569 = vmatprep.subr.bf16.mxu1 %v4568_v21  ;;  %v4584_v21 = vpack.c.bf16 %v868_v11, %v860_v10  ;;  %v915_v7 = vld [vmem:[#allocation8 + $0x670] sm:$0xff]  ;;  %v930_v9 = vld [vmem:[#allocation8 + $0x6e8] sm:$0xff]  ;;  %v924_v10 = vld [vmem:[#allocation8 + $0x6b8] sm:$0xff] }
 0x271   :  { %v932_v11 = vld [vmem:[#allocation8 + $0x6f8] sm:$0xff] }
 0x272   :  { %4315 = vmatpush1.bf16.msra.mxu0 %v4314_v33  ;;  %v4330_v33 = vpack.c.bf16 %v865_v22, %v857_v19  ;;  %v921_v19 = vld [vmem:[#allocation8 + $0x6a0] sm:$0xff] }
 0x273   :  { %4571 = vmatpush1.bf16.msra.mxu1 %v4570_v39  ;;  %4317 = vmatprep.subr.bf16.mxu0 %v4316_v41  ;;  %v4586_v39 = vpack.c.bf16 %v867_v27, %v859_v23  ;;  %v4332_v41 = vpack.c.bf16 %v882_v29, %v874_v28  ;;  %v929_v22 = vld [vmem:[#allocation8 + $0x6e0] sm:$0xff]  ;;  %v923_v23 = vld [vmem:[#allocation8 + $0x6b0] sm:$0xff]  ;;  %v938_v28 = vld [vmem:[#allocation8 + $0x728] sm:$0xff] }
 0x274   :  { %4573 = vmatprep.subr.bf16.mxu1 %v4572_v46  ;;  %v4588_v46 = vpack.c.bf16 %v884_v31, %v876_v30  ;;  %v931_v27 = vld [vmem:[#allocation8 + $0x6f0] sm:$0xff]  ;;  %v946_v29 = vld [vmem:[#allocation8 + $0x768] sm:$0xff]  ;;  %v940_v30 = vld [vmem:[#allocation8 + $0x738] sm:$0xff] }
 0x275   :  { %v948_v31 = vld [vmem:[#allocation8 + $0x778] sm:$0xff] }
 0x276   :  { %4319 = vmatpush1.bf16.msra.mxu0 %v4318_v53  ;;  %v4334_v53 = vpack.c.bf16 %v881_v44, %v873_v43  ;;  %v937_v43 = vld [vmem:[#allocation8 + $0x720] sm:$0xff] }
 0x277   :  { %4575 = vmatpush1.bf16.msra.mxu1 %v4574_v54  ;;  %4321 = vmatprep.subr.bf16.mxu0 %v4320_v56  ;;  %v4590_v54 = vpack.c.bf16 %v883_v47, %v875_v45  ;;  %v4336_v56 = vpack.c.bf16 %v898_v50, %v890_v48  ;;  %v945_v44 = vld [vmem:[#allocation8 + $0x760] sm:$0xff]  ;;  %v939_v45 = vld [vmem:[#allocation8 + $0x730] sm:$0xff]  ;;  %v954_v48 = vld [vmem:[#allocation8 + $0x7a8] sm:$0xff] }
 0x278   :  { %4577 = vmatprep.subr.bf16.mxu1 %v4576_v59  ;;  %v4592_v59 = vpack.c.bf16 %v900_v52, %v892_v51  ;;  %v947_v47 = vld [vmem:[#allocation8 + $0x770] sm:$0xff]  ;;  %v962_v50 = vld [vmem:[#allocation8 + $0x7e8] sm:$0xff]  ;;  %v956_v51 = vld [vmem:[#allocation8 + $0x7b8] sm:$0xff] }
 0x279   :  { %v964_v52 = vld [vmem:[#allocation8 + $0x7f8] sm:$0xff] }
 0x27a   :  { %4323 = vmatpush1.bf16.msra.mxu0 %v4322_v2  ;;  %v4338_v2 = vpack.c.bf16 %v897_v57, %v889_v32  ;;  %v953_v32 = vld [vmem:[#allocation8 + $0x7a0] sm:$0xff] }
 0x27b   :  { %4579 = vmatpush1.bf16.msra.mxu1 %v4578_v3  ;;  %4325 = vmatprep.subr.bf16.mxu0 %v4324_v4  ;;  %v4594_v3 = vpack.c.bf16 %v899_v60, %v891_v58  ;;  %v4340_v4 = vpack.c.bf16 %v914_v62, %v906_v61  ;;  %v961_v57 = vld [vmem:[#allocation8 + $0x7e0] sm:$0xff]  ;;  %v955_v58 = vld [vmem:[#allocation8 + $0x7b0] sm:$0xff]  ;;  %v970_v61 = vld [vmem:[#allocation8 + $0x828] sm:$0xff] }
 0x27c   :  { %4581 = vmatprep.subr.bf16.mxu1 %v4580_v63  ;;  %v4596_v63 = vpack.c.bf16 %v916_v1, %v908_v0  ;;  %v963_v60 = vld [vmem:[#allocation8 + $0x7f0] sm:$0xff]  ;;  %v978_v62 = vld [vmem:[#allocation8 + $0x868] sm:$0xff]  ;;  %v972_v0 = vld [vmem:[#allocation8 + $0x838] sm:$0xff] }
 0x27d   :  { %v980_v1 = vld [vmem:[#allocation8 + $0x878] sm:$0xff] }
 0x27e   :  { %4327 = vmatpush1.bf16.msra.mxu0 %v4326_v13  ;;  %v4342_v13 = vpack.c.bf16 %v913_v5, %v905_v35  ;;  %v969_v35 = vld [vmem:[#allocation8 + $0x820] sm:$0xff] }
 0x27f   :  { %4583 = vmatpush1.bf16.msra.mxu1 %v4582_v20  ;;  %4329 = vmatprep.subr.bf16.mxu0 %v4328_v42  ;;  %v4598_v20 = vpack.c.bf16 %v915_v7, %v907_v6  ;;  %v4344_v42 = vpack.c.bf16 %v930_v9, %v922_v38  ;;  %v977_v5 = vld [vmem:[#allocation8 + $0x860] sm:$0xff]  ;;  %v4612_v6 = vpack.c.bf16 %v980_v1, %v972_v0  ;;  %v979_v7 = vld [vmem:[#allocation8 + $0x870] sm:$0xff]  ;;  %v986_v38 = vld [vmem:[#allocation8 + $0x8a8] sm:$0xff] }
 0x280   :  { %4585 = vmatprep.subr.bf16.mxu1 %v4584_v21  ;;  %v4600_v21 = vpack.c.bf16 %v932_v11, %v924_v10  ;;  %v994_v9 = vld [vmem:[#allocation8 + $0x8e8] sm:$0xff]  ;;  %v4358_v10 = vpack.c.bf16 %v977_v5, %v969_v35  ;;  %v988_v11 = vld [vmem:[#allocation8 + $0x8b8] sm:$0xff]  ;;  %v1035_v35 = vld [vmem:[#allocation8 + $0xa30] sm:$0xff] }
 0x282   :  { %4331 = vmatpush1.bf16.msra.mxu0 %v4330_v33  ;;  %v4346_v33 = vpack.c.bf16 %v929_v22, %v921_v19  ;;  %v993_v19 = vld [vmem:[#allocation8 + $0x8e0] sm:$0xff]  ;;  %v987_v22 = vld [vmem:[#allocation8 + $0x8b0] sm:$0xff] }
 0x283   :  { %4587 = vmatpush1.bf16.msra.mxu1 %v4586_v39  ;;  %4333 = vmatprep.subr.bf16.mxu0 %v4332_v41  ;;  %v4602_v39 = vpack.c.bf16 %v931_v27, %v923_v23  ;;  %v4348_v41 = vpack.c.bf16 %v946_v29, %v938_v28  ;;  %v4360_v23 = vpack.c.bf16 %v994_v9, %v986_v38  ;;  %v1002_v27 = vld [vmem:[#allocation8 + $0x928] sm:$0xff]  ;;  %v1052_v38 = vld [vmem:[#allocation8 + $0xab8] sm:$0xff] }
 0x284   :  { %4589 = vmatprep.subr.bf16.mxu1 %v4588_v46  ;;  %v4604_v46 = vpack.c.bf16 %v948_v31, %v940_v30  ;;  %v1010_v28 = vld [vmem:[#allocation8 + $0x968] sm:$0xff]  ;;  %v1004_v30 = vld [vmem:[#allocation8 + $0x938] sm:$0xff] }
 0x285   :  { %v1012_v31 = vld [vmem:[#allocation8 + $0x978] sm:$0xff] }
 0x286   :  { %4335 = vmatpush1.bf16.msra.mxu0 %v4334_v53  ;;  %v4350_v53 = vpack.c.bf16 %v945_v44, %v937_v43  ;;  %v1001_v43 = vld [vmem:[#allocation8 + $0x920] sm:$0xff]  ;;  %v1060_v9 = vld [vmem:[#allocation8 + $0xaf8] sm:$0xff] }
 0x287   :  { %4591 = vmatpush1.bf16.msra.mxu1 %v4590_v54  ;;  %4337 = vmatprep.subr.bf16.mxu0 %v4336_v56  ;;  %v4606_v54 = vpack.c.bf16 %v947_v47, %v939_v45  ;;  %v4352_v56 = vpack.c.bf16 %v962_v50, %v954_v48  ;;  %v1009_v44 = vld [vmem:[#allocation8 + $0x960] sm:$0xff]  ;;  %v1003_v45 = vld [vmem:[#allocation8 + $0x930] sm:$0xff]  ;;  %v1018_v48 = vld [vmem:[#allocation8 + $0x9a8] sm:$0xff] }
 0x288   :  { %4593 = vmatprep.subr.bf16.mxu1 %v4592_v59  ;;  %v4608_v59 = vpack.c.bf16 %v964_v52, %v956_v51  ;;  %v1011_v47 = vld [vmem:[#allocation8 + $0x970] sm:$0xff]  ;;  %v1026_v50 = vld [vmem:[#allocation8 + $0x9e8] sm:$0xff]  ;;  %v1020_v51 = vld [vmem:[#allocation8 + $0x9b8] sm:$0xff]  ;;  %v4366_v52 = vpack.c.bf16 %v1009_v44, %v1001_v43 }
 0x289   :  { %v1067_v43 = vld [vmem:[#allocation8 + $0xb30] sm:$0xff] }
 0x28a   :  { %4339 = vmatpush1.bf16.msra.mxu0 %v4338_v2  ;;  %v4354_v2 = vpack.c.bf16 %v961_v57, %v953_v32  ;;  %v1025_v32 = vld [vmem:[#allocation8 + $0x9e0] sm:$0xff]  ;;  %v1019_v57 = vld [vmem:[#allocation8 + $0x9b0] sm:$0xff] }
 0x28b   :  { %4595 = vmatpush1.bf16.msra.mxu1 %v4594_v3  ;;  %4341 = vmatprep.subr.bf16.mxu0 %v4340_v4  ;;  %v4610_v3 = vpack.c.bf16 %v963_v60, %v955_v58  ;;  %v4356_v4 = vpack.c.bf16 %v978_v62, %v970_v61  ;;  %v1042_v60 = vld [vmem:[#allocation8 + $0xa68] sm:$0xff]  ;;  %v1036_v61 = vld [vmem:[#allocation8 + $0xa38] sm:$0xff] }
 0x28c   :  { %4597 = vmatprep.subr.bf16.mxu1 %v4596_v63  ;;  %v971_v63 = vld [vmem:[#allocation8 + $0x830] sm:$0xff]  ;;  %v1044_v62 = vld [vmem:[#allocation8 + $0xa78] sm:$0xff] }
 0x28d   :  { %v4628_v5 = vpack.c.bf16 %v1044_v62, %v1036_v61 }
 0x28e   :  { %4343 = vmatpush1.bf16.msra.mxu0 %v4342_v13  ;;  %v996_v13 = vld [vmem:[#allocation8 + $0x8f8] sm:$0xff] }
 0x28f   :  { %4599 = vmatpush1.bf16.msra.mxu1 %v4598_v20  ;;  %4345 = vmatprep.subr.bf16.mxu0 %v4344_v42  ;;  %v4614_v20 = vpack.c.bf16 %v979_v7, %v971_v63  ;;  %v985_v42 = vld [vmem:[#allocation8 + $0x8a0] sm:$0xff]  ;;  %v4616_v29 = vpack.c.bf16 %v996_v13, %v988_v11  ;;  %v1050_v63 = vld [vmem:[#allocation8 + $0xaa8] sm:$0xff] }
 0x290   :  { %4601 = vmatprep.subr.bf16.mxu1 %v4600_v21  ;;  %v995_v21 = vld [vmem:[#allocation8 + $0x8f0] sm:$0xff]  ;;  %v1058_v7 = vld [vmem:[#allocation8 + $0xae8] sm:$0xff] }
 0x291   :  { %v4376_v13 = vpack.c.bf16 %v1058_v7, %v1050_v63  ;;  %v1116_v63 = vld [vmem:[#allocation8 + $0xcb8] sm:$0xff] }
 0x292   :  { %4347 = vmatpush1.bf16.msra.mxu0 %v4346_v33  ;;  %v4362_v33 = vpack.c.bf16 %v993_v19, %v985_v42  ;;  %v1057_v42 = vld [vmem:[#allocation8 + $0xae0] sm:$0xff]  ;;  %v1051_v19 = vld [vmem:[#allocation8 + $0xab0] sm:$0xff]  ;;  %v1124_v7 = vld [vmem:[#allocation8 + $0xcf8] sm:$0xff] }
 0x293   :  { %4603 = vmatpush1.bf16.msra.mxu1 %v4602_v39  ;;  %4349 = vmatprep.subr.bf16.mxu0 %v4348_v41  ;;  %v4618_v39 = vpack.c.bf16 %v995_v21, %v987_v22  ;;  %v4364_v41 = vpack.c.bf16 %v1010_v28, %v1002_v27  ;;  %v4632_v22 = vpack.c.bf16 %v1060_v9, %v1052_v38  ;;  %v1066_v21 = vld [vmem:[#allocation8 + $0xb28] sm:$0xff]  ;;  %v1068_v28 = vld [vmem:[#allocation8 + $0xb38] sm:$0xff] }
 0x294   :  { %4605 = vmatprep.subr.bf16.mxu1 %v4604_v46  ;;  %v4620_v46 = vpack.c.bf16 %v1012_v31, %v1004_v30  ;;  %v1074_v27 = vld [vmem:[#allocation8 + $0xb68] sm:$0xff] }
 0x296   :  { %4351 = vmatpush1.bf16.msra.mxu0 %v4350_v53  ;;  %v4622_v53 = vpack.c.bf16 %v1011_v47, %v1003_v45  ;;  %v1075_v45 = vld [vmem:[#allocation8 + $0xb70] sm:$0xff]  ;;  %v1090_v47 = vld [vmem:[#allocation8 + $0xbe8] sm:$0xff] }
 0x297   :  { %4607 = vmatpush1.bf16.msra.mxu1 %v4606_v54  ;;  %4353 = vmatprep.subr.bf16.mxu0 %v4352_v56  ;;  %v4368_v54 = vpack.c.bf16 %v1026_v50, %v1018_v48  ;;  %v1017_v56 = vld [vmem:[#allocation8 + $0x9a0] sm:$0xff]  ;;  %v1084_v48 = vld [vmem:[#allocation8 + $0xbb8] sm:$0xff] }
 0x298   :  { %4609 = vmatprep.subr.bf16.mxu1 %v4608_v59  ;;  %v1034_v59 = vld [vmem:[#allocation8 + $0xa28] sm:$0xff]  ;;  %v4370_v0 = vpack.c.bf16 %v1025_v32, %v1017_v56  ;;  %v1092_v50 = vld [vmem:[#allocation8 + $0xbf8] sm:$0xff]  ;;  %v1083_v56 = vld [vmem:[#allocation8 + $0xbb0] sm:$0xff] }
 0x299   :  { %v4640_v32 = vpack.c.bf16 %v1092_v50, %v1084_v48 }
 0x29a   :  { %4355 = vmatpush1.bf16.msra.mxu0 %v4354_v2  ;;  %v4372_v2 = vpack.c.bf16 %v1042_v60, %v1034_v59  ;;  %v1100_v59 = vld [vmem:[#allocation8 + $0xc38] sm:$0xff] }
 0x29b   :  { %4611 = vmatpush1.bf16.msra.mxu1 %v4610_v3  ;;  %4357 = vmatprep.subr.bf16.mxu0 %v4356_v4  ;;  %v1033_v3 = vld [vmem:[#allocation8 + $0xa20] sm:$0xff]  ;;  %v1108_v60 = vld [vmem:[#allocation8 + $0xc78] sm:$0xff] }
 0x29c   :  { %4613 = vmatprep.subr.bf16.mxu1 %v4612_v6  ;;  %v1041_v4 = vld [vmem:[#allocation8 + $0xa60] sm:$0xff]  ;;  %v1043_v6 = vld [vmem:[#allocation8 + $0xa70] sm:$0xff] }
 0x29d   :  { %2408 = vmatmul.mubr.f32.vlgmr.msra.gmra.mrb[6].mxu0 %v5362_v37  ;;  %v4630_v11 = vpack.c.bf16 %v1043_v6, %v1035_v35  ;;  %v1107_v35 = vld [vmem:[#allocation8 + $0xc70] sm:$0xff]  ;;  %v1122_v6 = vld [vmem:[#allocation8 + $0xce8] sm:$0xff] }
 0x29e   :  { %2692 = vmatmul.mubr.f32.vlgmr.msra.gmra.mrb[6].mxu1 %v5362_v37  ;;  %4359 = vmatpush1.bf16.msra.mxu0 %v4358_v10  ;;  %v1028_v37 = vld [vmem:[#allocation8 + $0x9f8] sm:$0xff]  ;;  %v4374_v10 = vpack.c.bf16 %v1041_v4, %v1033_v3  ;;  %v1099_v3 = vld [vmem:[#allocation8 + $0xc30] sm:$0xff]  ;;  %v4644_v4 = vpack.c.bf16 %v1108_v60, %v1100_v59 }
 0x29f   :  { %2478 = vmatprep.mubr.f32.mxu0 %v5374_v55  ;;  %4615 = vmatpush1.bf16.msra.mxu1 %v4614_v20  ;;  %v4624_v58 = vpack.c.bf16 %v1028_v37, %v1020_v51  ;;  %v1049_v20 = vld [vmem:[#allocation8 + $0xaa0] sm:$0xff]  ;;  %v4638_v37 = vpack.c.bf16 %v1075_v45, %v1067_v43  ;;  %v4646_v9 = vpack.c.bf16 %v1107_v35, %v1099_v3  ;;  %v1139_v43 = vld [vmem:[#allocation8 + $0xd70] sm:$0xff]  ;;  %v1154_v45 = vld [vmem:[#allocation8 + $0xde8] sm:$0xff] }
 0x2a0   :  { %2762 = vmatprep.mubr.f32.mxu1 %v5374_v55  ;;  %4361 = vmatprep.subr.bf16.mxu0 %v4360_v23  ;;  %v1027_v55 = vld [vmem:[#allocation8 + $0x9f0] sm:$0xff]  ;;  %v4378_v30 = vpack.c.bf16 %v1057_v42, %v1049_v20  ;;  %v4648_v42 = vpack.c.bf16 %v1124_v7, %v1116_v63  ;;  %v1186_v35 = vld [vmem:[#allocation8 + $0xee8] sm:$0xff] }
 0x2a1   :  { %4617 = vmatprep.subr.bf16.mxu1 %v4616_v29  ;;  %v4626_v1 = vpack.c.bf16 %v1027_v55, %v1019_v57  ;;  %v1059_v23 = vld [vmem:[#allocation8 + $0xaf0] sm:$0xff]  ;;  %v1076_v29 = vld [vmem:[#allocation8 + $0xb78] sm:$0xff]  ;;  %v1106_v55 = vld [vmem:[#allocation8 + $0xc68] sm:$0xff] }
 0x2a2   :  { %4363 = vmatpush1.bf16.msra.mxu0 %v4362_v33  ;;  %v4634_v31 = vpack.c.bf16 %v1059_v23, %v1051_v19  ;;  %v4380_v33 = vpack.c.bf16 %v1074_v27, %v1066_v21  ;;  %v4636_v44 = vpack.c.bf16 %v1076_v29, %v1068_v28  ;;  %v1091_v57 = vld [vmem:[#allocation8 + $0xbf0] sm:$0xff]  ;;  %v1138_v23 = vld [vmem:[#allocation8 + $0xd68] sm:$0xff]  ;;  %v1132_v21 = vld [vmem:[#allocation8 + $0xd38] sm:$0xff] }
 0x2a3   :  { %4619 = vmatpush1.bf16.msra.mxu1 %v4618_v39  ;;  %4365 = vmatprep.subr.bf16.mxu0 %v4364_v41  ;;  %v1065_v39 = vld [vmem:[#allocation8 + $0xb20] sm:$0xff]  ;;  %v4642_v62 = vpack.c.bf16 %v1091_v57, %v1083_v56  ;;  %v1115_v20 = vld [vmem:[#allocation8 + $0xcb0] sm:$0xff]  ;;  %v1140_v27 = vld [vmem:[#allocation8 + $0xd78] sm:$0xff] }
 0x2a4   :  { %4621 = vmatprep.subr.bf16.mxu1 %v4620_v46  ;;  %v1073_v41 = vld [vmem:[#allocation8 + $0xb60] sm:$0xff]  ;;  %v1082_v46 = vld [vmem:[#allocation8 + $0xba8] sm:$0xff]  ;;  %v1123_v19 = vld [vmem:[#allocation8 + $0xcf0] sm:$0xff] }
 0x2a5   :  { %v4382_v51 = vpack.c.bf16 %v1073_v41, %v1065_v39  ;;  %v4650_v29 = vpack.c.bf16 %v1123_v19, %v1115_v20  ;;  %v1131_v39 = vld [vmem:[#allocation8 + $0xd30] sm:$0xff]  ;;  %v4652_v41 = vpack.c.bf16 %v1140_v27, %v1132_v21  ;;  %v1170_v57 = vld [vmem:[#allocation8 + $0xe68] sm:$0xff] }
 0x2a6   :  { %4367 = vmatpush1.bf16.msra.mxu0 %v4366_v52  ;;  %v4384_v52 = vpack.c.bf16 %v1090_v47, %v1082_v46  ;;  %v1148_v46 = vld [vmem:[#allocation8 + $0xdb8] sm:$0xff]  ;;  %v4654_v50 = vpack.c.bf16 %v1139_v43, %v1131_v39  ;;  %v1155_v56 = vld [vmem:[#allocation8 + $0xdf0] sm:$0xff]  ;;  %v1202_v19 = vld [vmem:[#allocation8 + $0xf68] sm:$0xff] }
 0x2a7   :  { %4623 = vmatpush1.bf16.msra.mxu1 %v4622_v53  ;;  %4369 = vmatprep.subr.bf16.mxu0 %v4368_v54  ;;  %v1081_v53 = vld [vmem:[#allocation8 + $0xba0] sm:$0xff]  ;;  %v1156_v47 = vld [vmem:[#allocation8 + $0xdf8] sm:$0xff]  ;;  %v1171_v3 = vld [vmem:[#allocation8 + $0xe70] sm:$0xff] }
 0x2a8   :  { %4625 = vmatprep.subr.bf16.mxu1 %v4624_v58  ;;  %v1089_v54 = vld [vmem:[#allocation8 + $0xbe0] sm:$0xff]  ;;  %v1098_v58 = vld [vmem:[#allocation8 + $0xc28] sm:$0xff]  ;;  %v1187_v20 = vld [vmem:[#allocation8 + $0xef0] sm:$0xff] }
 0x2a9   :  { %v4386_v61 = vpack.c.bf16 %v1089_v54, %v1081_v53  ;;  %v1147_v53 = vld [vmem:[#allocation8 + $0xdb0] sm:$0xff]  ;;  %v4656_v54 = vpack.c.bf16 %v1156_v47, %v1148_v46  ;;  %v1218_v43 = vld [vmem:[#allocation8 + $0xfe8] sm:$0xff] }
 0x2aa   :  { %4371 = vmatpush1.bf16.msra.mxu0 %v4370_v0  ;;  %v4388_v0 = vpack.c.bf16 %v1106_v55, %v1098_v58  ;;  %v1164_v58 = vld [vmem:[#allocation8 + $0xe38] sm:$0xff]  ;;  %v4658_v60 = vpack.c.bf16 %v1155_v56, %v1147_v53  ;;  %v1203_v39 = vld [vmem:[#allocation8 + $0xf70] sm:$0xff]  ;;  %v1234_v56 = vld [vmem:[#allocation8 + $0x1068] sm:$0xff] }
 0x2ab   :  { %4627 = vmatpush1.bf16.msra.mxu1 %v4626_v1  ;;  %4373 = vmatprep.subr.bf16.mxu0 %v4372_v2  ;;  %v1097_v1 = vld [vmem:[#allocation8 + $0xc20] sm:$0xff]  ;;  %v1172_v55 = vld [vmem:[#allocation8 + $0xe78] sm:$0xff]  ;;  %v1219_v53 = vld [vmem:[#allocation8 + $0xff0] sm:$0xff] }
 0x2ac   :  { %4629 = vmatprep.subr.bf16.mxu1 %v4628_v5  ;;  %v1105_v2 = vld [vmem:[#allocation8 + $0xc60] sm:$0xff]  ;;  %v1114_v5 = vld [vmem:[#allocation8 + $0xca8] sm:$0xff] }
 0x2ad   :  { %v4390_v38 = vpack.c.bf16 %v1105_v2, %v1097_v1  ;;  %v1163_v1 = vld [vmem:[#allocation8 + $0xe30] sm:$0xff]  ;;  %v4660_v2 = vpack.c.bf16 %v1172_v55, %v1164_v58 }
 0x2ae   :  { %4375 = vmatpush1.bf16.msra.mxu0 %v4374_v10  ;;  %v4392_v10 = vpack.c.bf16 %v1122_v6, %v1114_v5  ;;  %v1180_v5 = vld [vmem:[#allocation8 + $0xeb8] sm:$0xff]  ;;  %v4662_v7 = vpack.c.bf16 %v1171_v3, %v1163_v1  ;;  %v1235_v1 = vld [vmem:[#allocation8 + $0x1070] sm:$0xff]  ;;  %v1250_v3 = vld [vmem:[#allocation8 + $0x10e8] sm:$0xff] }
 0x2af   :  { %4631 = vmatpush1.bf16.msra.mxu1 %v4630_v11  ;;  %4377 = vmatprep.subr.bf16.mxu0 %v4376_v13  ;;  %v1113_v11 = vld [vmem:[#allocation8 + $0xca0] sm:$0xff]  ;;  %v1188_v6 = vld [vmem:[#allocation8 + $0xef8] sm:$0xff] }
 0x2b0   :  { %4633 = vmatprep.subr.bf16.mxu1 %v4632_v22  ;;  %v1121_v13 = vld [vmem:[#allocation8 + $0xce0] sm:$0xff]  ;;  %v1130_v22 = vld [vmem:[#allocation8 + $0xd28] sm:$0xff] }
 0x2b1   :  { %v4394_v28 = vpack.c.bf16 %v1121_v13, %v1113_v11  ;;  %v1179_v11 = vld [vmem:[#allocation8 + $0xeb0] sm:$0xff]  ;;  %v4664_v13 = vpack.c.bf16 %v1188_v6, %v1180_v5  ;;  %v1252_v5 = vld [vmem:[#allocation8 + $0x10f8] sm:$0xff] }
 0x2b2   :  { %4379 = vmatpush1.bf16.msra.mxu0 %v4378_v30  ;;  %v4396_v30 = vpack.c.bf16 %v1138_v23, %v1130_v22  ;;  %v1196_v22 = vld [vmem:[#allocation8 + $0xf38] sm:$0xff]  ;;  %v4666_v27 = vpack.c.bf16 %v1187_v20, %v1179_v11  ;;  %v1258_v11 = vld [vmem:[#allocation8 + $0x1128] sm:$0xff] }
 0x2b3   :  { %4635 = vmatpush1.bf16.msra.mxu1 %v4634_v31  ;;  %4381 = vmatprep.subr.bf16.mxu0 %v4380_v33  ;;  %v1129_v31 = vld [vmem:[#allocation8 + $0xd20] sm:$0xff]  ;;  %v1204_v23 = vld [vmem:[#allocation8 + $0xf78] sm:$0xff] }
 0x2b4   :  { %4637 = vmatprep.subr.bf16.mxu1 %v4636_v44  ;;  %v1137_v33 = vld [vmem:[#allocation8 + $0xd60] sm:$0xff]  ;;  %v1146_v44 = vld [vmem:[#allocation8 + $0xda8] sm:$0xff] }
 0x2b5   :  { %v4398_v48 = vpack.c.bf16 %v1137_v33, %v1129_v31  ;;  %v1195_v31 = vld [vmem:[#allocation8 + $0xf30] sm:$0xff]  ;;  %v4668_v33 = vpack.c.bf16 %v1204_v23, %v1196_v22 }
 0x2b6   :  { %4383 = vmatpush1.bf16.msra.mxu0 %v4382_v51  ;;  %v4400_v51 = vpack.c.bf16 %v1154_v45, %v1146_v44  ;;  %v1212_v44 = vld [vmem:[#allocation8 + $0xfb8] sm:$0xff]  ;;  %v4670_v47 = vpack.c.bf16 %v1203_v39, %v1195_v31  ;;  %v1267_v31 = vld [vmem:[#allocation8 + $0x1170] sm:$0xff]  ;;  %v1282_v39 = vld [vmem:[#allocation8 + $0x11e8] sm:$0xff] }
 0x2b7   :  { %4639 = vmatpush1.bf16.msra.mxu1 %v4638_v37  ;;  %4385 = vmatprep.subr.bf16.mxu0 %v4384_v52  ;;  %v1145_v37 = vld [vmem:[#allocation8 + $0xda0] sm:$0xff]  ;;  %v1220_v45 = vld [vmem:[#allocation8 + $0xff8] sm:$0xff] }
 0x2b8   :  { %4641 = vmatprep.subr.bf16.mxu1 %v4640_v32  ;;  %v1153_v52 = vld [vmem:[#allocation8 + $0xde0] sm:$0xff]  ;;  %v1162_v32 = vld [vmem:[#allocation8 + $0xe28] sm:$0xff] }
 0x2b9   :  { %v4402_v59 = vpack.c.bf16 %v1153_v52, %v1145_v37  ;;  %v1211_v37 = vld [vmem:[#allocation8 + $0xfb0] sm:$0xff]  ;;  %v4672_v52 = vpack.c.bf16 %v1220_v45, %v1212_v44 }
 0x2ba   :  { %4387 = vmatpush1.bf16.msra.mxu0 %v4386_v61  ;;  %v4404_v61 = vpack.c.bf16 %v1170_v57, %v1162_v32  ;;  %v1228_v32 = vld [vmem:[#allocation8 + $0x1038] sm:$0xff]  ;;  %v4674_v55 = vpack.c.bf16 %v1219_v53, %v1211_v37  ;;  %v1298_v37 = vld [vmem:[#allocation8 + $0x1268] sm:$0xff] }
 0x2bb   :  { %4643 = vmatpush1.bf16.msra.mxu1 %v4642_v62  ;;  %4389 = vmatprep.subr.bf16.mxu0 %v4388_v0  ;;  %v1161_v62 = vld [vmem:[#allocation8 + $0xe20] sm:$0xff]  ;;  %v1236_v57 = vld [vmem:[#allocation8 + $0x1078] sm:$0xff] }
 0x2bc   :  { %4645 = vmatprep.subr.bf16.mxu1 %v4644_v4  ;;  %v1169_v0 = vld [vmem:[#allocation8 + $0xe60] sm:$0xff]  ;;  %v1178_v4 = vld [vmem:[#allocation8 + $0xea8] sm:$0xff]  ;;  %v1300_v53 = vld [vmem:[#allocation8 + $0x1278] sm:$0xff] }
 0x2bd   :  { %v4406_v63 = vpack.c.bf16 %v1169_v0, %v1161_v62  ;;  %v4676_v62 = vpack.c.bf16 %v1236_v57, %v1228_v32  ;;  %v1227_v0 = vld [vmem:[#allocation8 + $0x1030] sm:$0xff]  ;;  %v1289_v57 = vld [vmem:[#allocation8 + $0x1220] sm:$0xff] }
 0x2be   :  { %4391 = vmatpush1.bf16.msra.mxu0 %v4390_v38  ;;  %v4408_v38 = vpack.c.bf16 %v1186_v35, %v1178_v4  ;;  %v1244_v35 = vld [vmem:[#allocation8 + $0x10b8] sm:$0xff]  ;;  %v4678_v6 = vpack.c.bf16 %v1235_v1, %v1227_v0 }
 0x2bf   :  { %4647 = vmatpush1.bf16.msra.mxu1 %v4646_v9  ;;  %4393 = vmatprep.subr.bf16.mxu0 %v4392_v10  ;;  %v1177_v9 = vld [vmem:[#allocation8 + $0xea0] sm:$0xff]  ;;  %v4680_v20 = vpack.c.bf16 %v1252_v5, %v1244_v35  ;;  %v1308_v0 = vld [vmem:[#allocation8 + $0x12b8] sm:$0xff] }
 0x2c0   :  { %4649 = vmatprep.subr.bf16.mxu1 %v4648_v42  ;;  %v1185_v10 = vld [vmem:[#allocation8 + $0xee0] sm:$0xff]  ;;  %v1194_v42 = vld [vmem:[#allocation8 + $0xf28] sm:$0xff]  ;;  %v1316_v1 = vld [vmem:[#allocation8 + $0x12f8] sm:$0xff] }
 0x2c1   :  { %v4410_v21 = vpack.c.bf16 %v1185_v10, %v1177_v9  ;;  %v1251_v10 = vld [vmem:[#allocation8 + $0x10f0] sm:$0xff]  ;;  %v1305_v35 = vld [vmem:[#allocation8 + $0x12a0] sm:$0xff] }
 0x2c2   :  { %4395 = vmatpush1.bf16.msra.mxu0 %v4394_v28  ;;  %v4412_v28 = vpack.c.bf16 %v1202_v19, %v1194_v42  ;;  %v1260_v42 = vld [vmem:[#allocation8 + $0x1138] sm:$0xff]  ;;  %v1313_v5 = vld [vmem:[#allocation8 + $0x12e0] sm:$0xff] }
 0x2c3   :  { %4651 = vmatpush1.bf16.msra.mxu1 %v4650_v29  ;;  %4397 = vmatprep.subr.bf16.mxu0 %v4396_v30  ;;  %v1193_v29 = vld [vmem:[#allocation8 + $0xf20] sm:$0xff]  ;;  %v1268_v19 = vld [vmem:[#allocation8 + $0x1178] sm:$0xff] }
 0x2c4   :  { %4653 = vmatprep.subr.bf16.mxu1 %v4652_v41  ;;  %v1201_v30 = vld [vmem:[#allocation8 + $0xf60] sm:$0xff]  ;;  %v1210_v41 = vld [vmem:[#allocation8 + $0xfa8] sm:$0xff] }
 0x2c5   :  { %v4414_v46 = vpack.c.bf16 %v1201_v30, %v1193_v29  ;;  %v1259_v29 = vld [vmem:[#allocation8 + $0x1130] sm:$0xff]  ;;  %v4684_v30 = vpack.c.bf16 %v1268_v19, %v1260_v42  ;;  %v1321_v19 = vld [vmem:[#allocation8 + $0x1320] sm:$0xff] }
 0x2c6   :  { %4399 = vmatpush1.bf16.msra.mxu0 %v4398_v48  ;;  %v4416_v48 = vpack.c.bf16 %v1218_v43, %v1210_v41  ;;  %v1276_v41 = vld [vmem:[#allocation8 + $0x11b8] sm:$0xff]  ;;  %v4686_v44 = vpack.c.bf16 %v1267_v31, %v1259_v29  ;;  %v1346_v29 = vld [vmem:[#allocation8 + $0x13e8] sm:$0xff] }
 0x2c7   :  { %4655 = vmatpush1.bf16.msra.mxu1 %v4654_v50  ;;  %4401 = vmatprep.subr.bf16.mxu0 %v4400_v51  ;;  %v1209_v50 = vld [vmem:[#allocation8 + $0xfa0] sm:$0xff]  ;;  %v1348_v31 = vld [vmem:[#allocation8 + $0x13f8] sm:$0xff] }
 0x2c8   :  { %4657 = vmatprep.subr.bf16.mxu1 %v4656_v54  ;;  %v1217_v51 = vld [vmem:[#allocation8 + $0xfe0] sm:$0xff]  ;;  %v1226_v54 = vld [vmem:[#allocation8 + $0x1028] sm:$0xff] }
 0x2c9   :  { %v4418_v58 = vpack.c.bf16 %v1217_v51, %v1209_v50  ;;  %v1290_v51 = vld [vmem:[#allocation8 + $0x1228] sm:$0xff] }
 0x2ca   :  { %4403 = vmatpush1.bf16.msra.mxu0 %v4402_v59  ;;  %v4420_v59 = vpack.c.bf16 %v1234_v56, %v1226_v54  ;;  %v4436_v32 = vpack.c.bf16 %v1298_v37, %v1290_v51 }
 0x2cb   :  { %4659 = vmatpush1.bf16.msra.mxu1 %v4658_v60  ;;  %4405 = vmatprep.subr.bf16.mxu0 %v4404_v61  ;;  %v1225_v60 = vld [vmem:[#allocation8 + $0x1020] sm:$0xff] }
 0x2cc   :  { %4661 = vmatprep.subr.bf16.mxu1 %v4660_v2  ;;  %v1233_v61 = vld [vmem:[#allocation8 + $0x1060] sm:$0xff]  ;;  %v1242_v2 = vld [vmem:[#allocation8 + $0x10a8] sm:$0xff] }
 0x2cd   :  { %v4422_v4 = vpack.c.bf16 %v1233_v61, %v1225_v60  ;;  %v4424_v9 = vpack.c.bf16 %v1250_v3, %v1242_v2  ;;  %v1299_v60 = vld [vmem:[#allocation8 + $0x1270] sm:$0xff]  ;;  %v1306_v61 = vld [vmem:[#allocation8 + $0x12a8] sm:$0xff] }
 0x2ce   :  { %4407 = vmatpush1.bf16.msra.mxu0 %v4406_v63  ;;  %v1241_v63 = vld [vmem:[#allocation8 + $0x10a0] sm:$0xff] }
 0x2cf   :  { %4663 = vmatpush1.bf16.msra.mxu1 %v4662_v7  ;;  %4409 = vmatprep.subr.bf16.mxu0 %v4408_v38  ;;  %v1249_v7 = vld [vmem:[#allocation8 + $0x10e0] sm:$0xff]  ;;  %v1243_v38 = vld [vmem:[#allocation8 + $0x10b0] sm:$0xff] }
 0x2d0   :  { %4665 = vmatprep.subr.bf16.mxu1 %v4664_v13  ;;  %v1266_v13 = vld [vmem:[#allocation8 + $0x1168] sm:$0xff]  ;;  %v4426_v22 = vpack.c.bf16 %v1249_v7, %v1241_v63  ;;  %v4682_v23 = vpack.c.bf16 %v1251_v10, %v1243_v38  ;;  %v4696_v63 = vpack.c.bf16 %v1316_v1, %v1308_v0  ;;  %v1315_v7 = vld [vmem:[#allocation8 + $0x12f0] sm:$0xff]  ;;  %v1324_v10 = vld [vmem:[#allocation8 + $0x1338] sm:$0xff] }
 0x2d1   :  { %v1322_v38 = vld [vmem:[#allocation8 + $0x1328] sm:$0xff]  ;;  %v1369_v1 = vld [vmem:[#allocation8 + $0x14a0] sm:$0xff] }
 0x2d2   :  { %4411 = vmatpush1.bf16.msra.mxu0 %v4410_v21  ;;  %v4428_v21 = vpack.c.bf16 %v1266_v13, %v1258_v11  ;;  %v1332_v11 = vld [vmem:[#allocation8 + $0x1378] sm:$0xff]  ;;  %v4442_v13 = vpack.c.bf16 %v1313_v5, %v1305_v35  ;;  %v1379_v35 = vld [vmem:[#allocation8 + $0x14f0] sm:$0xff]  ;;  %v1386_v5 = vld [vmem:[#allocation8 + $0x1528] sm:$0xff] }
 0x2d3   :  { %4667 = vmatpush1.bf16.msra.mxu1 %v4666_v27  ;;  %4413 = vmatprep.subr.bf16.mxu0 %v4412_v28  ;;  %v1257_v27 = vld [vmem:[#allocation8 + $0x1120] sm:$0xff] }
 0x2d4   :  { %4669 = vmatprep.subr.bf16.mxu1 %v4668_v33  ;;  %v1265_v28 = vld [vmem:[#allocation8 + $0x1160] sm:$0xff]  ;;  %v1274_v33 = vld [vmem:[#allocation8 + $0x11a8] sm:$0xff] }
 0x2d5   :  { %v4430_v43 = vpack.c.bf16 %v1265_v28, %v1257_v27  ;;  %v4432_v45 = vpack.c.bf16 %v1282_v39, %v1274_v33  ;;  %v1331_v27 = vld [vmem:[#allocation8 + $0x1370] sm:$0xff]  ;;  %v1338_v28 = vld [vmem:[#allocation8 + $0x13a8] sm:$0xff] }
 0x2d6   :  { %4415 = vmatpush1.bf16.msra.mxu0 %v4414_v46  ;;  %v1273_v46 = vld [vmem:[#allocation8 + $0x11a0] sm:$0xff] }
 0x2d7   :  { %4671 = vmatpush1.bf16.msra.mxu1 %v4670_v47  ;;  %4417 = vmatprep.subr.bf16.mxu0 %v4416_v48  ;;  %v1281_v47 = vld [vmem:[#allocation8 + $0x11e0] sm:$0xff]  ;;  %v1275_v48 = vld [vmem:[#allocation8 + $0x11b0] sm:$0xff] }
 0x2d8   :  { %4673 = vmatprep.subr.bf16.mxu1 %v4672_v52  ;;  %v1292_v52 = vld [vmem:[#allocation8 + $0x1238] sm:$0xff]  ;;  %v4434_v54 = vpack.c.bf16 %v1281_v47, %v1273_v46  ;;  %v1347_v46 = vld [vmem:[#allocation8 + $0x13f0] sm:$0xff]  ;;  %v1354_v47 = vld [vmem:[#allocation8 + $0x1428] sm:$0xff] }
 0x2da   :  { %4419 = vmatpush1.bf16.msra.mxu0 %v4418_v58  ;;  %v1297_v58 = vld [vmem:[#allocation8 + $0x1260] sm:$0xff] }
 0x2db   :  { %4675 = vmatpush1.bf16.msra.mxu1 %v4674_v55  ;;  %4421 = vmatprep.subr.bf16.mxu0 %v4420_v59  ;;  %v1291_v55 = vld [vmem:[#allocation8 + $0x1230] sm:$0xff]  ;;  %v4692_v59 = vpack.c.bf16 %v1300_v53, %v1292_v52  ;;  %v4438_v2 = vpack.c.bf16 %v1297_v58, %v1289_v57  ;;  %v1353_v53 = vld [vmem:[#allocation8 + $0x1420] sm:$0xff]  ;;  %v1370_v58 = vld [vmem:[#allocation8 + $0x14a8] sm:$0xff] }
 0x2dc   :  { %4677 = vmatprep.subr.bf16.mxu1 %v4676_v62  ;;  %v1314_v62 = vld [vmem:[#allocation8 + $0x12e8] sm:$0xff]  ;;  %v4694_v3 = vpack.c.bf16 %v1299_v60, %v1291_v55  ;;  %v1363_v57 = vld [vmem:[#allocation8 + $0x1470] sm:$0xff]  ;;  %v1380_v60 = vld [vmem:[#allocation8 + $0x14f8] sm:$0xff] }
 0x2dd   :  { %2479 = vmatmul.mubr.f32.vlgmr.msra.gmra.mrb[6].mxu0 %v5389_v8  ;;  %v1378_v55 = vld [vmem:[#allocation8 + $0x14e8] sm:$0xff] }
 0x2de   :  { %2763 = vmatmul.mubr.f32.vlgmr.msra.gmra.mrb[6].mxu1 %v5389_v8  ;;  %4423 = vmatpush1.bf16.msra.mxu0 %v4422_v4  ;;  %v1284_v8 = vld [vmem:[#allocation8 + $0x11f8] sm:$0xff]  ;;  %v4440_v4 = vpack.c.bf16 %v1314_v62, %v1306_v61  ;;  %v4456_v0 = vpack.c.bf16 %v1378_v55, %v1370_v58 }
 0x2df   :  { %2549 = vmatprep.mubr.f32.mxu0 %v5391_v25  ;;  %4679 = vmatpush1.bf16.msra.mxu1 %v4678_v6  ;;  %v4688_v50 = vpack.c.bf16 %v1284_v8, %v1276_v41  ;;  %v1307_v6 = vld [vmem:[#allocation8 + $0x12b0] sm:$0xff]  ;;  %v4448_v41 = vpack.c.bf16 %v1346_v29, %v1338_v28  ;;  %v1337_v8 = vld [vmem:[#allocation8 + $0x13a0] sm:$0xff] }
 0x2e0   :  { %2833 = vmatprep.mubr.f32.mxu1 %v5391_v25  ;;  %4425 = vmatprep.subr.bf16.mxu0 %v4424_v9  ;;  %v1283_v25 = vld [vmem:[#allocation8 + $0x11f0] sm:$0xff]  ;;  %v1330_v9 = vld [vmem:[#allocation8 + $0x1368] sm:$0xff] }
 0x2e1   :  { %4681 = vmatprep.subr.bf16.mxu1 %v4680_v20  ;;  %v4690_v56 = vpack.c.bf16 %v1283_v25, %v1275_v48  ;;  %v4698_v20 = vpack.c.bf16 %v1315_v7, %v1307_v6  ;;  %v4444_v42 = vpack.c.bf16 %v1330_v9, %v1322_v38  ;;  %v1362_v48 = vld [vmem:[#allocation8 + $0x1468] sm:$0xff]  ;;  %v1364_v25 = vld [vmem:[#allocation8 + $0x1478] sm:$0xff] }
 0x2e2   :  { %4427 = vmatpush1.bf16.msra.mxu0 %v4426_v22  ;;  %v1329_v22 = vld [vmem:[#allocation8 + $0x1360] sm:$0xff]  ;;  %v4452_v52 = vpack.c.bf16 %v1362_v48, %v1354_v47  ;;  %v1394_v6 = vld [vmem:[#allocation8 + $0x1568] sm:$0xff]  ;;  %v1396_v7 = vld [vmem:[#allocation8 + $0x1578] sm:$0xff] }
 0x2e3   :  { %4683 = vmatpush1.bf16.msra.mxu1 %v4682_v23  ;;  %4429 = vmatprep.subr.bf16.mxu0 %v4428_v21  ;;  %v1323_v23 = vld [vmem:[#allocation8 + $0x1330] sm:$0xff]  ;;  %v4700_v21 = vpack.c.bf16 %v1332_v11, %v1324_v10  ;;  %v4446_v33 = vpack.c.bf16 %v1329_v22, %v1321_v19  ;;  %v4460_v10 = vpack.c.bf16 %v1394_v6, %v1386_v5  ;;  %v1385_v11 = vld [vmem:[#allocation8 + $0x1520] sm:$0xff]  ;;  %v1402_v22 = vld [vmem:[#allocation8 + $0x15a8] sm:$0xff] }
 0x2e4   :  { %4685 = vmatprep.subr.bf16.mxu1 %v4684_v30  ;;  %v1340_v30 = vld [vmem:[#allocation8 + $0x13b8] sm:$0xff]  ;;  %v4702_v39 = vpack.c.bf16 %v1331_v27, %v1323_v23  ;;  %v1395_v19 = vld [vmem:[#allocation8 + $0x1570] sm:$0xff]  ;;  %v1410_v23 = vld [vmem:[#allocation8 + $0x15e8] sm:$0xff] }
 0x2e5   :  { %v1412_v27 = vld [vmem:[#allocation8 + $0x15f8] sm:$0xff] }
 0x2e6   :  { %4431 = vmatpush1.bf16.msra.mxu0 %v4430_v43  ;;  %v1345_v43 = vld [vmem:[#allocation8 + $0x13e0] sm:$0xff] }
 0x2e7   :  { %4687 = vmatpush1.bf16.msra.mxu1 %v4686_v44  ;;  %4433 = vmatprep.subr.bf16.mxu0 %v4432_v45  ;;  %v1339_v44 = vld [vmem:[#allocation8 + $0x13b0] sm:$0xff]  ;;  %v4704_v45 = vpack.c.bf16 %v1348_v31, %v1340_v30  ;;  %v4450_v51 = vpack.c.bf16 %v1345_v43, %v1337_v8  ;;  %v4464_v30 = vpack.c.bf16 %v1410_v23, %v1402_v22  ;;  %v1401_v31 = vld [vmem:[#allocation8 + $0x15a0] sm:$0xff]  ;;  %v1418_v43 = vld [vmem:[#allocation8 + $0x1628] sm:$0xff] }
 0x2e8   :  { %4689 = vmatprep.subr.bf16.mxu1 %v4688_v50  ;;  %v1356_v50 = vld [vmem:[#allocation8 + $0x1438] sm:$0xff]  ;;  %v4706_v37 = vpack.c.bf16 %v1347_v46, %v1339_v44  ;;  %v1411_v8 = vld [vmem:[#allocation8 + $0x15f0] sm:$0xff]  ;;  %v1426_v44 = vld [vmem:[#allocation8 + $0x1668] sm:$0xff] }
 0x2e9   :  { %v1428_v46 = vld [vmem:[#allocation8 + $0x1678] sm:$0xff] }
 0x2ea   :  { %4435 = vmatpush1.bf16.msra.mxu0 %v4434_v54  ;;  %v1361_v54 = vld [vmem:[#allocation8 + $0x1460] sm:$0xff] }
 0x2eb   :  { %4691 = vmatpush1.bf16.msra.mxu1 %v4690_v56  ;;  %4437 = vmatprep.subr.bf16.mxu0 %v4436_v32  ;;  %v1355_v56 = vld [vmem:[#allocation8 + $0x1430] sm:$0xff]  ;;  %v4708_v32 = vpack.c.bf16 %v1364_v25, %v1356_v50  ;;  %v4454_v61 = vpack.c.bf16 %v1361_v54, %v1353_v53  ;;  %v4468_v50 = vpack.c.bf16 %v1426_v44, %v1418_v43  ;;  %v1417_v25 = vld [vmem:[#allocation8 + $0x1620] sm:$0xff]  ;;  %v1434_v54 = vld [vmem:[#allocation8 + $0x16a8] sm:$0xff] }
 0x2ec   :  { %4693 = vmatprep.subr.bf16.mxu1 %v4692_v59  ;;  %v1372_v59 = vld [vmem:[#allocation8 + $0x14b8] sm:$0xff]  ;;  %v4710_v62 = vpack.c.bf16 %v1363_v57, %v1355_v56  ;;  %v1427_v53 = vld [vmem:[#allocation8 + $0x1670] sm:$0xff]  ;;  %v1442_v56 = vld [vmem:[#allocation8 + $0x16e8] sm:$0xff] }
 0x2ed   :  { %v1444_v57 = vld [vmem:[#allocation8 + $0x16f8] sm:$0xff] }
 0x2ee   :  { %4439 = vmatpush1.bf16.msra.mxu0 %v4438_v2  ;;  %v1377_v2 = vld [vmem:[#allocation8 + $0x14e0] sm:$0xff] }
 0x2ef   :  { %4695 = vmatpush1.bf16.msra.mxu1 %v4694_v3  ;;  %4441 = vmatprep.subr.bf16.mxu0 %v4440_v4  ;;  %v1371_v3 = vld [vmem:[#allocation8 + $0x14b0] sm:$0xff]  ;;  %v4712_v4 = vpack.c.bf16 %v1380_v60, %v1372_v59  ;;  %v4458_v38 = vpack.c.bf16 %v1377_v2, %v1369_v1  ;;  %v4472_v59 = vpack.c.bf16 %v1442_v56, %v1434_v54  ;;  %v1433_v60 = vld [vmem:[#allocation8 + $0x16a0] sm:$0xff]  ;;  %v1450_v2 = vld [vmem:[#allocation8 + $0x1728] sm:$0xff] }
 0x2f0   :  { %4697 = vmatprep.subr.bf16.mxu1 %v4696_v63  ;;  %v1388_v63 = vld [vmem:[#allocation8 + $0x1538] sm:$0xff]  ;;  %v4714_v9 = vpack.c.bf16 %v1379_v35, %v1371_v3  ;;  %v1443_v1 = vld [vmem:[#allocation8 + $0x16f0] sm:$0xff]  ;;  %v1458_v3 = vld [vmem:[#allocation8 + $0x1768] sm:$0xff] }
 0x2f1   :  { %v1460_v35 = vld [vmem:[#allocation8 + $0x1778] sm:$0xff] }
 0x2f2   :  { %4443 = vmatpush1.bf16.msra.mxu0 %v4442_v13  ;;  %v1393_v13 = vld [vmem:[#allocation8 + $0x1560] sm:$0xff]  ;;  %v1508_v54 = vld [vmem:[#allocation8 + $0x18f8] sm:$0xff] }
 0x2f3   :  { %4699 = vmatpush1.bf16.msra.mxu1 %v4698_v20  ;;  %4445 = vmatprep.subr.bf16.mxu0 %v4444_v42  ;;  %v1387_v20 = vld [vmem:[#allocation8 + $0x1530] sm:$0xff]  ;;  %v4716_v42 = vpack.c.bf16 %v1396_v7, %v1388_v63  ;;  %v4462_v28 = vpack.c.bf16 %v1393_v13, %v1385_v11  ;;  %v4476_v63 = vpack.c.bf16 %v1458_v3, %v1450_v2  ;;  %v1449_v7 = vld [vmem:[#allocation8 + $0x1720] sm:$0xff]  ;;  %v1466_v13 = vld [vmem:[#allocation8 + $0x17a8] sm:$0xff] }
 0x2f4   :  { %4701 = vmatprep.subr.bf16.mxu1 %v4700_v21  ;;  %v1404_v21 = vld [vmem:[#allocation8 + $0x15b8] sm:$0xff]  ;;  %v4718_v29 = vpack.c.bf16 %v1395_v19, %v1387_v20  ;;  %v1459_v11 = vld [vmem:[#allocation8 + $0x1770] sm:$0xff]  ;;  %v1474_v20 = vld [vmem:[#allocation8 + $0x17e8] sm:$0xff] }
 0x2f5   :  { %v1476_v19 = vld [vmem:[#allocation8 + $0x17f8] sm:$0xff] }
 0x2f6   :  { %4447 = vmatpush1.bf16.msra.mxu0 %v4446_v33  ;;  %v1409_v33 = vld [vmem:[#allocation8 + $0x15e0] sm:$0xff] }
 0x2f7   :  { %4703 = vmatpush1.bf16.msra.mxu1 %v4702_v39  ;;  %4449 = vmatprep.subr.bf16.mxu0 %v4448_v41  ;;  %v1403_v39 = vld [vmem:[#allocation8 + $0x15b0] sm:$0xff]  ;;  %v4720_v41 = vpack.c.bf16 %v1412_v27, %v1404_v21  ;;  %v4466_v47 = vpack.c.bf16 %v1409_v33, %v1401_v31  ;;  %v4480_v21 = vpack.c.bf16 %v1474_v20, %v1466_v13  ;;  %v1465_v27 = vld [vmem:[#allocation8 + $0x17a0] sm:$0xff]  ;;  %v1482_v33 = vld [vmem:[#allocation8 + $0x1828] sm:$0xff] }
 0x2f8   :  { %4705 = vmatprep.subr.bf16.mxu1 %v4704_v45  ;;  %v1420_v45 = vld [vmem:[#allocation8 + $0x1638] sm:$0xff]  ;;  %v4722_v48 = vpack.c.bf16 %v1411_v8, %v1403_v39  ;;  %v1475_v31 = vld [vmem:[#allocation8 + $0x17f0] sm:$0xff]  ;;  %v1490_v39 = vld [vmem:[#allocation8 + $0x1868] sm:$0xff] }
 0x2f9   :  { %v1492_v8 = vld [vmem:[#allocation8 + $0x1878] sm:$0xff] }
 0x2fa   :  { %4451 = vmatpush1.bf16.msra.mxu0 %v4450_v51  ;;  %v1425_v51 = vld [vmem:[#allocation8 + $0x1660] sm:$0xff] }
 0x2fb   :  { %4707 = vmatpush1.bf16.msra.mxu1 %v4706_v37  ;;  %4453 = vmatprep.subr.bf16.mxu0 %v4452_v52  ;;  %v1419_v37 = vld [vmem:[#allocation8 + $0x1630] sm:$0xff]  ;;  %v4724_v52 = vpack.c.bf16 %v1428_v46, %v1420_v45  ;;  %v4470_v58 = vpack.c.bf16 %v1425_v51, %v1417_v25  ;;  %v4484_v45 = vpack.c.bf16 %v1490_v39, %v1482_v33  ;;  %v1481_v46 = vld [vmem:[#allocation8 + $0x1820] sm:$0xff]  ;;  %v1498_v51 = vld [vmem:[#allocation8 + $0x18a8] sm:$0xff] }
 0x2fc   :  { %4709 = vmatprep.subr.bf16.mxu1 %v4708_v32  ;;  %v1436_v32 = vld [vmem:[#allocation8 + $0x16b8] sm:$0xff]  ;;  %v4726_v55 = vpack.c.bf16 %v1427_v53, %v1419_v37  ;;  %v1491_v25 = vld [vmem:[#allocation8 + $0x1870] sm:$0xff]  ;;  %v1506_v37 = vld [vmem:[#allocation8 + $0x18e8] sm:$0xff] }
 0x2fd   :  { %v1500_v53 = vld [vmem:[#allocation8 + $0x18b8] sm:$0xff]  ;;  %v1545_v39 = vld [vmem:[#allocation8 + $0x1a20] sm:$0xff] }
 0x2fe   :  { %4455 = vmatpush1.bf16.msra.mxu0 %v4454_v61  ;;  %v1441_v61 = vld [vmem:[#allocation8 + $0x16e0] sm:$0xff] }
 0x2ff   :  { %4711 = vmatpush1.bf16.msra.mxu1 %v4710_v62  ;;  %4457 = vmatprep.subr.bf16.mxu0 %v4456_v0  ;;  %v1435_v62 = vld [vmem:[#allocation8 + $0x16b0] sm:$0xff]  ;;  %v4728_v0 = vpack.c.bf16 %v1444_v57, %v1436_v32  ;;  %v4474_v5 = vpack.c.bf16 %v1441_v61, %v1433_v60  ;;  %v1497_v32 = vld [vmem:[#allocation8 + $0x18a0] sm:$0xff]  ;;  %v1514_v60 = vld [vmem:[#allocation8 + $0x1928] sm:$0xff] }
 0x300   :  { %4713 = vmatprep.subr.bf16.mxu1 %v4712_v4  ;;  %v1452_v4 = vld [vmem:[#allocation8 + $0x1738] sm:$0xff]  ;;  %v4730_v6 = vpack.c.bf16 %v1443_v1, %v1435_v62  ;;  %v1505_v57 = vld [vmem:[#allocation8 + $0x18e0] sm:$0xff]  ;;  %v1522_v61 = vld [vmem:[#allocation8 + $0x1968] sm:$0xff]  ;;  %v4744_v62 = vpack.c.bf16 %v1508_v54, %v1500_v53 }
 0x301   :  { %v1524_v1 = vld [vmem:[#allocation8 + $0x1978] sm:$0xff]  ;;  %v4490_v2 = vpack.c.bf16 %v1505_v57, %v1497_v32  ;;  %v1563_v53 = vld [vmem:[#allocation8 + $0x1ab0] sm:$0xff]  ;;  %v1578_v32 = vld [vmem:[#allocation8 + $0x1b28] sm:$0xff] }
 0x302   :  { %4459 = vmatpush1.bf16.msra.mxu0 %v4458_v38  ;;  %v1457_v38 = vld [vmem:[#allocation8 + $0x1760] sm:$0xff]  ;;  %v1586_v57 = vld [vmem:[#allocation8 + $0x1b68] sm:$0xff] }
 0x303   :  { %4715 = vmatpush1.bf16.msra.mxu1 %v4714_v9  ;;  %4461 = vmatprep.subr.bf16.mxu0 %v4460_v10  ;;  %v1451_v9 = vld [vmem:[#allocation8 + $0x1730] sm:$0xff]  ;;  %v4732_v10 = vpack.c.bf16 %v1460_v35, %v1452_v4  ;;  %v4478_v22 = vpack.c.bf16 %v1457_v38, %v1449_v7  ;;  %v4492_v4 = vpack.c.bf16 %v1522_v61, %v1514_v60  ;;  %v1513_v35 = vld [vmem:[#allocation8 + $0x1920] sm:$0xff]  ;;  %v1530_v38 = vld [vmem:[#allocation8 + $0x19a8] sm:$0xff] }
 0x304   :  { %4717 = vmatprep.subr.bf16.mxu1 %v4716_v42  ;;  %v1468_v42 = vld [vmem:[#allocation8 + $0x17b8] sm:$0xff]  ;;  %v4734_v23 = vpack.c.bf16 %v1459_v11, %v1451_v9  ;;  %v1523_v7 = vld [vmem:[#allocation8 + $0x1970] sm:$0xff]  ;;  %v1538_v9 = vld [vmem:[#allocation8 + $0x19e8] sm:$0xff]  ;;  %v4508_v61 = vpack.c.bf16 %v1586_v57, %v1578_v32 }
 0x305   :  { %v4496_v20 = vpack.c.bf16 %v1538_v9, %v1530_v38  ;;  %v1596_v38 = vld [vmem:[#allocation8 + $0x1bb8] sm:$0xff] }
 0x306   :  { %4463 = vmatpush1.bf16.msra.mxu0 %v4462_v28  ;;  %v1473_v28 = vld [vmem:[#allocation8 + $0x17e0] sm:$0xff]  ;;  %v1604_v9 = vld [vmem:[#allocation8 + $0x1bf8] sm:$0xff] }
 0x307   :  { %4719 = vmatpush1.bf16.msra.mxu1 %v4718_v29  ;;  %4465 = vmatprep.subr.bf16.mxu0 %v4464_v30  ;;  %v1467_v29 = vld [vmem:[#allocation8 + $0x17b0] sm:$0xff]  ;;  %v4736_v30 = vpack.c.bf16 %v1476_v19, %v1468_v42  ;;  %v4482_v43 = vpack.c.bf16 %v1473_v28, %v1465_v27  ;;  %v1529_v42 = vld [vmem:[#allocation8 + $0x19a0] sm:$0xff]  ;;  %v1554_v27 = vld [vmem:[#allocation8 + $0x1a68] sm:$0xff] }
 0x308   :  { %4721 = vmatprep.subr.bf16.mxu1 %v4720_v41  ;;  %v1484_v41 = vld [vmem:[#allocation8 + $0x1838] sm:$0xff]  ;;  %v4738_v44 = vpack.c.bf16 %v1475_v31, %v1467_v29  ;;  %v1537_v19 = vld [vmem:[#allocation8 + $0x19e0] sm:$0xff] }
 0x309   :  { %v1548_v28 = vld [vmem:[#allocation8 + $0x1a38] sm:$0xff] }
 0x30a   :  { %4467 = vmatpush1.bf16.msra.mxu0 %v4466_v47  ;;  %v1489_v47 = vld [vmem:[#allocation8 + $0x1860] sm:$0xff]  ;;  %v1556_v29 = vld [vmem:[#allocation8 + $0x1a78] sm:$0xff] }
 0x30b   :  { %4723 = vmatpush1.bf16.msra.mxu1 %v4722_v48  ;;  %4469 = vmatprep.subr.bf16.mxu0 %v4468_v50  ;;  %v4740_v48 = vpack.c.bf16 %v1492_v8, %v1484_v41  ;;  %v1483_v50 = vld [vmem:[#allocation8 + $0x1830] sm:$0xff]  ;;  %v1553_v41 = vld [vmem:[#allocation8 + $0x1a60] sm:$0xff]  ;;  %v1644_v32 = vld [vmem:[#allocation8 + $0x1d38] sm:$0xff] }
 0x30c   :  { %4725 = vmatprep.subr.bf16.mxu1 %v4724_v52  ;;  %v4486_v52 = vpack.c.bf16 %v1489_v47, %v1481_v46  ;;  %v4742_v56 = vpack.c.bf16 %v1491_v25, %v1483_v50  ;;  %v1547_v8 = vld [vmem:[#allocation8 + $0x1a30] sm:$0xff]  ;;  %v1570_v46 = vld [vmem:[#allocation8 + $0x1ae8] sm:$0xff]  ;;  %v1564_v47 = vld [vmem:[#allocation8 + $0x1ab8] sm:$0xff]  ;;  %v4502_v50 = vpack.c.bf16 %v1553_v41, %v1545_v39 }
 0x30d   :  { %v1611_v39 = vld [vmem:[#allocation8 + $0x1c30] sm:$0xff]  ;;  %v1652_v57 = vld [vmem:[#allocation8 + $0x1d78] sm:$0xff] }
 0x30e   :  { %4471 = vmatpush1.bf16.msra.mxu0 %v4470_v58  ;;  %v1499_v58 = vld [vmem:[#allocation8 + $0x18b0] sm:$0xff] }
 0x30f   :  { %4727 = vmatpush1.bf16.msra.mxu1 %v4726_v55  ;;  %4473 = vmatprep.subr.bf16.mxu0 %v4472_v59  ;;  %v4488_v55 = vpack.c.bf16 %v1506_v37, %v1498_v51  ;;  %v1507_v59 = vld [vmem:[#allocation8 + $0x18f0] sm:$0xff]  ;;  %v1561_v37 = vld [vmem:[#allocation8 + $0x1aa0] sm:$0xff] }
 0x310   :  { %4729 = vmatprep.subr.bf16.mxu1 %v4728_v0  ;;  %v1516_v0 = vld [vmem:[#allocation8 + $0x1938] sm:$0xff]  ;;  %v4746_v3 = vpack.c.bf16 %v1507_v59, %v1499_v58 }
 0x311   :  { %v1580_v58 = vld [vmem:[#allocation8 + $0x1b38] sm:$0xff] }
 0x312   :  { %4475 = vmatpush1.bf16.msra.mxu0 %v4474_v5  ;;  %v1521_v5 = vld [vmem:[#allocation8 + $0x1960] sm:$0xff] }
 0x313   :  { %4731 = vmatpush1.bf16.msra.mxu1 %v4730_v6  ;;  %4477 = vmatprep.subr.bf16.mxu0 %v4476_v63  ;;  %v1515_v6 = vld [vmem:[#allocation8 + $0x1930] sm:$0xff]  ;;  %v4748_v63 = vpack.c.bf16 %v1524_v1, %v1516_v0  ;;  %v4494_v11 = vpack.c.bf16 %v1521_v5, %v1513_v35  ;;  %v1585_v0 = vld [vmem:[#allocation8 + $0x1b60] sm:$0xff]  ;;  %v1594_v5 = vld [vmem:[#allocation8 + $0x1ba8] sm:$0xff] }
 0x314   :  { %4733 = vmatprep.subr.bf16.mxu1 %v4732_v10  ;;  %v1532_v10 = vld [vmem:[#allocation8 + $0x19b8] sm:$0xff]  ;;  %v4750_v13 = vpack.c.bf16 %v1523_v7, %v1515_v6  ;;  %v1579_v1 = vld [vmem:[#allocation8 + $0x1b30] sm:$0xff]  ;;  %v1602_v6 = vld [vmem:[#allocation8 + $0x1be8] sm:$0xff] }
 0x315   :  { %v1587_v35 = vld [vmem:[#allocation8 + $0x1b70] sm:$0xff] }
 0x316   :  { %4479 = vmatpush1.bf16.msra.mxu0 %v4478_v22  ;;  %v1531_v22 = vld [vmem:[#allocation8 + $0x19b0] sm:$0xff] }
 0x317   :  { %4735 = vmatpush1.bf16.msra.mxu1 %v4734_v23  ;;  %4481 = vmatprep.subr.bf16.mxu0 %v4480_v21  ;;  %v1546_v21 = vld [vmem:[#allocation8 + $0x1a28] sm:$0xff] }
 0x318   :  { %4737 = vmatprep.subr.bf16.mxu1 %v4736_v30  ;;  %v4498_v30 = vpack.c.bf16 %v1537_v19, %v1529_v42  ;;  %v4500_v33 = vpack.c.bf16 %v1554_v27, %v1546_v21  ;;  %v1595_v42 = vld [vmem:[#allocation8 + $0x1bb0] sm:$0xff]  ;;  %v4768_v19 = vpack.c.bf16 %v1604_v9, %v1596_v38  ;;  %v1612_v21 = vld [vmem:[#allocation8 + $0x1c38] sm:$0xff] }
 0x319   :  { %v1620_v27 = vld [vmem:[#allocation8 + $0x1c78] sm:$0xff] }
 0x31a   :  { %4483 = vmatpush1.bf16.msra.mxu0 %v4482_v43  ;;  %v4756_v43 = vpack.c.bf16 %v1556_v29, %v1548_v28  ;;  %v4772_v41 = vpack.c.bf16 %v1620_v27, %v1612_v21 }
 0x31b   :  { %4739 = vmatpush1.bf16.msra.mxu1 %v4738_v44  ;;  %4485 = vmatprep.subr.bf16.mxu0 %v4484_v45  ;;  %v1555_v44 = vld [vmem:[#allocation8 + $0x1a70] sm:$0xff]  ;;  %v1562_v45 = vld [vmem:[#allocation8 + $0x1aa8] sm:$0xff] }
 0x31c   :  { %4741 = vmatprep.subr.bf16.mxu1 %v4740_v48  ;;  %v1572_v48 = vld [vmem:[#allocation8 + $0x1af8] sm:$0xff]  ;;  %v4758_v25 = vpack.c.bf16 %v1555_v44, %v1547_v8  ;;  %v4504_v51 = vpack.c.bf16 %v1570_v46, %v1562_v45  ;;  %v1619_v8 = vld [vmem:[#allocation8 + $0x1c70] sm:$0xff]  ;;  %v1634_v44 = vld [vmem:[#allocation8 + $0x1ce8] sm:$0xff] }
 0x31d   :  { %2550 = vmatmul.mubr.f32.vlgmr.msra.gmra.mrb[6].mxu0 %v5413_v17  ;;  %v4760_v54 = vpack.c.bf16 %v1572_v48, %v1564_v47  ;;  %v1628_v45 = vld [vmem:[#allocation8 + $0x1cb8] sm:$0xff]  ;;  %v4774_v48 = vpack.c.bf16 %v1619_v8, %v1611_v39  ;;  %v1683_v39 = vld [vmem:[#allocation8 + $0x1e70] sm:$0xff]  ;;  %v1698_v8 = vld [vmem:[#allocation8 + $0x1ee8] sm:$0xff] }
 0x31e   :  { %2834 = vmatmul.mubr.f32.vlgmr.msra.gmra.mrb[6].mxu1 %v5413_v17  ;;  %4487 = vmatpush1.bf16.msra.mxu0 %v4486_v52  ;;  %v1540_v17 = vld [vmem:[#allocation8 + $0x19f8] sm:$0xff]  ;;  %v1569_v52 = vld [vmem:[#allocation8 + $0x1ae0] sm:$0xff] }
 0x31f   :  { %2620 = vmatprep.mubr.f32.mxu0 %v5415_v26  ;;  %4743 = vmatpush1.bf16.msra.mxu1 %v4742_v56  ;;  %v4752_v23 = vpack.c.bf16 %v1540_v17, %v1532_v10  ;;  %v1571_v56 = vld [vmem:[#allocation8 + $0x1af0] sm:$0xff]  ;;  %v4506_v59 = vpack.c.bf16 %v1569_v52, %v1561_v37  ;;  %v4766_v17 = vpack.c.bf16 %v1587_v35, %v1579_v1  ;;  %v1636_v46 = vld [vmem:[#allocation8 + $0x1cf8] sm:$0xff]  ;;  %v1666_v35 = vld [vmem:[#allocation8 + $0x1de8] sm:$0xff] }
 0x320   :  { %2904 = vmatprep.mubr.f32.mxu1 %v5415_v26  ;;  %4489 = vmatprep.subr.bf16.mxu0 %v4488_v55  ;;  %v1539_v26 = vld [vmem:[#allocation8 + $0x19f0] sm:$0xff]  ;;  %v1588_v55 = vld [vmem:[#allocation8 + $0x1b78] sm:$0xff]  ;;  %v4762_v60 = vpack.c.bf16 %v1571_v56, %v1563_v53  ;;  %v4776_v52 = vpack.c.bf16 %v1636_v46, %v1628_v45  ;;  %v1650_v56 = vld [vmem:[#allocation8 + $0x1d68] sm:$0xff] }
 0x321   :  { %4745 = vmatprep.subr.bf16.mxu1 %v4744_v62  ;;  %v4754_v31 = vpack.c.bf16 %v1539_v26, %v1531_v22  ;;  %v1577_v62 = vld [vmem:[#allocation8 + $0x1b20] sm:$0xff]  ;;  %v1603_v22 = vld [vmem:[#allocation8 + $0x1bf0] sm:$0xff]  ;;  %v1618_v26 = vld [vmem:[#allocation8 + $0x1c68] sm:$0xff] }
 0x322   :  { %4491 = vmatpush1.bf16.msra.mxu0 %v4490_v2  ;;  %v4510_v10 = vpack.c.bf16 %v1585_v0, %v1577_v62  ;;  %v4770_v29 = vpack.c.bf16 %v1603_v22, %v1595_v42  ;;  %v1627_v37 = vld [vmem:[#allocation8 + $0x1cb0] sm:$0xff]  ;;  %v4780_v0 = vpack.c.bf16 %v1652_v57, %v1644_v32  ;;  %v1682_v22 = vld [vmem:[#allocation8 + $0x1e68] sm:$0xff] }
 0x323   :  { %4747 = vmatpush1.bf16.msra.mxu1 %v4746_v3  ;;  %4493 = vmatprep.subr.bf16.mxu0 %v4492_v4  ;;  %v4764_v4 = vpack.c.bf16 %v1588_v55, %v1580_v58  ;;  %v1635_v53 = vld [vmem:[#allocation8 + $0x1cf0] sm:$0xff] }
 0x324   :  { %4749 = vmatprep.subr.bf16.mxu1 %v4748_v63  ;;  %v4778_v55 = vpack.c.bf16 %v1635_v53, %v1627_v37  ;;  %v1643_v62 = vld [vmem:[#allocation8 + $0x1d30] sm:$0xff]  ;;  %v1714_v53 = vld [vmem:[#allocation8 + $0x1f68] sm:$0xff] }
 0x325   :  { %v1651_v1 = vld [vmem:[#allocation8 + $0x1d70] sm:$0xff] }
 0x326   :  { %4495 = vmatpush1.bf16.msra.mxu0 %v4494_v11  ;;  %v4512_v11 = vpack.c.bf16 %v1602_v6, %v1594_v5  ;;  %v1660_v5 = vld [vmem:[#allocation8 + $0x1db8] sm:$0xff]  ;;  %v4782_v9 = vpack.c.bf16 %v1651_v1, %v1643_v62  ;;  %v1667_v42 = vld [vmem:[#allocation8 + $0x1df0] sm:$0xff]  ;;  %v1730_v1 = vld [vmem:[#allocation8 + $0x1fe8] sm:$0xff] }
 0x327   :  { %4751 = vmatpush1.bf16.msra.mxu1 %v4750_v13  ;;  %4497 = vmatprep.subr.bf16.mxu0 %v4496_v20  ;;  %v1593_v13 = vld [vmem:[#allocation8 + $0x1ba0] sm:$0xff]  ;;  %v1668_v6 = vld [vmem:[#allocation8 + $0x1df8] sm:$0xff]  ;;  %v1699_v37 = vld [vmem:[#allocation8 + $0x1ef0] sm:$0xff] }
 0x328   :  { %4753 = vmatprep.subr.bf16.mxu1 %v4752_v23  ;;  %v1601_v20 = vld [vmem:[#allocation8 + $0x1be0] sm:$0xff]  ;;  %v1610_v23 = vld [vmem:[#allocation8 + $0x1c28] sm:$0xff]  ;;  %v1715_v62 = vld [vmem:[#allocation8 + $0x1f70] sm:$0xff] }
 0x329   :  { %v4514_v28 = vpack.c.bf16 %v1601_v20, %v1593_v13  ;;  %v1659_v13 = vld [vmem:[#allocation8 + $0x1db0] sm:$0xff]  ;;  %v4784_v20 = vpack.c.bf16 %v1668_v6, %v1660_v5  ;;  %v5452_v5 = vld [vmem:[#allocation10] sm:$0xff] }
 0x32a   :  { %4499 = vmatpush1.bf16.msra.mxu0 %v4498_v30  ;;  %v4516_v30 = vpack.c.bf16 %v1618_v26, %v1610_v23  ;;  %v1676_v23 = vld [vmem:[#allocation8 + $0x1e38] sm:$0xff]  ;;  %v4786_v27 = vpack.c.bf16 %v1667_v42, %v1659_v13  ;;  %v2935_v42 = vld [vmem:[#allocation11 + $0x80] sm:$0xff] }
 0x32b   :  { %4755 = vmatpush1.bf16.msra.mxu1 %v4754_v31  ;;  %4501 = vmatprep.subr.bf16.mxu0 %v4500_v33  ;;  %v1609_v31 = vld [vmem:[#allocation8 + $0x1c20] sm:$0xff]  ;;  %v1684_v26 = vld [vmem:[#allocation8 + $0x1e78] sm:$0xff] }
 0x32c   :  { %4757 = vmatprep.subr.bf16.mxu1 %v4756_v43  ;;  %v1617_v33 = vld [vmem:[#allocation8 + $0x1c60] sm:$0xff]  ;;  %v1626_v43 = vld [vmem:[#allocation8 + $0x1ca8] sm:$0xff] }
 0x32d   :  { %v4518_v47 = vpack.c.bf16 %v1617_v33, %v1609_v31  ;;  %v1675_v31 = vld [vmem:[#allocation8 + $0x1e30] sm:$0xff]  ;;  %v4788_v33 = vpack.c.bf16 %v1684_v26, %v1676_v23  ;;  %v2967_v23 = vld [vmem:[#allocation11 + $0x180] sm:$0xff] }
 0x32e   :  { %4503 = vmatpush1.bf16.msra.mxu0 %v4502_v50  ;;  %v4520_v50 = vpack.c.bf16 %v1634_v44, %v1626_v43  ;;  %v1692_v43 = vld [vmem:[#allocation8 + $0x1eb8] sm:$0xff]  ;;  %v4790_v46 = vpack.c.bf16 %v1683_v39, %v1675_v31  ;;  %v2968_v26 = vld [vmem:[#allocation11 + $0x188] sm:$0xff]  ;;  %v2951_v39 = vld [vmem:[#allocation11 + $0x100] sm:$0xff] }
 0x32f   :  { %4759 = vmatpush1.bf16.msra.mxu1 %v4758_v25  ;;  %4505 = vmatprep.subr.bf16.mxu0 %v4504_v51  ;;  %v1625_v25 = vld [vmem:[#allocation8 + $0x1ca0] sm:$0xff]  ;;  %v1700_v44 = vld [vmem:[#allocation8 + $0x1ef8] sm:$0xff]  ;;  %v2920_v31 = vld [vmem:[#allocation11 + $0x8] sm:$0xff] }
 0x330   :  { %v5444_v2 = vpop.f32.mrb[4].mxu0  ;;  %v5446_v3 = vpop.f32.mrb[4].mxu1  ;;  %4761 = vmatprep.subr.bf16.mxu1 %v4760_v54  ;;  %v1633_v51 = vld [vmem:[#allocation8 + $0x1ce0] sm:$0xff]  ;;  %v1642_v54 = vld [vmem:[#allocation8 + $0x1d28] sm:$0xff] }
 0x331   :  { %v5448_v63 = vpop.f32.mrb[5].mxu0  ;;  %v5450_v7 = vpop.f32.mrb[5].mxu1  ;;  %v4522_v58 = vpack.c.bf16 %v1633_v51, %v1625_v25  ;;  %v1691_v25 = vld [vmem:[#allocation8 + $0x1eb0] sm:$0xff]  ;;  %v4792_v51 = vpack.c.bf16 %v1700_v44, %v1692_v43  ;;  %v2938_v43 = vld [vmem:[#allocation11 + $0x98] sm:$0xff] }
 0x332   :  { %4507 = vmatpush1.bf16.msra.mxu0 %v4506_v59  ;;  %v4524_v59 = vpack.c.bf16 %v1650_v56, %v1642_v54  ;;  %v1708_v54 = vld [vmem:[#allocation8 + $0x1f38] sm:$0xff]  ;;  %v4794_v57 = vpack.c.bf16 %v1699_v37, %v1691_v25  ;;  %v2954_v37 = vld [vmem:[#allocation11 + $0x118] sm:$0xff] }
 0x333   :  { %4763 = vmatpush1.bf16.msra.mxu1 %v4762_v60  ;;  %4509 = vmatprep.subr.bf16.mxu0 %v4508_v61  ;;  %v1641_v60 = vld [vmem:[#allocation8 + $0x1d20] sm:$0xff]  ;;  %v1716_v56 = vld [vmem:[#allocation8 + $0x1f78] sm:$0xff] }
 0x334   :  { %4765 = vmatprep.subr.bf16.mxu1 %v4764_v4  ;;  %v1649_v61 = vld [vmem:[#allocation8 + $0x1d60] sm:$0xff]  ;;  %v1658_v4 = vld [vmem:[#allocation8 + $0x1da8] sm:$0xff]  ;;  %v2953_v25 = vld [vmem:[#allocation11 + $0x110] sm:$0xff] }
 0x335   :  { %v4526_v38 = vpack.c.bf16 %v1649_v61, %v1641_v60  ;;  %v1707_v60 = vld [vmem:[#allocation8 + $0x1f30] sm:$0xff]  ;;  %v4796_v61 = vpack.c.bf16 %v1716_v56, %v1708_v54 }
 0x336   :  { %4511 = vmatpush1.bf16.msra.mxu0 %v4510_v10  ;;  %v4528_v10 = vpack.c.bf16 %v1666_v35, %v1658_v4  ;;  %v1724_v4 = vld [vmem:[#allocation8 + $0x1fb8] sm:$0xff]  ;;  %v2972_v56 = vld [vmem:[#allocation11 + $0x1a8] sm:$0xff] }
 0x337   :  { %4767 = vmatpush1.bf16.msra.mxu1 %v4766_v17  ;;  %4513 = vmatprep.subr.bf16.mxu0 %v4512_v11  ;;  %v1657_v17 = vld [vmem:[#allocation8 + $0x1da0] sm:$0xff]  ;;  %v1732_v35 = vld [vmem:[#allocation8 + $0x1ff8] sm:$0xff] }
 0x338   :  { %4769 = vmatprep.subr.bf16.mxu1 %v4768_v19  ;;  %v1665_v11 = vld [vmem:[#allocation8 + $0x1de0] sm:$0xff]  ;;  %v1674_v19 = vld [vmem:[#allocation8 + $0x1e28] sm:$0xff]  ;;  %v4800_v13 = vpack.c.bf16 %v1732_v35, %v1724_v4  ;;  %v2973_v35 = vld [vmem:[#allocation11 + $0x1b0] sm:$0xff] }
 0x339   :  { %v4530_v21 = vpack.c.bf16 %v1665_v11, %v1657_v17  ;;  %v1729_v17 = vld [vmem:[#allocation8 + $0x1fe0] sm:$0xff]  ;;  %v1723_v11 = vld [vmem:[#allocation8 + $0x1fb0] sm:$0xff] }
 0x33a   :  { %4515 = vmatpush1.bf16.msra.mxu0 %v4514_v28  ;;  %v4532_v28 = vpack.c.bf16 %v1682_v22, %v1674_v19  ;;  %v2936_v19 = vld [vmem:[#allocation11 + $0x88] sm:$0xff]  ;;  %v1742_v22 = vrot.slane %v5452_v5, %v383_v18  ;;  %v2942_v4 = vld [vmem:[#allocation11 + $0xb8] sm:$0xff] }
 0x33b   :  { %4771 = vmatpush1.bf16.msra.mxu1 %v4770_v29  ;;  %4517 = vmatprep.subr.bf16.mxu0 %v4516_v30  ;;  %v1673_v29 = vld [vmem:[#allocation8 + $0x1e20] sm:$0xff] }
 0x33c   :  { %4773 = vmatprep.subr.bf16.mxu1 %v4772_v41  ;;  %v1681_v30 = vld [vmem:[#allocation8 + $0x1e60] sm:$0xff]  ;;  %v1690_v41 = vld [vmem:[#allocation8 + $0x1ea8] sm:$0xff]  ;;  %v4933_v18 = vadd.f32 %v5448_v63, %v1742_v22 }
 0x33d   :  { %v4534_v45 = vpack.c.bf16 %v1681_v30, %v1673_v29  ;;  %v4804_v29 = vpack.c.bf16 %v2936_v19, %v2935_v42  ;;  %v2919_v30 = vld [vmem:[#allocation11] sm:$0xff]  ;;  %v2944_v19 = vld [vmem:[#allocation11 + $0xc8] sm:$0xff] }
 0x33e   :  { %4519 = vmatpush1.bf16.msra.mxu0 %v4518_v47  ;;  %v4536_v47 = vpack.c.bf16 %v1698_v8, %v1690_v41  ;;  %v2952_v41 = vld [vmem:[#allocation11 + $0x108] sm:$0xff]  ;;  %v2937_v8 = vld [vmem:[#allocation11 + $0x90] sm:$0xff]  ;;  %v2912_v63 = vmax.f32 %v4933_v18, 0.0  ;;  %v2943_v42 = vld [vmem:[#allocation11 + $0xc0] sm:$0xff] }
 0x33f   :  { %4775 = vmatpush1.bf16.msra.mxu1 %v4774_v48  ;;  %4521 = vmatprep.subr.bf16.mxu0 %v4520_v50  ;;  %v1689_v48 = vld [vmem:[#allocation8 + $0x1ea0] sm:$0xff]  ;;  %v2975_v22 = vld [vmem:[#allocation11 + $0x1c0] sm:$0xff]  ;;  %v2977_v18 = vld [vmem:[#allocation11 + $0x1d0] sm:$0xff] }
 0x340   :  { %4777 = vmatprep.subr.bf16.mxu1 %v4776_v52  ;;  %v1697_v50 = vld [vmem:[#allocation8 + $0x1ee0] sm:$0xff]  ;;  %v1706_v52 = vld [vmem:[#allocation8 + $0x1f28] sm:$0xff] }
 0x341   :  { %v4538_v32 = vpack.c.bf16 %v1697_v50, %v1689_v48  ;;  %v2921_v48 = vld [vmem:[#allocation11 + $0x10] sm:$0xff]  ;;  %v2922_v50 = vld [vmem:[#allocation11 + $0x18] sm:$0xff] }
 0x342   :  { %4523 = vmatpush1.bf16.msra.mxu0 %v4522_v58  ;;  %v4540_v58 = vpack.c.bf16 %v1714_v53, %v1706_v52  ;;  %v2939_v52 = vld [vmem:[#allocation11 + $0xa0] sm:$0xff]  ;;  %v2940_v53 = vld [vmem:[#allocation11 + $0xa8] sm:$0xff] }
 0x343   :  { %4779 = vmatpush1.bf16.msra.mxu1 %v4778_v55  ;;  %4525 = vmatprep.subr.bf16.mxu0 %v4524_v59  ;;  %v1705_v55 = vld [vmem:[#allocation8 + $0x1f20] sm:$0xff] }
 0x344   :  { %4781 = vmatprep.subr.bf16.mxu1 %v4780_v0  ;;  %v1713_v59 = vld [vmem:[#allocation8 + $0x1f60] sm:$0xff]  ;;  %v1722_v0 = vld [vmem:[#allocation8 + $0x1fa8] sm:$0xff] }
 0x345   :  { %v4542_v6 = vpack.c.bf16 %v1713_v59, %v1705_v55  ;;  %v4812_v55 = vpack.c.bf16 %v2940_v53, %v2939_v52  ;;  %v2923_v59 = vld [vmem:[#allocation11 + $0x20] sm:$0xff]  ;;  %v2980_v52 = vld [vmem:[#allocation11 + $0x1e8] sm:$0xff] }
 0x346   :  { %4527 = vmatpush1.bf16.msra.mxu0 %v4526_v38  ;;  %v4798_v38 = vpack.c.bf16 %v1715_v62, %v1707_v60  ;;  %v2924_v60 = vld [vmem:[#allocation11 + $0x28] sm:$0xff] }
 0x347   :  { %4783 = vmatpush1.bf16.msra.mxu1 %v4782_v9  ;;  %4529 = vmatprep.subr.bf16.mxu0 %v4528_v10  ;;  %v4544_v9 = vpack.c.bf16 %v1730_v1, %v1722_v0  ;;  %v1721_v10 = vld [vmem:[#allocation8 + $0x1fa0] sm:$0xff]  ;;  %v2956_v0 = vld [vmem:[#allocation11 + $0x128] sm:$0xff]  ;;  %v2941_v1 = vld [vmem:[#allocation11 + $0xb0] sm:$0xff] }
 0x348   :  { %4785 = vmatprep.subr.bf16.mxu1 %v4784_v20  ;;  %v1731_v20 = vld [vmem:[#allocation8 + $0x1ff0] sm:$0xff] }
 0x34a   :  { %4531 = vmatpush1.bf16.msra.mxu0 %v4530_v21  ;;  %v1750_v21 = vrot.slane %v5452_v5, %v391_v12  ;;  %v4806_v12 = vpack.c.bf16 %v2920_v31, %v2919_v30  ;;  %v2959_v30 = vld [vmem:[#allocation11 + $0x140] sm:$0xff] }
 0x34b   :  { %4787 = vmatpush1.bf16.msra.mxu1 %v4786_v27  ;;  %4533 = vmatprep.subr.bf16.mxu0 %v4532_v28  ;;  %v4546_v27 = vpack.c.bf16 %v1729_v17, %v1721_v10  ;;  %v4802_v28 = vpack.c.bf16 %v1731_v20, %v1723_v11  ;;  %v2925_v10 = vld [vmem:[#allocation11 + $0x30] sm:$0xff]  ;;  %v2926_v17 = vld [vmem:[#allocation11 + $0x38] sm:$0xff] }
 0x34c   :  { %4789 = vmatprep.subr.bf16.mxu1 %v4788_v33  ;;  %v4836_v33 = vpack.c.bf16 %v2968_v26, %v2967_v23  ;;  %v4935_v44 = vadd.f32 %v5450_v7, %v1750_v21  ;;  %v2971_v7 = vld [vmem:[#allocation11 + $0x1a0] sm:$0xff]  ;;  %v2957_v11 = vld [vmem:[#allocation11 + $0x130] sm:$0xff]  ;;  %v2958_v20 = vld [vmem:[#allocation11 + $0x138] sm:$0xff]  ;;  %v4818_v26 = vpack.c.bf16 %v2926_v17, %v2925_v10 }
 0x34d   :  { %v4844_v62 = vpack.c.bf16 %v2972_v56, %v2971_v7  ;;  %v2976_v23 = vld [vmem:[#allocation11 + $0x1c8] sm:$0xff]  ;;  %v4850_v21 = vpack.c.bf16 %v2958_v20, %v2957_v11  ;;  %v2931_v7 = vld [vmem:[#allocation11 + $0x60] sm:$0xff]  ;;  %v2966_v10 = vld [vmem:[#allocation11 + $0x178] sm:$0xff] }
 0x34e   :  { %4535 = vmatpush1.bf16.msra.mxu0 %v4534_v45  ;;  %v2969_v45 = vld [vmem:[#allocation11 + $0x190] sm:$0xff]  ;;  %v4852_v31 = vpack.c.bf16 %v2976_v23, %v2975_v22  ;;  %v2932_v56 = vld [vmem:[#allocation11 + $0x68] sm:$0xff]  ;;  %v2999_v17 = vld [vmem:[#allocation11 + $0x280] sm:$0xff] }
 0x34f   :  { %4791 = vmatpush1.bf16.msra.mxu1 %v4790_v46  ;;  %4537 = vmatprep.subr.bf16.mxu0 %v4536_v47  ;;  %v2970_v46 = vld [vmem:[#allocation11 + $0x198] sm:$0xff]  ;;  %v4838_v47 = vpack.c.bf16 %v2952_v41, %v2951_v39  ;;  %v2945_v39 = vld [vmem:[#allocation11 + $0xd0] sm:$0xff]  ;;  %v3000_v11 = vld [vmem:[#allocation11 + $0x288] sm:$0xff] }
 0x350   :  { %4793 = vmatprep.subr.bf16.mxu1 %v4792_v51  ;;  %v4808_v51 = vpack.c.bf16 %v2938_v43, %v2937_v8  ;;  %v4840_v54 = vpack.c.bf16 %v2970_v46, %v2969_v45  ;;  %v2946_v41 = vld [vmem:[#allocation11 + $0xd8] sm:$0xff]  ;;  %v2929_v45 = vld [vmem:[#allocation11 + $0x50] sm:$0xff]  ;;  %v3032_v20 = vld [vmem:[#allocation11 + $0x388] sm:$0xff]  ;;  %v4868_v22 = vpack.c.bf16 %v3000_v11, %v2999_v17 }
 0x351   :  { %v2978_v8 = vld [vmem:[#allocation11 + $0x1d8] sm:$0xff]  ;;  %v2983_v23 = vld [vmem:[#allocation11 + $0x200] sm:$0xff] }
 0x352   :  { %4539 = vmatpush1.bf16.msra.mxu0 %v4538_v32  ;;  %v2914_v32 = vmax.f32 %v4935_v44, 0.0  ;;  %v2930_v46 = vld [vmem:[#allocation11 + $0x58] sm:$0xff]  ;;  %v2991_v11 = vld [vmem:[#allocation11 + $0x240] sm:$0xff] }
 0x353   :  { %4795 = vmatpush1.bf16.msra.mxu1 %v4794_v57  ;;  %4541 = vmatprep.subr.bf16.mxu0 %v4540_v58  ;;  %v4810_v57 = vpack.c.bf16 %v2922_v50, %v2921_v48  ;;  %v4842_v58 = vpack.c.bf16 %v2954_v37, %v2953_v25  ;;  %v4856_v48 = vpack.c.bf16 %v2978_v8, %v2977_v18  ;;  %v2962_v50 = vld [vmem:[#allocation11 + $0x158] sm:$0xff]  ;;  %v2947_v25 = vld [vmem:[#allocation11 + $0xe0] sm:$0xff]  ;;  %v2985_v8 = vld [vmem:[#allocation11 + $0x210] sm:$0xff] }
 0x354   :  { %4797 = vmatprep.subr.bf16.mxu1 %v4796_v61  ;;  %v2955_v61 = vld [vmem:[#allocation11 + $0x120] sm:$0xff]  ;;  %v4826_v53 = vpack.c.bf16 %v2930_v46, %v2929_v45  ;;  %v3018_v45 = vld [vmem:[#allocation11 + $0x318] sm:$0xff] }
 0x355   :  { %v2979_v37 = vld [vmem:[#allocation11 + $0x1e0] sm:$0xff] }
 0x356   :  { %4543 = vmatpush1.bf16.msra.mxu0 %v4542_v6  ;;  %v2974_v6 = vld [vmem:[#allocation11 + $0x1b8] sm:$0xff]  ;;  %v3003_v46 = vld [vmem:[#allocation11 + $0x2a0] sm:$0xff] }
 0x357   :  { %4799 = vmatpush1.bf16.msra.mxu1 %v4798_v38  ;;  %4545 = vmatprep.subr.bf16.mxu0 %v4544_v9  ;;  %v4846_v38 = vpack.c.bf16 %v2956_v0, %v2955_v61  ;;  %v4816_v9 = vpack.c.bf16 %v2942_v4, %v2941_v1  ;;  %v2982_v61 = vld [vmem:[#allocation11 + $0x1f8] sm:$0xff]  ;;  %v1738_v0 = vrot.slane %v5452_v5, %v379_v16 }
 0x358   :  { %4801 = vmatprep.subr.bf16.mxu1 %v4800_v13  ;;  %v4848_v13 = vpack.c.bf16 %v2974_v6, %v2973_v35  ;;  %v2933_v35 = vld [vmem:[#allocation11 + $0x70] sm:$0xff]  ;;  %v2934_v6 = vld [vmem:[#allocation11 + $0x78] sm:$0xff] }
 0x359   :  { %v4834_v16 = vpack.c.bf16 %v2934_v6, %v2933_v35  ;;  %v3007_v35 = vld [vmem:[#allocation11 + $0x2c0] sm:$0xff]  ;;  %v3008_v6 = vld [vmem:[#allocation11 + $0x2c8] sm:$0xff] }
 0x35a   :  { %4547 = vmatpush1.bf16.msra.mxu0 %v4546_v27  ;;  %v4820_v27 = vpack.c.bf16 %v2944_v19, %v2943_v42  ;;  %v4932_v42 = vadd.f32 %v5444_v2, %v1738_v0  ;;  %v3021_v0 = vld [vmem:[#allocation11 + $0x330] sm:$0xff]  ;;  %v4884_v17 = vpack.c.bf16 %v3008_v6, %v3007_v35 }
 0x35b   :  { %4803 = vmatpush1.bf16.msra.mxu1 %v4802_v28  ;;  %4805 = vmatprep.subr.bf16.mxu0 %v4804_v29  ;;  %v2927_v28 = vld [vmem:[#allocation11 + $0x40] sm:$0xff]  ;;  %v2928_v29 = vld [vmem:[#allocation11 + $0x48] sm:$0xff] }
 0x35c   :  { %4837 = vmatprep.subr.bf16.mxu1 %v4836_v33  ;;  %v2960_v33 = vld [vmem:[#allocation11 + $0x148] sm:$0xff]  ;;  %v4822_v43 = vpack.c.bf16 %v2928_v29, %v2927_v28  ;;  %v3001_v29 = vld [vmem:[#allocation11 + $0x290] sm:$0xff] }
 0x35d   :  { %2621 = vmatmul.mubr.f32.vlgmr.msra.gmra.mrb[6].mxu0 %v5426_v15  ;;  %v4854_v44 = vpack.c.bf16 %v2960_v33, %v2959_v30  ;;  %v3016_v28 = vld [vmem:[#allocation11 + $0x308] sm:$0xff]  ;;  %v3002_v30 = vld [vmem:[#allocation11 + $0x298] sm:$0xff] }
 0x35e   :  { %2905 = vmatmul.mubr.f32.vlgmr.msra.gmra.mrb[6].mxu1 %v5426_v15  ;;  %4807 = vmatpush3.bf16.msra.mxu0 %v4806_v12  ;;  %v4814_v15 = vpack.c.bf16 %v2924_v60, %v2923_v59  ;;  %v4824_v12 = vpack.c.bf16 %v2946_v41, %v2945_v39  ;;  %v2950_v59 = vld [vmem:[#allocation11 + $0xf8] sm:$0xff]  ;;  %v2981_v60 = vld [vmem:[#allocation11 + $0x1f0] sm:$0xff]  ;;  %v2911_v41 = vmax.f32 %v4932_v42, 0.0  ;;  %v4872_v18 = vpack.c.bf16 %v3002_v30, %v3001_v29  ;;  %v3024_v42 = vld [vmem:[#allocation11 + $0x348] sm:$0xff] }
 0x35f   :  { %3118 = vmatprep.mubr.f32.mxu0 %v2912_v63  ;;  %4839 = vmatpush3.bf16.msra.mxu1 %v4838_v47  ;;  %v2961_v47 = vld [vmem:[#allocation11 + $0x150] sm:$0xff]  ;;  %v3034_v33 = vld [vmem:[#allocation11 + $0x398] sm:$0xff] }
 0x360   :  { %3188 = vmatprep.mubr.f32.mxu1 %v2914_v32  ;;  %4809 = vmatprep.subr.bf16.mxu0 %v4808_v51  ;;  %v2948_v51 = vld [vmem:[#allocation11 + $0xe8] sm:$0xff]  ;;  %v4858_v63 = vpack.c.bf16 %v2962_v50, %v2961_v47  ;;  %v2963_v32 = vld [vmem:[#allocation11 + $0x160] sm:$0xff]  ;;  %v2994_v29 = vld [vmem:[#allocation11 + $0x258] sm:$0xff] }
 0x361   :  { %4841 = vmatprep.subr.bf16.mxu1 %v4840_v54  ;;  %v4828_v54 = vpack.c.bf16 %v2948_v51, %v2947_v25  ;;  %v3004_v47 = vld [vmem:[#allocation11 + $0x2a8] sm:$0xff]  ;;  %v3025_v30 = vld [vmem:[#allocation11 + $0x350] sm:$0xff] }
 0x362   :  { %4811 = vmatpush3.bf16.msra.mxu0 %v4810_v57  ;;  %v4860_v57 = vpack.c.bf16 %v2980_v52, %v2979_v37  ;;  %v3036_v50 = vld [vmem:[#allocation11 + $0x3a8] sm:$0xff]  ;;  %v4876_v37 = vpack.c.bf16 %v3004_v47, %v3003_v46  ;;  %v2987_v52 = vld [vmem:[#allocation11 + $0x220] sm:$0xff] }
 0x363   :  { %4843 = vmatpush3.bf16.msra.mxu1 %v4842_v58  ;;  %4813 = vmatprep.subr.bf16.mxu0 %v4812_v55  ;;  %v2964_v58 = vld [vmem:[#allocation11 + $0x168] sm:$0xff]  ;;  %v2949_v55 = vld [vmem:[#allocation11 + $0xf0] sm:$0xff]  ;;  %v3027_v46 = vld [vmem:[#allocation11 + $0x360] sm:$0xff] }
 0x364   :  { %4845 = vmatprep.subr.bf16.mxu1 %v4844_v62  ;;  %v4830_v62 = vpack.c.bf16 %v2932_v56, %v2931_v7  ;;  %v4862_v1 = vpack.c.bf16 %v2964_v58, %v2963_v32  ;;  %v4832_v4 = vpack.c.bf16 %v2950_v59, %v2949_v55  ;;  %v3020_v7 = vld [vmem:[#allocation11 + $0x328] sm:$0xff]  ;;  %v3005_v56 = vld [vmem:[#allocation11 + $0x2b0] sm:$0xff]  ;;  %v3006_v32 = vld [vmem:[#allocation11 + $0x2b8] sm:$0xff] }
 0x365   :  { %v3038_v58 = vld [vmem:[#allocation11 + $0x3b8] sm:$0xff] }
 0x366   :  { %4815 = vmatpush3.bf16.msra.mxu0 %v4814_v15  ;;  %v2965_v15 = vld [vmem:[#allocation11 + $0x170] sm:$0xff] }
 0x367   :  { %4847 = vmatpush3.bf16.msra.mxu1 %v4846_v38  ;;  %4817 = vmatprep.subr.bf16.mxu0 %v4816_v9  ;;  %v1746_v38 = vrot.slane %v5452_v5, %v387_v24  ;;  %v4864_v9 = vpack.c.bf16 %v2982_v61, %v2981_v60  ;;  %v4866_v19 = vpack.c.bf16 %v2966_v10, %v2965_v15  ;;  %v2989_v61 = vld [vmem:[#allocation11 + $0x230] sm:$0xff]  ;;  %v3039_v15 = vld [vmem:[#allocation11 + $0x3c0] sm:$0xff] }
 0x368   :  { %4849 = vmatprep.subr.bf16.mxu1 %v4848_v13  ;;  %v3031_v13 = vld [vmem:[#allocation11 + $0x380] sm:$0xff]  ;;  %v4880_v60 = vpack.c.bf16 %v3006_v32, %v3005_v56  ;;  %v3029_v32 = vld [vmem:[#allocation11 + $0x370] sm:$0xff] }
 0x369   :  { %v4934_v24 = vadd.f32 %v5446_v3, %v1746_v38  ;;  %v3040_v38 = vld [vmem:[#allocation11 + $0x3c8] sm:$0xff] }
 0x36a   :  { %4819 = vmatpush3.bf16.msra.mxu0 %v4818_v26  ;;  %v2984_v26 = vld [vmem:[#allocation11 + $0x208] sm:$0xff] }
 0x36b   :  { %4851 = vmatpush3.bf16.msra.mxu1 %v4850_v21  ;;  %4821 = vmatprep.subr.bf16.mxu0 %v4820_v27  ;;  %v3015_v21 = vld [vmem:[#allocation11 + $0x300] sm:$0xff]  ;;  %v4900_v27 = vpack.c.bf16 %v3032_v20, %v3031_v13  ;;  %v4870_v39 = vpack.c.bf16 %v2984_v26, %v2983_v23  ;;  %v2992_v13 = vld [vmem:[#allocation11 + $0x248] sm:$0xff]  ;;  %v3041_v23 = vld [vmem:[#allocation11 + $0x3d0] sm:$0xff] }
 0x36c   :  { %4853 = vmatprep.subr.bf16.mxu1 %v4852_v31  ;;  %v3033_v31 = vld [vmem:[#allocation11 + $0x390] sm:$0xff]  ;;  %v4902_v2 = vpack.c.bf16 %v3016_v28, %v3015_v21  ;;  %v3023_v20 = vld [vmem:[#allocation11 + $0x340] sm:$0xff]  ;;  %v3042_v26 = vld [vmem:[#allocation11 + $0x3d8] sm:$0xff]  ;;  %v4886_v21 = vpack.c.bf16 %v2992_v13, %v2991_v11 }
 0x36d   :  { %v4904_v3 = vpack.c.bf16 %v3034_v33, %v3033_v31  ;;  %v2993_v28 = vld [vmem:[#allocation11 + $0x250] sm:$0xff]  ;;  %v4920_v31 = vpack.c.bf16 %v3042_v26, %v3041_v23  ;;  %v3026_v33 = vld [vmem:[#allocation11 + $0x358] sm:$0xff] }
 0x36e   :  { %4823 = vmatpush3.bf16.msra.mxu0 %v4822_v43  ;;  %v2986_v43 = vld [vmem:[#allocation11 + $0x218] sm:$0xff] }
 0x36f   :  { %4855 = vmatpush3.bf16.msra.mxu1 %v4854_v44  ;;  %4825 = vmatprep.subr.bf16.mxu0 %v4824_v12  ;;  %v3017_v44 = vld [vmem:[#allocation11 + $0x310] sm:$0xff]  ;;  %v2913_v12 = vmax.f32 %v4934_v24, 0.0  ;;  %v4874_v25 = vpack.c.bf16 %v2986_v43, %v2985_v8  ;;  %v4918_v24 = vpack.c.bf16 %v3024_v42, %v3023_v20  ;;  %v4890_v8 = vpack.c.bf16 %v2994_v29, %v2993_v28 }
 0x370   :  { %4857 = vmatprep.subr.bf16.mxu1 %v4856_v48  ;;  %v3035_v48 = vld [vmem:[#allocation11 + $0x3a0] sm:$0xff]  ;;  %v4906_v51 = vpack.c.bf16 %v3018_v45, %v3017_v44  ;;  %v4922_v43 = vpack.c.bf16 %v3026_v33, %v3025_v30  ;;  %v2996_v45 = vld [vmem:[#allocation11 + $0x268] sm:$0xff] }
 0x372   :  { %4827 = vmatpush3.bf16.msra.mxu0 %v4826_v53  ;;  %v2988_v53 = vld [vmem:[#allocation11 + $0x228] sm:$0xff] }
 0x373   :  { %4859 = vmatpush3.bf16.msra.mxu1 %v4858_v63  ;;  %4829 = vmatprep.subr.bf16.mxu0 %v4828_v54  ;;  %v3019_v63 = vld [vmem:[#allocation11 + $0x320] sm:$0xff]  ;;  %v4908_v54 = vpack.c.bf16 %v3036_v50, %v3035_v48  ;;  %v4878_v55 = vpack.c.bf16 %v2988_v53, %v2987_v52  ;;  %v3028_v48 = vld [vmem:[#allocation11 + $0x368] sm:$0xff]  ;;  %v3046_v53 = vld [vmem:[#allocation11 + $0x3f8] sm:$0xff] }
 0x374   :  { %4861 = vmatprep.subr.bf16.mxu1 %v4860_v57  ;;  %v3037_v57 = vld [vmem:[#allocation11 + $0x3b0] sm:$0xff]  ;;  %v4910_v59 = vpack.c.bf16 %v3020_v7, %v3019_v63  ;;  %v4926_v50 = vpack.c.bf16 %v3028_v48, %v3027_v46 }
 0x375   :  { %v2997_v63 = vld [vmem:[#allocation11 + $0x270] sm:$0xff] }
 0x376   :  { %4831 = vmatpush3.bf16.msra.mxu0 %v4830_v62  ;;  %v2990_v62 = vld [vmem:[#allocation11 + $0x238] sm:$0xff] }
 0x377   :  { %4863 = vmatpush3.bf16.msra.mxu1 %v4862_v1  ;;  %4833 = vmatprep.subr.bf16.mxu0 %v4832_v4  ;;  %v4912_v1 = vpack.c.bf16 %v3038_v58, %v3037_v57  ;;  %v3022_v4 = vld [vmem:[#allocation11 + $0x338] sm:$0xff] }
 0x378   :  { %4865 = vmatprep.subr.bf16.mxu1 %v4864_v9  ;;  %v4882_v9 = vpack.c.bf16 %v2990_v62, %v2989_v61  ;;  %v4914_v10 = vpack.c.bf16 %v3022_v4, %v3021_v0  ;;  %v3030_v57 = vld [vmem:[#allocation11 + $0x378] sm:$0xff]  ;;  %v1766_v61 = vrot.slane %v5452_v5, %v407_v34 }
 0x379   :  { %v4930_v58 = vpack.c.bf16 %v3030_v57, %v3029_v32 }
 0x37a   :  { %4835 = vmatpush3.bf16.msra.mxu0 %v4834_v16  ;;  %v4916_v16 = vpack.c.bf16 %v3040_v38, %v3039_v15 }
 0x37b   :  { %4867 = vmatpush3.bf16.msra.mxu1 %v4866_v19  ;;  %4869 = vmatprep.subr.bf16.mxu0 %v4868_v22  ;;  %v3009_v19 = vld [vmem:[#allocation11 + $0x2d0] sm:$0xff]  ;;  %v3010_v22 = vld [vmem:[#allocation11 + $0x2d8] sm:$0xff] }
 0x37c   :  { %4901 = vmatprep.subr.bf16.mxu1 %v4900_v27  ;;  %v4888_v27 = vpack.c.bf16 %v3010_v22, %v3009_v19 }
 0x37d   :  { %3119 = vmatmul.mubr.f32.vlgmr.msra.gmra.mrb[8].mxu0 %v2911_v41  ;;  %v3012_v41 = vld [vmem:[#allocation11 + $0x2e8] sm:$0xff] }
 0x37e   :  { %3189 = vmatmul.mubr.f32.vlgmr.msra.gmra.mrb[8].mxu1 %v2913_v12  ;;  %4871 = vmatpush3.bf16.msra.mxu0 %v4870_v39  ;;  %v3011_v39 = vld [vmem:[#allocation11 + $0x2e0] sm:$0xff] }
 0x37f   :  { %4903 = vmatpush3.bf16.msra.mxu1 %v4902_v2  ;;  %4873 = vmatprep.subr.bf16.mxu0 %v4872_v18  ;;  %v3043_v2 = vld [vmem:[#allocation11 + $0x3e0] sm:$0xff]  ;;  %v3044_v18 = vld [vmem:[#allocation11 + $0x3e8] sm:$0xff]  ;;  %v4892_v44 = vpack.c.bf16 %v3012_v41, %v3011_v39 }
 0x380   :  { %4905 = vmatprep.subr.bf16.mxu1 %v4904_v3  ;;  %v4924_v12 = vpack.c.bf16 %v3044_v18, %v3043_v2  ;;  %v2995_v3 = vld [vmem:[#allocation11 + $0x260] sm:$0xff] }
 0x381   :  { %v4894_v47 = vpack.c.bf16 %v2996_v45, %v2995_v3 }
 0x382   :  { %4875 = vmatpush3.bf16.msra.mxu0 %v4874_v25  ;;  %v3013_v25 = vld [vmem:[#allocation11 + $0x2f0] sm:$0xff] }
 0x383   :  { %4907 = vmatpush3.bf16.msra.mxu1 %v4906_v51  ;;  %4877 = vmatprep.subr.bf16.mxu0 %v4876_v37  ;;  %v3014_v51 = vld [vmem:[#allocation11 + $0x2f8] sm:$0xff]  ;;  %v3045_v37 = vld [vmem:[#allocation11 + $0x3f0] sm:$0xff] }
 0x384   :  { %4909 = vmatprep.subr.bf16.mxu1 %v4908_v54  ;;  %v4896_v52 = vpack.c.bf16 %v3014_v51, %v3013_v25  ;;  %v2998_v54 = vld [vmem:[#allocation11 + $0x278] sm:$0xff]  ;;  %v4928_v7 = vpack.c.bf16 %v3046_v53, %v3045_v37 }
 0x385   :  { %v4898_v56 = vpack.c.bf16 %v2998_v54, %v2997_v63 }
 0x386   :  { %4879 = vmatpush3.bf16.msra.mxu0 %v4878_v55  ;;  %v1754_v55 = vrot.slane %v5452_v5, %v395_v14 }
 0x387   :  { %4911 = vmatpush3.bf16.msra.mxu1 %v4910_v59  ;;  %4881 = vmatprep.subr.bf16.mxu0 %v4880_v60  ;;  %v1762_v59 = vrot.slane %v5452_v5, %v403_v36  ;;  %v1758_v60 = vrot.slane %v5452_v5, %v399_v40 }
 0x388   :  { %4913 = vmatprep.subr.bf16.mxu1 %v4912_v1 }
 0x38a   :  { %4883 = vmatpush3.bf16.msra.mxu0 %v4882_v9 }
 0x38b   :  { %4915 = vmatpush3.bf16.msra.mxu1 %v4914_v10  ;;  %4885 = vmatprep.subr.bf16.mxu0 %v4884_v17  ;;  %v3383_v17 = vld [vmem:[#allocation13] ss:$0 sm:$0xff] }
 0x38c   :  { %4917 = vmatprep.subr.bf16.mxu1 %v4916_v16 }
 0x38e   :  { %4887 = vmatpush3.bf16.msra.mxu0 %v4886_v21 }
 0x38f   :  { %4919 = vmatpush3.bf16.msra.mxu1 %v4918_v24  ;;  %4889 = vmatprep.subr.bf16.mxu0 %v4888_v27 }
 0x390   :  { %4921 = vmatprep.subr.bf16.mxu1 %v4920_v31 }
 0x392   :  { %4891 = vmatpush3.bf16.msra.mxu0 %v4890_v8 }
 0x393   :  { %4923 = vmatpush3.bf16.msra.mxu1 %v4922_v43  ;;  %4893 = vmatprep.subr.bf16.mxu0 %v4892_v44 }
 0x394   :  { %4925 = vmatprep.subr.bf16.mxu1 %v4924_v12 }
 0x396   :  { %4895 = vmatpush3.bf16.msra.mxu0 %v4894_v47 }
 0x397   :  { %4927 = vmatpush3.bf16.msra.mxu1 %v4926_v50  ;;  %4897 = vmatprep.subr.bf16.mxu0 %v4896_v52 }
 0x398   :  { %4929 = vmatprep.subr.bf16.mxu1 %v4928_v7 }
 0x39a   :  { %4899 = vmatpush3.bf16.msra.mxu0 %v4898_v56 }
 0x39b   :  { %4931 = vmatpush3.bf16.msra.mxu1 %v4930_v58 }
 0x430   :  { %v2622_v62 = vpop.f32.mrb[6].mxu0 }
 0x431   :  { %v4936_v0 = vadd.f32 %v2622_v62, %v1754_v55  ;;  %v2906_v1 = vpop.f32.mrb[6].mxu1  ;;  %v2624_v4 = vpop.f32.mrb[7].mxu0 }
 0x432   :  { %v4938_v35 = vadd.f32 %v2906_v1, %v1762_v59  ;;  %v4937_v6 = vadd.f32 %v2624_v4, %v1758_v60  ;;  %v2908_v15 = vpop.f32.mrb[7].mxu1 }
 0x433   :  { %v4939_v14 = vadd.f32 %v2908_v15, %v1766_v61  ;;  %v2915_v9 = vmax.f32 %v4936_v0, 0.0 }
 0x434   :  { %v2916_v38 = vmax.f32 %v4937_v6, 0.0  ;;  %v2917_v36 = vmax.f32 %v4938_v35, 0.0 }
 0x435   :  { %v2918_v10 = vmax.f32 %v4939_v14, 0.0 }
 0x436   :  { %3258 = vmatprep.mubr.f32.mxu0 %v2916_v38 }
 0x437   :  { %3328 = vmatprep.mubr.f32.mxu1 %v2918_v10  ;;  %3259 = vmatmul.mubr.f32.vlgmr.msra.gmra.mrb[10].mxu0 %v2915_v9 }
 0x438   :  { %3329 = vmatmul.mubr.f32.vlgmr.msra.gmra.mrb[10].mxu1 %v2917_v36 }
 0x450   :  { %v3416_v40 = vpop.f32.mrb[8].mxu0 }
 0x451   :  { %v3451_v49 = vpop.f32.mrb[8].mxu1  ;;  %v3417_v34 = vpop.f32.mrb[9].mxu0 }
 0x452   :  { %v3418_v5 = vadd.f32 %v3417_v34, %v3416_v40  ;;  %v3452_v11 = vpop.f32.mrb[9].mxu1 }
 0x453   :  { %v3453_v13 = vadd.f32 %v3452_v11, %v3451_v49 }
 0x454   :  { %v3121_v20 = vadd.f32 %v3418_v5, %v3383_v17 }
 0x456   :  { %v3191_v16 = vadd.f32 %v3453_v13, %v3121_v20 }
 0x50a   :  { %v3486_v42 = vpop.f32.mrb[10].mxu0 }
 0x50b   :  { %v3521_v19 = vpop.f32.mrb[10].mxu1  ;;  %v3487_v22 = vpop.f32.mrb[11].mxu0 }
 0x50c   :  { %v3488_v23 = vadd.f32 %v3487_v22, %v3486_v42  ;;  %v3522_v26 = vpop.f32.mrb[11].mxu1 }
 0x50d   :  { %v3523_v21 = vadd.f32 %v3522_v26, %v3521_v19 }
 0x50e   :  { %v3261_v24 = vadd.f32 %v3488_v23, %v3191_v16 }
 0x510   :  { %v3331_v27 = vadd.f32 %v3523_v21, %v3261_v24 }
 0x512   :  { %v3335_v28 = vand.u32 2147483647, %v3331_v27  ;;  %3345 = vst.msk [vmem:[#allocation14] sm:$0xff] %vm3344_vm0, %v3331_v27 }
 0x514   :  { %v3336_v29 = vsub.f32 0.0, %v3335_v28 }
 0x516   :  { %v3337_v30 = vmul.f32 1.442695, %v3336_v29 }
 0x518   :  { %4977 = vpow2.f32 %v3337_v30 }
 0x522   :  { %v4978_v31 = vpop.eup %4977 }
 0x523   :  { %v3339_v33 = vadd.f32 1.0, %v4978_v31 }
 0x525   :  { %4979 = vlog2.f32 %v3339_v33 }
 0x526   :  { %5147 = shalt.err (!%p5144_p4)
}
 0x527   :  { %s5148_s24 = scalar_lea.hbm %s5518_s7, 128 }
 0x528   :  { %p5149_p5 = scmp.ne.s32.totalorder %s5518_s7, %s5148_s24  ;;  %p5152_p6 = scmp.lt.u32.totalorder %s5148_s24, %s5518_s7 }
 0x52a   :  { %p5154_p7 = pnand %p5152_p6, %p5149_p5 }
 0x52c   :  { %5157 = shalt.err (!%p5154_p7)
}
 0x52d   :  { %3360 = dma.vmem_to_hbm [thread:$0]  %s3358_s0, 128, %s5518_s7, [#allocation4]   ;;  %v3334_v41 = vmax.f32 %v3331_v27, 0.0 }
 0x52e   :  { %s5204_s9 = smov [#allocation15]  }
 0x52f   :  { %v4980_v39 = vpop.eup %4979  ;;  %s3367_s10 = sshll.u32 %s5204_s9, 4  ;;  %s3368_s10 = int_to_ptr.vmem [resolvable:$true] %s3367_s10 }
 0x530   :  { %v3341_v2 = vmul.f32 0.6931472, %v4980_v39  ;;  %s5158_s2 = scalar_lea.vmem %s3368_s10, 128  ;;  %p5163_p9 = scmp.lt.s32.totalorder %s3368_s10, %s3368_s10 }
 0x531   :  { %p5159_p8 = scmp.ne.s32.totalorder %s3368_s10, %s5158_s2  ;;  %p5164_p10 = scmp.lt.s32.totalorder %s5158_s2, %s5158_s2 }
 0x532   :  { %v3342_v18 = vadd.f32 %v3341_v2, %v3334_v41 }
 0x533   :  { %p5165_p11 = por %p5164_p10, %p5163_p9 }
 0x534   :  { %v3343_v8 = vadd.f32 1e-07, %v3342_v18 }
 0x535   :  { %p5166_p12 = pnand %p5165_p11, %p5159_p8 }
 0x536   :  { %3347 = vrot.lane.b32.xlu0 %v3343_v8, %s5194_s16 }
 0x5a8   :  { %v3348_v43 = vpop.permute.xlu0 %3347 }
 0x5a9   :  { %3350 = vst.msk [vmem:[#allocation15] sm:$0xff] %vm3344_vm0, %v3348_v43 }
 0x5aa   :  { %5169 = shalt.err (!%p5166_p12)
}
 0x5ab   :  { %s5170_s5 = scalar_lea.hbm %s5519_s8, 128 }
 0x5ac   :  { %p5171_p13 = scmp.ne.s32.totalorder %s5519_s8, %s5170_s5  ;;  %p5174_p0 = scmp.lt.u32.totalorder %s5170_s5, %s5519_s8 }
 0x5ae   :  { %p5176_p1 = pnand %p5174_p0, %p5171_p13 }
 0x5b0   :  { %5179 = shalt.err (!%p5176_p1)
}
 0x5b1   :  { %3370 = dma.vmem_to_hbm [thread:$0]  %s3368_s10, 128, %s5519_s8, [#allocation16]  }
 0x5b2   :  { %5188 = dma.done.wait [#allocation4], 128  }
 0x5b3   :  { %5189 = vsyncadd [#allocation4], 4294967168 }
 0x5b4   :  { %5190 = dma.done.wait [#allocation16], 128  }
 0x5b5   :  { %5191 = vsyncadd [#allocation16], 4294967168 }
 0x5b6   :  { %3377 = vsyncpa [#allocation3], 1 }
 0x5b7   :  { %3378 = vsyncpa [#allocation6], 1 }
 0x5b8   :  { %3379 = vsyncpa [#allocation9], 1 }
 0x5b9   :  { %3380 = vsyncpa [#allocation12], 1 }
 0x5ba   :  { %3381 = vsyncpa [#allocation4], 1 }
 0x5bb   :  { %3382 = vsyncpa [#allocation16], 1 }

</bundles_post_ra>
